<compile_context>
chip_gen: v5e
topology: v5e:2x2
jax: 0.10.0
libtpu: 0.0.40
codegen_flags: <defaults>
</compile_context>

<pallas_src>
import functools

import jax
import jax.numpy as jnp
from jax import lax
from jax.experimental import pallas as pl
from jax.experimental.pallas import tpu as pltpu


# ----------------------------------------------------------------------------
# Fused Pallas kernel
# ----------------------------------------------------------------------------
def _decoder_kernel(S, B, H, L, *refs):
    """Fused bidirectional multi-layer LSTM + FC head (single invocation, no grid).

    Inputs (VMEM):
      x       (S*B, 1)  f32   time-major input column
      h0, c0  (2L, B, H) f32
      wih0    (1, 8H)   f32   layer-0 packed input weights (i/f/o cols pre-scaled 0.5)
      wih_rest(L-1, 2H, 8H) bf16   (only if L > 1)
      whh     (L, 2H, 8H) bf16     block-diagonal per layer
      b       (L, 1, 8H) f32
      wfc     (2H, Opad) bf16
      bfc     (1, Opad) f32
    Outputs: pred (S*B, Opad) f32, hT (2L,B,H) f32, cT (2L,B,H) f32
    Scratch: y_fwd (S*B, H) f32, y_bwd (S*B, H) f32
    """
    x_ref, h0_ref, c0_ref, wih0_ref = refs[0], refs[1], refs[2], refs[3]
    i = 4
    if L > 1:
        wih_rest_ref = refs[i]
        i += 1
    whh_ref = refs[i + 0]
    b_ref = refs[i + 1]
    wfc_ref = refs[i + 2]
    bfc_ref = refs[i + 3]
    pred_ref = refs[i + 4]
    hT_ref = refs[i + 5]
    cT_ref = refs[i + 6]
    yf_ref = refs[i + 7]
    yb_ref = refs[i + 8]

    H4 = 4 * H
    H8 = 8 * H

    # Hoisted lane mask selecting the "g" gate columns (tanh) vs i/f/o
    # (sigmoid-via-tanh, the 0.5 input scale was folded into the weights).
    lane = lax.broadcasted_iota(jnp.int32, (B, H8), 1)
    g_mask = ((lane % H4) >= 2 * H) & ((lane % H4) < 3 * H)

    for l in range(L):
        b_l = b_ref[l]            # (1, 8H) f32
        whh_l = whh_ref[l]        # (2H, 8H) bf16, block-diagonal (fwd|bwd)

        # ---- hoisted input projection: one pass over the whole sequence
        if l == 0:
            # in_dim == 1 -> VPU broadcast multiply, keep f32 (off critical path)
            gx_all = x_ref[...] * wih0_ref[...] + b_l                 # (S*B, 8H)
        else:
            yf = yf_ref[...].astype(jnp.bfloat16)                     # (S*B, H)
            yb = yb_ref[...].astype(jnp.bfloat16)
            wih_l = wih_rest_ref[l - 1]                               # (2H, 8H) bf16
            gx_all = (jnp.dot(yf, wih_l[:H, :], preferred_element_type=jnp.float32)
                      + jnp.dot(yb, wih_l[H:, :], preferred_element_type=jnp.float32)
                      + b_l)                                          # (S*B, 8H)

        # ---- recurrence: both directions in one loop, states as register values
        h_f = h0_ref[2 * l + 0]                                       # (B, H)
        h_b = h0_ref[2 * l + 1]
        c_f = c0_ref[2 * l + 0]
        c_b = c0_ref[2 * l + 1]
        h_stack = jnp.concatenate([h_f, h_b], axis=1)                 # (B, 2H)

        for t in range(S):                # S small & static -> fully unrolled
            rf = t * B                    # forward reads/writes row t
            rb = (S - 1 - t) * B          # backward reads/writes row S-1-t
            pre = jnp.concatenate(
                [gx_all[rf:rf + B, :H4], gx_all[rb:rb + B, H4:]], axis=1)  # (B, 8H)
            gates = pre + jnp.dot(h_stack.astype(jnp.bfloat16), whh_l,
                                  preferred_element_type=jnp.float32)      # (B, 8H)

            tt = jnp.tanh(gates)                       # single EUP push for all gates
            act = jnp.where(g_mask, tt, 0.5 * tt + 0.5)

            i_f = act[:, 0 * H:1 * H]
            f_f = act[:, 1 * H:2 * H]
            g_f = act[:, 2 * H:3 * H]
            o_f = act[:, 3 * H:4 * H]
            i_b = act[:, H4 + 0 * H:H4 + 1 * H]
            f_b = act[:, H4 + 1 * H:H4 + 2 * H]
            g_b = act[:, H4 + 2 * H:H4 + 3 * H]
            o_b = act[:, H4 + 3 * H:H4 + 4 * H]

            c_f = f_f * c_f + i_f * g_f
            c_b = f_b * c_b + i_b * g_b
            c_stack = jnp.concatenate([c_f, c_b], axis=1)             # (B, 2H)
            o_stack = jnp.concatenate([o_f, o_b], axis=1)
            h_stack = o_stack * jnp.tanh(c_stack)      # one tanh(c) push per step
            h_f = h_stack[:, :H]
            h_b = h_stack[:, H:]

            # lane-dense stores at offset 0 (separate per-direction buffers)
            yf_ref[rf:rf + B, :] = h_f
            yb_ref[rb:rb + B, :] = h_b

        hT_ref[2 * l + 0] = h_f
        hT_ref[2 * l + 1] = h_b
        cT_ref[2 * l + 0] = c_f
        cT_ref[2 * l + 1] = c_b

    # ---- FC head fused on VMEM-resident last-layer activations (lane-dense output)
    yf = yf_ref[...].astype(jnp.bfloat16)
    yb = yb_ref[...].astype(jnp.bfloat16)
    wfc = wfc_ref[...]                                                # (2H, Opad) bf16
    pred_ref[...] = (jnp.dot(yf, wfc[:H, :], preferred_element_type=jnp.float32)
                     + jnp.dot(yb, wfc[H:, :], preferred_element_type=jnp.float32)
                     + bfc_ref[...])


# ----------------------------------------------------------------------------
# pallas_call wrapper
# ----------------------------------------------------------------------------
def _run_decoder(x_col, hidden, cell, packed, *, S, B, H, L):
    o_pad = packed["wfc"].shape[1]
    inputs = [x_col, hidden, cell, packed["wih0"]]
    if L > 1:
        inputs.append(packed["wih_rest"])
    inputs += [packed["whh"], packed["b"], packed["wfc"], packed["bfc"]]

    vmem = pl.BlockSpec(memory_space=pltpu.MemorySpace.VMEM)
    kernel = functools.partial(_decoder_kernel, S, B, H, L)
    return pl.pallas_call(
        kernel,
        out_shape=(
            jax.ShapeDtypeStruct((S * B, o_pad), jnp.float32),    # pred (time-major)
            jax.ShapeDtypeStruct((2 * L, B, H), jnp.float32),     # h_n
            jax.ShapeDtypeStruct((2 * L, B, H), jnp.float32),     # c_n
        ),
        in_specs=[vmem] * len(inputs),
        out_specs=(vmem, vmem, vmem),
        scratch_shapes=[pltpu.VMEM((S * B, H), jnp.float32),      # y_fwd
                        pltpu.VMEM((S * B, H), jnp.float32)],     # y_bwd
    )(*inputs)


# ----------------------------------------------------------------------------
# Parameter construction (deterministic, PyTorch-style uniform init)
# ----------------------------------------------------------------------------
def init_decoder_params(key, hid_dim, n_layers, output_dim):
    params = {"lstm": [], "fc": None}
    k = 1.0 / jnp.sqrt(jnp.float32(hid_dim))
    keys = jax.random.split(key, n_layers * 2 * 4 + 2)
    ki = 0
    for l in range(n_layers):
        in_dim = 1 if l == 0 else 2 * hid_dim
        dirs = []
        for _d in range(2):
            w_ih = jax.random.uniform(keys[ki], (4 * hid_dim, in_dim),
                                      jnp.float32, -k, k); ki += 1
            w_hh = jax.random.uniform(keys[ki], (4 * hid_dim, hid_dim),
                                      jnp.float32, -k, k); ki += 1
            b_ih = jax.random.uniform(keys[ki], (4 * hid_dim,),
                                      jnp.float32, -k, k); ki += 1
            b_hh = jax.random.uniform(keys[ki], (4 * hid_dim,),
                                      jnp.float32, -k, k); ki += 1
            dirs.append((
                w_ih.T,                                   # (in_dim, 4H)
                w_hh.T,                                   # (H, 4H)
                (b_ih + b_hh).reshape(1, 4 * hid_dim),    # (1, 4H)
            ))
        params["lstm"].append(dirs)
    kf = 1.0 / jnp.sqrt(jnp.float32(2 * hid_dim))
    w_fc = jax.random.uniform(keys[ki], (output_dim, 2 * hid_dim),
                              jnp.float32, -kf, kf); ki += 1
    b_fc = jax.random.uniform(keys[ki], (output_dim,),
                              jnp.float32, -kf, kf)
    params["fc"] = (w_fc.T, b_fc.reshape(1, output_dim))  # (2H, O), (1, O)
    return params


def pack_decoder_params(params, hid_dim, n_layers, output_dim):
    """Build kernel-ready packed weights: fused-direction (8H) gate layout,
    block-diagonal W_hh, 0.5 folded into i/f/o columns, bf16 MXU operands,
    lane-dense (128-padded) FC output."""
    H = hid_dim
    L = n_layers
    col = jnp.arange(8 * H)
    g_cols = ((col % (4 * H)) >= 2 * H) & ((col % (4 * H)) < 3 * H)
    scale = jnp.where(g_cols, 1.0, 0.5).astype(jnp.float32)           # (8H,)

    wih0 = None
    wih_rest, whh_all, b_all = [], [], []
    for l in range(L):
        (wih_f, whh_f, b_f), (wih_b, whh_b, b_b) = params["lstm"][l]
        wih_pk = jnp.concatenate([wih_f, wih_b], axis=1) * scale       # (in_dim, 8H)
        b_pk = jnp.concatenate([b_f, b_b], axis=1) * scale             # (1, 8H)
        whh_pk = jnp.zeros((2 * H, 8 * H), jnp.float32)
        whh_pk = whh_pk.at[:H, :4 * H].set(whh_f)
        whh_pk = whh_pk.at[H:, 4 * H:].set(whh_b)
        whh_pk = whh_pk * scale                                        # (2H, 8H)
        if l == 0:
            wih0 = wih_pk                                              # (1, 8H)
        else:
            wih_rest.append(wih_pk)
        whh_all.append(whh_pk)
        b_all.append(b_pk)

    wfc_t, bfc = params["fc"]                                          # (2H,O), (1,O)
    o_pad = max(128, ((output_dim + 127) // 128) * 128)
    wfc_pad = jnp.zeros((2 * H, o_pad), jnp.float32).at[:, :output_dim].set(wfc_t)
    bfc_pad = jnp.zeros((1, o_pad), jnp.float32).at[:, :output_dim].set(bfc)

    packed = {
        "wih0": wih0.astype(jnp.float32),                              # VPU multiply
        "wih_rest": (jnp.stack(wih_rest).astype(jnp.bfloat16) if L > 1 else None),
        "whh": jnp.stack(whh_all).astype(jnp.bfloat16),                # (L,2H,8H)
        "b": jnp.stack(b_all).astype(jnp.float32),                     # (L,1,8H)
        "wfc": wfc_pad.astype(jnp.bfloat16),                           # (2H,Opad)
        "bfc": bfc_pad.astype(jnp.float32),                            # (1,Opad)
    }
    return packed


# ----------------------------------------------------------------------------
# Decoder forward (mirrors Decoder.forward)
# ----------------------------------------------------------------------------
@functools.partial(jax.jit, static_argnames=("hid_dim", "n_layers", "output_dim"))
def decoder_forward(inp, hidden, cell, packed, *, hid_dim, n_layers, output_dim):
    # inp: (B, S, 1); hidden/cell: (2*n_layers, B, H)
    B, S, _ = inp.shape
    # tiny (S*B,1) time-major column; only trivially small XLA work outside the kernel
    x_col = jnp.transpose(inp.astype(jnp.float32)[:, :, 0]).reshape(S * B, 1)
    pred_tm, hT, cT = _run_decoder(
        x_col, hidden.astype(jnp.float32), cell.astype(jnp.float32), packed,
        S=S, B=B, H=hid_dim, L=n_layers)
    pred = pred_tm[:, :output_dim].reshape(S, B, output_dim).transpose(1, 0, 2)
    return pred, hT, cT


# ----------------------------------------------------------------------------
# Pure-JAX reference (sanity check of the fused kernel)
# ----------------------------------------------------------------------------
@functools.partial(jax.jit, static_argnames=("hid_dim", "n_layers", "output_dim"))
def _reference_forward(inp, hidden, cell, params, *, hid_dim, n_layers, output_dim):
    B, S, _ = inp.shape
    H = hid_dim
    layer_in = inp.astype(jnp.float32)                 # (B, S, in)
    h_fin, c_fin = [], []
    for l in range(n_layers):
        outs = []
        for d in range(2):
            wih_t, whh_t, b = params["lstm"][l][d]
            h = hidden[2 * l + d].astype(jnp.float32)
            c = cell[2 * l + d].astype(jnp.float32)
            ys = [None] * S
            ts = range(S) if d == 0 else range(S - 1, -1, -1)
            for t in ts:
                xt = layer_in[:, t, :]
                gates = xt @ wih_t + h @ whh_t + b
                i = jax.nn.sigmoid(gates[:, 0 * H:1 * H])
                f = jax.nn.sigmoid(gates[:, 1 * H:2 * H])
                g = jnp.tanh(gates[:, 2 * H:3 * H])
                o = jax.nn.sigmoid(gates[:, 3 * H:4 * H])
                c = f * c + i * g
                h = o * jnp.tanh(c)
                ys[t] = h
            outs.append(jnp.stack(ys, axis=1))          # (B, S, H)
            h_fin.append(h)
            c_fin.append(c)
        layer_in = jnp.concatenate(outs, axis=-1)       # (B, S, 2H)
    wfc_t, bfc = params["fc"]
    pred = layer_in @ wfc_t + bfc
    return pred, jnp.stack(h_fin), jnp.stack(c_fin)


# ----------------------------------------------------------------------------
if __name__ == "__main__":
    HID_DIM = 32
    N_LAYERS = 2
    OUTPUT_DIM = 8
    BATCH = 2
    SEQ = 8

    key = jax.random.PRNGKey(0)
    k_in, k_h, k_c, k_p = jax.random.split(key, 4)

    x = jax.random.normal(k_in, (BATCH, SEQ, 1), jnp.float32)
    h0 = jax.random.normal(k_h, (2 * N_LAYERS, BATCH, HID_DIM), jnp.float32)
    c0 = jax.random.normal(k_c, (2 * N_LAYERS, BATCH, HID_DIM), jnp.float32)

    params = init_decoder_params(k_p, HID_DIM, N_LAYERS, OUTPUT_DIM)
    packed = pack_decoder_params(params, HID_DIM, N_LAYERS, OUTPUT_DIM)

    pred, hid, cell = decoder_forward(
        x, h0, c0, packed,
        hid_dim=HID_DIM, n_layers=N_LAYERS, output_dim=OUTPUT_DIM)
    jax.block_until_ready((pred, hid, cell))

    assert pred.shape == (BATCH, SEQ, OUTPUT_DIM)
    assert hid.shape == (2 * N_LAYERS, BATCH, HID_DIM)
    assert cell.shape == (2 * N_LAYERS, BATCH, HID_DIM)
    assert bool(jnp.all(jnp.isfinite(pred)))

    # Loose numerical check vs. pure-JAX f32 reference (kernel uses bf16 MXU operands
    # with f32 accumulation, so allow a correspondingly loose tolerance).
    pred_r, hid_r, cell_r = _reference_forward(
        x, h0, c0, params,
        hid_dim=HID_DIM, n_layers=N_LAYERS, output_dim=OUTPUT_DIM)
    jax.block_until_ready((pred_r, hid_r, cell_r))
    assert float(jnp.max(jnp.abs(pred - pred_r))) < 1e-1
    assert float(jnp.max(jnp.abs(hid - hid_r))) < 1e-1
    assert float(jnp.max(jnp.abs(cell - cell_r))) < 1e-1

    print("KERNEL_OK")
</pallas_src>

<mosaic_0001>
module attributes {stable_mosaic.version = 11 : i64} {
  func.func @_decoder_kernel(%arg0: memref<16x1xf32, #tpu.memory_space<vmem>>, %arg1: memref<4x2x32xf32, #tpu.memory_space<vmem>>, %arg2: memref<4x2x32xf32, #tpu.memory_space<vmem>>, %arg3: memref<1x256xf32, #tpu.memory_space<vmem>>, %arg4: memref<1x64x256xbf16, #tpu.memory_space<vmem>>, %arg5: memref<2x64x256xbf16, #tpu.memory_space<vmem>>, %arg6: memref<2x1x256xf32, #tpu.memory_space<vmem>>, %arg7: memref<64x128xbf16, #tpu.memory_space<vmem>>, %arg8: memref<1x128xf32, #tpu.memory_space<vmem>>, %arg9: memref<16x128xf32, #tpu.memory_space<vmem>>, %arg10: memref<4x2x32xf32, #tpu.memory_space<vmem>>, %arg11: memref<4x2x32xf32, #tpu.memory_space<vmem>>, %arg12: memref<16x32xf32, #tpu.memory_space<vmem>>, %arg13: memref<16x32xf32, #tpu.memory_space<vmem>>) attributes {dimension_semantics = [], scalar_prefetch = 0 : i64, scratch_operands = 2 : i64, tpu.core_type = #tpu.core_type<tc>} {
    %0 = tpu.iota {dimensions = array<i32: 1>} : vector<2x256xi32>
    %c128_i32 = arith.constant 128 : i32
    %c0_i32 = arith.constant 0 : i32
    %1 = arith.cmpi eq, %c128_i32, %c0_i32 : i32
    %c1_i32 = arith.constant 1 : i32
    %2 = arith.select %1, %c1_i32, %c128_i32 : i32
    %3 = vector.broadcast %2 : i32 to vector<2x256xi32>
    %4 = arith.remsi %0, %3 : vector<2x256xi32>
    %c0_i32_0 = arith.constant 0 : i32
    %5 = vector.broadcast %c0_i32_0 : i32 to vector<2x256xi32>
    %6 = arith.cmpi ne, %4, %5 : vector<2x256xi32>
    %c0_i32_1 = arith.constant 0 : i32
    %7 = vector.broadcast %c0_i32_1 : i32 to vector<2x256xi32>
    %8 = arith.cmpi slt, %4, %7 : vector<2x256xi32>
    %c0_i32_2 = arith.constant 0 : i32
    %9 = arith.cmpi slt, %2, %c0_i32_2 : i32
    %10 = vector.broadcast %9 : i1 to vector<2x256xi1>
    %11 = vector.broadcast %10 : vector<2x256xi1> to vector<2x256xi1>
    %12 = arith.xori %8, %11 : vector<2x256xi1>
    %13 = arith.andi %12, %6 : vector<2x256xi1>
    %14 = vector.broadcast %2 : i32 to vector<2x256xi32>
    %15 = arith.addi %4, %14 : vector<2x256xi32>
    %16 = arith.select %13, %15, %4 : vector<2x256xi1>, vector<2x256xi32>
    %c64_i32 = arith.constant 64 : i32
    %17 = vector.broadcast %c64_i32 : i32 to vector<2x256xi32>
    %18 = arith.cmpi sge, %16, %17 : vector<2x256xi32>
    %c128_i32_3 = arith.constant 128 : i32
    %c0_i32_4 = arith.constant 0 : i32
    %19 = arith.cmpi eq, %c128_i32_3, %c0_i32_4 : i32
    %c1_i32_5 = arith.constant 1 : i32
    %20 = arith.select %19, %c1_i32_5, %c128_i32_3 : i32
    %21 = vector.broadcast %20 : i32 to vector<2x256xi32>
    %22 = arith.remsi %0, %21 : vector<2x256xi32>
    %c0_i32_6 = arith.constant 0 : i32
    %23 = vector.broadcast %c0_i32_6 : i32 to vector<2x256xi32>
    %24 = arith.cmpi ne, %22, %23 : vector<2x256xi32>
    %c0_i32_7 = arith.constant 0 : i32
    %25 = vector.broadcast %c0_i32_7 : i32 to vector<2x256xi32>
    %26 = arith.cmpi slt, %22, %25 : vector<2x256xi32>
    %c0_i32_8 = arith.constant 0 : i32
    %27 = arith.cmpi slt, %20, %c0_i32_8 : i32
    %28 = vector.broadcast %27 : i1 to vector<2x256xi1>
    %29 = vector.broadcast %28 : vector<2x256xi1> to vector<2x256xi1>
    %30 = arith.xori %26, %29 : vector<2x256xi1>
    %31 = arith.andi %30, %24 : vector<2x256xi1>
    %32 = vector.broadcast %20 : i32 to vector<2x256xi32>
    %33 = arith.addi %22, %32 : vector<2x256xi32>
    %34 = arith.select %31, %33, %22 : vector<2x256xi1>, vector<2x256xi32>
    %c96_i32 = arith.constant 96 : i32
    %35 = vector.broadcast %c96_i32 : i32 to vector<2x256xi32>
    %36 = arith.cmpi slt, %34, %35 : vector<2x256xi32>
    %37 = arith.andi %18, %36 : vector<2x256xi1>
    %c0 = arith.constant 0 : index
    %c0_9 = arith.constant 0 : index
    %c0_10 = arith.constant 0 : index
    %38 = vector.load %arg6[%c0, %c0_9, %c0_10] : memref<2x1x256xf32, #tpu.memory_space<vmem>>, vector<1x1x256xf32>
    %39 = vector.shape_cast %38 : vector<1x1x256xf32> to vector<1x256xf32>
    %c0_11 = arith.constant 0 : index
    %c0_12 = arith.constant 0 : index
    %c0_13 = arith.constant 0 : index
    %40 = vector.load %arg5[%c0_11, %c0_12, %c0_13] : memref<2x64x256xbf16, #tpu.memory_space<vmem>>, vector<1x64x256xbf16>
    %41 = vector.shape_cast %40 : vector<1x64x256xbf16> to vector<64x256xbf16>
    %c0_14 = arith.constant 0 : index
    %c0_15 = arith.constant 0 : index
    %42 = vector.load %arg0[%c0_14, %c0_15] : memref<16x1xf32, #tpu.memory_space<vmem>>, vector<16x1xf32>
    %c0_16 = arith.constant 0 : index
    %c0_17 = arith.constant 0 : index
    %43 = vector.load %arg3[%c0_16, %c0_17] : memref<1x256xf32, #tpu.memory_space<vmem>>, vector<1x256xf32>
    %44 = vector.broadcast %42 : vector<16x1xf32> to vector<16x256xf32>
    %45 = vector.broadcast %43 : vector<1x256xf32> to vector<16x256xf32>
    %46 = arith.mulf %44, %45 : vector<16x256xf32>
    %47 = vector.broadcast %39 : vector<1x256xf32> to vector<16x256xf32>
    %48 = arith.addf %46, %47 : vector<16x256xf32>
    %c0_18 = arith.constant 0 : index
    %c0_19 = arith.constant 0 : index
    %c0_20 = arith.constant 0 : index
    %49 = vector.load %arg1[%c0_18, %c0_19, %c0_20] : memref<4x2x32xf32, #tpu.memory_space<vmem>>, vector<1x2x32xf32>
    %50 = vector.shape_cast %49 : vector<1x2x32xf32> to vector<2x32xf32>
    %c1 = arith.constant 1 : index
    %c0_21 = arith.constant 0 : index
    %c0_22 = arith.constant 0 : index
    %51 = vector.load %arg1[%c1, %c0_21, %c0_22] : memref<4x2x32xf32, #tpu.memory_space<vmem>>, vector<1x2x32xf32>
    %52 = vector.shape_cast %51 : vector<1x2x32xf32> to vector<2x32xf32>
    %c0_23 = arith.constant 0 : index
    %c0_24 = arith.constant 0 : index
    %c0_25 = arith.constant 0 : index
    %53 = vector.load %arg2[%c0_23, %c0_24, %c0_25] : memref<4x2x32xf32, #tpu.memory_space<vmem>>, vector<1x2x32xf32>
    %54 = vector.shape_cast %53 : vector<1x2x32xf32> to vector<2x32xf32>
    %c1_26 = arith.constant 1 : index
    %c0_27 = arith.constant 0 : index
    %c0_28 = arith.constant 0 : index
    %55 = vector.load %arg2[%c1_26, %c0_27, %c0_28] : memref<4x2x32xf32, #tpu.memory_space<vmem>>, vector<1x2x32xf32>
    %56 = vector.shape_cast %55 : vector<1x2x32xf32> to vector<2x32xf32>
    %57 = tpu.concatenate %50, %52 in 1 : vector<2x32xf32>, vector<2x32xf32> -> vector<2x64xf32>
    %58 = vector.extract_strided_slice %48 {offsets = [0, 0], sizes = [2, 128], strides = [1, 1]} : vector<16x256xf32> to vector<2x128xf32>
    %59 = vector.extract_strided_slice %48 {offsets = [14, 128], sizes = [2, 128], strides = [1, 1]} : vector<16x256xf32> to vector<2x128xf32>
    %60 = tpu.concatenate %58, %59 in 1 : vector<2x128xf32>, vector<2x128xf32> -> vector<2x256xf32>
    %61 = arith.truncf %57 : vector<2x64xf32> to vector<2x64xbf16>
    %cst = arith.constant dense<0.000000e+00> : vector<2x256xf32>
    %62 = tpu.matmul %61, %41, %cst {dimension_numbers = #tpu.dot_dimension_numbers<[1], [0], [0], [1], [0, 0, 1, 1], [], []>} : vector<2x64xbf16>, vector<64x256xbf16>, vector<2x256xf32> -> vector<2x256xf32>
    %63 = arith.addf %60, %62 : vector<2x256xf32>
    %64 = math.tanh %63 : vector<2x256xf32>
    %cst_29 = arith.constant 5.000000e-01 : f32
    %65 = vector.broadcast %cst_29 : f32 to vector<2x256xf32>
    %66 = arith.mulf %65, %64 : vector<2x256xf32>
    %cst_30 = arith.constant 5.000000e-01 : f32
    %67 = vector.broadcast %cst_30 : f32 to vector<2x256xf32>
    %68 = arith.addf %66, %67 : vector<2x256xf32>
    %69 = arith.select %37, %64, %68 : vector<2x256xi1>, vector<2x256xf32>
    %70 = vector.extract_strided_slice %69 {offsets = [0, 0], sizes = [2, 32], strides = [1, 1]} : vector<2x256xf32> to vector<2x32xf32>
    %71 = vector.extract_strided_slice %69 {offsets = [0, 32], sizes = [2, 32], strides = [1, 1]} : vector<2x256xf32> to vector<2x32xf32>
    %72 = vector.extract_strided_slice %69 {offsets = [0, 64], sizes = [2, 32], strides = [1, 1]} : vector<2x256xf32> to vector<2x32xf32>
    %73 = vector.extract_strided_slice %69 {offsets = [0, 96], sizes = [2, 32], strides = [1, 1]} : vector<2x256xf32> to vector<2x32xf32>
    %74 = vector.extract_strided_slice %69 {offsets = [0, 128], sizes = [2, 32], strides = [1, 1]} : vector<2x256xf32> to vector<2x32xf32>
    %75 = vector.extract_strided_slice %69 {offsets = [0, 160], sizes = [2, 32], strides = [1, 1]} : vector<2x256xf32> to vector<2x32xf32>
    %76 = vector.extract_strided_slice %69 {offsets = [0, 192], sizes = [2, 32], strides = [1, 1]} : vector<2x256xf32> to vector<2x32xf32>
    %77 = vector.extract_strided_slice %69 {offsets = [0, 224], sizes = [2, 32], strides = [1, 1]} : vector<2x256xf32> to vector<2x32xf32>
    %78 = arith.mulf %71, %54 : vector<2x32xf32>
    %79 = arith.mulf %70, %72 : vector<2x32xf32>
    %80 = arith.addf %78, %79 : vector<2x32xf32>
    %81 = arith.mulf %75, %56 : vector<2x32xf32>
    %82 = arith.mulf %74, %76 : vector<2x32xf32>
    %83 = arith.addf %81, %82 : vector<2x32xf32>
    %84 = tpu.concatenate %80, %83 in 1 : vector<2x32xf32>, vector<2x32xf32> -> vector<2x64xf32>
    %85 = tpu.concatenate %73, %77 in 1 : vector<2x32xf32>, vector<2x32xf32> -> vector<2x64xf32>
    %86 = math.tanh %84 : vector<2x64xf32>
    %87 = arith.mulf %85, %86 : vector<2x64xf32>
    %88 = vector.extract_strided_slice %87 {offsets = [0, 0], sizes = [2, 32], strides = [1, 1]} : vector<2x64xf32> to vector<2x32xf32>
    %89 = vector.extract_strided_slice %87 {offsets = [0, 32], sizes = [2, 32], strides = [1, 1]} : vector<2x64xf32> to vector<2x32xf32>
    %c0_31 = arith.constant 0 : index
    %c0_32 = arith.constant 0 : index
    %90 = vector.load %arg12[%c0_31, %c0_32] : memref<16x32xf32, #tpu.memory_space<vmem>>, vector<2x32xf32>
    tpu.vector_store %arg12[%c0_31, %c0_32], %88 {strides = array<i32>} : memref<16x32xf32, #tpu.memory_space<vmem>>, vector<2x32xf32>,
    %c14 = arith.constant 14 : index
    %c0_33 = arith.constant 0 : index
    %91 = vector.load %arg13[%c14, %c0_33] : memref<16x32xf32, #tpu.memory_space<vmem>>, vector<2x32xf32>
    tpu.vector_store %arg13[%c14, %c0_33], %89 {strides = array<i32>} : memref<16x32xf32, #tpu.memory_space<vmem>>, vector<2x32xf32>,
    %92 = vector.extract_strided_slice %48 {offsets = [2, 0], sizes = [2, 128], strides = [1, 1]} : vector<16x256xf32> to vector<2x128xf32>
    %93 = vector.extract_strided_slice %48 {offsets = [12, 128], sizes = [2, 128], strides = [1, 1]} : vector<16x256xf32> to vector<2x128xf32>
    %94 = tpu.concatenate %92, %93 in 1 : vector<2x128xf32>, vector<2x128xf32> -> vector<2x256xf32>
    %95 = arith.truncf %87 : vector<2x64xf32> to vector<2x64xbf16>
    %cst_34 = arith.constant dense<0.000000e+00> : vector<2x256xf32>
    %96 = tpu.matmul %95, %41, %cst_34 {dimension_numbers = #tpu.dot_dimension_numbers<[1], [0], [0], [1], [0, 0, 1, 1], [], []>} : vector<2x64xbf16>, vector<64x256xbf16>, vector<2x256xf32> -> vector<2x256xf32>
    %97 = arith.addf %94, %96 : vector<2x256xf32>
    %98 = math.tanh %97 : vector<2x256xf32>
    %cst_35 = arith.constant 5.000000e-01 : f32
    %99 = vector.broadcast %cst_35 : f32 to vector<2x256xf32>
    %100 = arith.mulf %99, %98 : vector<2x256xf32>
    %cst_36 = arith.constant 5.000000e-01 : f32
    %101 = vector.broadcast %cst_36 : f32 to vector<2x256xf32>
    %102 = arith.addf %100, %101 : vector<2x256xf32>
    %103 = arith.select %37, %98, %102 : vector<2x256xi1>, vector<2x256xf32>
    %104 = vector.extract_strided_slice %103 {offsets = [0, 0], sizes = [2, 32], strides = [1, 1]} : vector<2x256xf32> to vector<2x32xf32>
    %105 = vector.extract_strided_slice %103 {offsets = [0, 32], sizes = [2, 32], strides = [1, 1]} : vector<2x256xf32> to vector<2x32xf32>
    %106 = vector.extract_strided_slice %103 {offsets = [0, 64], sizes = [2, 32], strides = [1, 1]} : vector<2x256xf32> to vector<2x32xf32>
    %107 = vector.extract_strided_slice %103 {offsets = [0, 96], sizes = [2, 32], strides = [1, 1]} : vector<2x256xf32> to vector<2x32xf32>
    %108 = vector.extract_strided_slice %103 {offsets = [0, 128], sizes = [2, 32], strides = [1, 1]} : vector<2x256xf32> to vector<2x32xf32>
    %109 = vector.extract_strided_slice %103 {offsets = [0, 160], sizes = [2, 32], strides = [1, 1]} : vector<2x256xf32> to vector<2x32xf32>
    %110 = vector.extract_strided_slice %103 {offsets = [0, 192], sizes = [2, 32], strides = [1, 1]} : vector<2x256xf32> to vector<2x32xf32>
    %111 = vector.extract_strided_slice %103 {offsets = [0, 224], sizes = [2, 32], strides = [1, 1]} : vector<2x256xf32> to vector<2x32xf32>
    %112 = arith.mulf %105, %80 : vector<2x32xf32>
    %113 = arith.mulf %104, %106 : vector<2x32xf32>
    %114 = arith.addf %112, %113 : vector<2x32xf32>
    %115 = arith.mulf %109, %83 : vector<2x32xf32>
    %116 = arith.mulf %108, %110 : vector<2x32xf32>
    %117 = arith.addf %115, %116 : vector<2x32xf32>
    %118 = tpu.concatenate %114, %117 in 1 : vector<2x32xf32>, vector<2x32xf32> -> vector<2x64xf32>
    %119 = tpu.concatenate %107, %111 in 1 : vector<2x32xf32>, vector<2x32xf32> -> vector<2x64xf32>
    %120 = math.tanh %118 : vector<2x64xf32>
    %121 = arith.mulf %119, %120 : vector<2x64xf32>
    %122 = vector.extract_strided_slice %121 {offsets = [0, 0], sizes = [2, 32], strides = [1, 1]} : vector<2x64xf32> to vector<2x32xf32>
    %123 = vector.extract_strided_slice %121 {offsets = [0, 32], sizes = [2, 32], strides = [1, 1]} : vector<2x64xf32> to vector<2x32xf32>
    %c2 = arith.constant 2 : index
    %c0_37 = arith.constant 0 : index
    %124 = vector.load %arg12[%c2, %c0_37] : memref<16x32xf32, #tpu.memory_space<vmem>>, vector<2x32xf32>
    tpu.vector_store %arg12[%c2, %c0_37], %122 {strides = array<i32>} : memref<16x32xf32, #tpu.memory_space<vmem>>, vector<2x32xf32>,
    %c12 = arith.constant 12 : index
    %c0_38 = arith.constant 0 : index
    %125 = vector.load %arg13[%c12, %c0_38] : memref<16x32xf32, #tpu.memory_space<vmem>>, vector<2x32xf32>
    tpu.vector_store %arg13[%c12, %c0_38], %123 {strides = array<i32>} : memref<16x32xf32, #tpu.memory_space<vmem>>, vector<2x32xf32>,
    %126 = vector.extract_strided_slice %48 {offsets = [4, 0], sizes = [2, 128], strides = [1, 1]} : vector<16x256xf32> to vector<2x128xf32>
    %127 = vector.extract_strided_slice %48 {offsets = [10, 128], sizes = [2, 128], strides = [1, 1]} : vector<16x256xf32> to vector<2x128xf32>
    %128 = tpu.concatenate %126, %127 in 1 : vector<2x128xf32>, vector<2x128xf32> -> vector<2x256xf32>
    %129 = arith.truncf %121 : vector<2x64xf32> to vector<2x64xbf16>
    %cst_39 = arith.constant dense<0.000000e+00> : vector<2x256xf32>
    %130 = tpu.matmul %129, %41, %cst_39 {dimension_numbers = #tpu.dot_dimension_numbers<[1], [0], [0], [1], [0, 0, 1, 1], [], []>} : vector<2x64xbf16>, vector<64x256xbf16>, vector<2x256xf32> -> vector<2x256xf32>
    %131 = arith.addf %128, %130 : vector<2x256xf32>
    %132 = math.tanh %131 : vector<2x256xf32>
    %cst_40 = arith.constant 5.000000e-01 : f32
    %133 = vector.broadcast %cst_40 : f32 to vector<2x256xf32>
    %134 = arith.mulf %133, %132 : vector<2x256xf32>
    %cst_41 = arith.constant 5.000000e-01 : f32
    %135 = vector.broadcast %cst_41 : f32 to vector<2x256xf32>
    %136 = arith.addf %134, %135 : vector<2x256xf32>
    %137 = arith.select %37, %132, %136 : vector<2x256xi1>, vector<2x256xf32>
    %138 = vector.extract_strided_slice %137 {offsets = [0, 0], sizes = [2, 32], strides = [1, 1]} : vector<2x256xf32> to vector<2x32xf32>
    %139 = vector.extract_strided_slice %137 {offsets = [0, 32], sizes = [2, 32], strides = [1, 1]} : vector<2x256xf32> to vector<2x32xf32>
    %140 = vector.extract_strided_slice %137 {offsets = [0, 64], sizes = [2, 32], strides = [1, 1]} : vector<2x256xf32> to vector<2x32xf32>
    %141 = vector.extract_strided_slice %137 {offsets = [0, 96], sizes = [2, 32], strides = [1, 1]} : vector<2x256xf32> to vector<2x32xf32>
    %142 = vector.extract_strided_slice %137 {offsets = [0, 128], sizes = [2, 32], strides = [1, 1]} : vector<2x256xf32> to vector<2x32xf32>
    %143 = vector.extract_strided_slice %137 {offsets = [0, 160], sizes = [2, 32], strides = [1, 1]} : vector<2x256xf32> to vector<2x32xf32>
    %144 = vector.extract_strided_slice %137 {offsets = [0, 192], sizes = [2, 32], strides = [1, 1]} : vector<2x256xf32> to vector<2x32xf32>
    %145 = vector.extract_strided_slice %137 {offsets = [0, 224], sizes = [2, 32], strides = [1, 1]} : vector<2x256xf32> to vector<2x32xf32>
    %146 = arith.mulf %139, %114 : vector<2x32xf32>
    %147 = arith.mulf %138, %140 : vector<2x32xf32>
    %148 = arith.addf %146, %147 : vector<2x32xf32>
    %149 = arith.mulf %143, %117 : vector<2x32xf32>
    %150 = arith.mulf %142, %144 : vector<2x32xf32>
    %151 = arith.addf %149, %150 : vector<2x32xf32>
    %152 = tpu.concatenate %148, %151 in 1 : vector<2x32xf32>, vector<2x32xf32> -> vector<2x64xf32>
    %153 = tpu.concatenate %141, %145 in 1 : vector<2x32xf32>, vector<2x32xf32> -> vector<2x64xf32>
    %154 = math.tanh %152 : vector<2x64xf32>
    %155 = arith.mulf %153, %154 : vector<2x64xf32>
    %156 = vector.extract_strided_slice %155 {offsets = [0, 0], sizes = [2, 32], strides = [1, 1]} : vector<2x64xf32> to vector<2x32xf32>
    %157 = vector.extract_strided_slice %155 {offsets = [0, 32], sizes = [2, 32], strides = [1, 1]} : vector<2x64xf32> to vector<2x32xf32>
    %c4 = arith.constant 4 : index
    %c0_42 = arith.constant 0 : index
    %158 = vector.load %arg12[%c4, %c0_42] : memref<16x32xf32, #tpu.memory_space<vmem>>, vector<2x32xf32>
    tpu.vector_store %arg12[%c4, %c0_42], %156 {strides = array<i32>} : memref<16x32xf32, #tpu.memory_space<vmem>>, vector<2x32xf32>,
    %c10 = arith.constant 10 : index
    %c0_43 = arith.constant 0 : index
    %159 = vector.load %arg13[%c10, %c0_43] : memref<16x32xf32, #tpu.memory_space<vmem>>, vector<2x32xf32>
    tpu.vector_store %arg13[%c10, %c0_43], %157 {strides = array<i32>} : memref<16x32xf32, #tpu.memory_space<vmem>>, vector<2x32xf32>,
    %160 = vector.extract_strided_slice %48 {offsets = [6, 0], sizes = [2, 128], strides = [1, 1]} : vector<16x256xf32> to vector<2x128xf32>
    %161 = vector.extract_strided_slice %48 {offsets = [8, 128], sizes = [2, 128], strides = [1, 1]} : vector<16x256xf32> to vector<2x128xf32>
    %162 = tpu.concatenate %160, %161 in 1 : vector<2x128xf32>, vector<2x128xf32> -> vector<2x256xf32>
    %163 = arith.truncf %155 : vector<2x64xf32> to vector<2x64xbf16>
    %cst_44 = arith.constant dense<0.000000e+00> : vector<2x256xf32>
    %164 = tpu.matmul %163, %41, %cst_44 {dimension_numbers = #tpu.dot_dimension_numbers<[1], [0], [0], [1], [0, 0, 1, 1], [], []>} : vector<2x64xbf16>, vector<64x256xbf16>, vector<2x256xf32> -> vector<2x256xf32>
    %165 = arith.addf %162, %164 : vector<2x256xf32>
    %166 = math.tanh %165 : vector<2x256xf32>
    %cst_45 = arith.constant 5.000000e-01 : f32
    %167 = vector.broadcast %cst_45 : f32 to vector<2x256xf32>
    %168 = arith.mulf %167, %166 : vector<2x256xf32>
    %cst_46 = arith.constant 5.000000e-01 : f32
    %169 = vector.broadcast %cst_46 : f32 to vector<2x256xf32>
    %170 = arith.addf %168, %169 : vector<2x256xf32>
    %171 = arith.select %37, %166, %170 : vector<2x256xi1>, vector<2x256xf32>
    %172 = vector.extract_strided_slice %171 {offsets = [0, 0], sizes = [2, 32], strides = [1, 1]} : vector<2x256xf32> to vector<2x32xf32>
    %173 = vector.extract_strided_slice %171 {offsets = [0, 32], sizes = [2, 32], strides = [1, 1]} : vector<2x256xf32> to vector<2x32xf32>
    %174 = vector.extract_strided_slice %171 {offsets = [0, 64], sizes = [2, 32], strides = [1, 1]} : vector<2x256xf32> to vector<2x32xf32>
    %175 = vector.extract_strided_slice %171 {offsets = [0, 96], sizes = [2, 32], strides = [1, 1]} : vector<2x256xf32> to vector<2x32xf32>
    %176 = vector.extract_strided_slice %171 {offsets = [0, 128], sizes = [2, 32], strides = [1, 1]} : vector<2x256xf32> to vector<2x32xf32>
    %177 = vector.extract_strided_slice %171 {offsets = [0, 160], sizes = [2, 32], strides = [1, 1]} : vector<2x256xf32> to vector<2x32xf32>
    %178 = vector.extract_strided_slice %171 {offsets = [0, 192], sizes = [2, 32], strides = [1, 1]} : vector<2x256xf32> to vector<2x32xf32>
    %179 = vector.extract_strided_slice %171 {offsets = [0, 224], sizes = [2, 32], strides = [1, 1]} : vector<2x256xf32> to vector<2x32xf32>
    %180 = arith.mulf %173, %148 : vector<2x32xf32>
    %181 = arith.mulf %172, %174 : vector<2x32xf32>
    %182 = arith.addf %180, %181 : vector<2x32xf32>
    %183 = arith.mulf %177, %151 : vector<2x32xf32>
    %184 = arith.mulf %176, %178 : vector<2x32xf32>
    %185 = arith.addf %183, %184 : vector<2x32xf32>
    %186 = tpu.concatenate %182, %185 in 1 : vector<2x32xf32>, vector<2x32xf32> -> vector<2x64xf32>
    %187 = tpu.concatenate %175, %179 in 1 : vector<2x32xf32>, vector<2x32xf32> -> vector<2x64xf32>
    %188 = math.tanh %186 : vector<2x64xf32>
    %189 = arith.mulf %187, %188 : vector<2x64xf32>
    %190 = vector.extract_strided_slice %189 {offsets = [0, 0], sizes = [2, 32], strides = [1, 1]} : vector<2x64xf32> to vector<2x32xf32>
    %191 = vector.extract_strided_slice %189 {offsets = [0, 32], sizes = [2, 32], strides = [1, 1]} : vector<2x64xf32> to vector<2x32xf32>
    %c6 = arith.constant 6 : index
    %c0_47 = arith.constant 0 : index
    %192 = vector.load %arg12[%c6, %c0_47] : memref<16x32xf32, #tpu.memory_space<vmem>>, vector<2x32xf32>
    tpu.vector_store %arg12[%c6, %c0_47], %190 {strides = array<i32>} : memref<16x32xf32, #tpu.memory_space<vmem>>, vector<2x32xf32>,
    %c8 = arith.constant 8 : index
    %c0_48 = arith.constant 0 : index
    %193 = vector.load %arg13[%c8, %c0_48] : memref<16x32xf32, #tpu.memory_space<vmem>>, vector<2x32xf32>
    tpu.vector_store %arg13[%c8, %c0_48], %191 {strides = array<i32>} : memref<16x32xf32, #tpu.memory_space<vmem>>, vector<2x32xf32>,
    %194 = vector.extract_strided_slice %48 {offsets = [8, 0], sizes = [2, 128], strides = [1, 1]} : vector<16x256xf32> to vector<2x128xf32>
    %195 = vector.extract_strided_slice %48 {offsets = [6, 128], sizes = [2, 128], strides = [1, 1]} : vector<16x256xf32> to vector<2x128xf32>
    %196 = tpu.concatenate %194, %195 in 1 : vector<2x128xf32>, vector<2x128xf32> -> vector<2x256xf32>
    %197 = arith.truncf %189 : vector<2x64xf32> to vector<2x64xbf16>
    %cst_49 = arith.constant dense<0.000000e+00> : vector<2x256xf32>
    %198 = tpu.matmul %197, %41, %cst_49 {dimension_numbers = #tpu.dot_dimension_numbers<[1], [0], [0], [1], [0, 0, 1, 1], [], []>} : vector<2x64xbf16>, vector<64x256xbf16>, vector<2x256xf32> -> vector<2x256xf32>
    %199 = arith.addf %196, %198 : vector<2x256xf32>
    %200 = math.tanh %199 : vector<2x256xf32>
    %cst_50 = arith.constant 5.000000e-01 : f32
    %201 = vector.broadcast %cst_50 : f32 to vector<2x256xf32>
    %202 = arith.mulf %201, %200 : vector<2x256xf32>
    %cst_51 = arith.constant 5.000000e-01 : f32
    %203 = vector.broadcast %cst_51 : f32 to vector<2x256xf32>
    %204 = arith.addf %202, %203 : vector<2x256xf32>
    %205 = arith.select %37, %200, %204 : vector<2x256xi1>, vector<2x256xf32>
    %206 = vector.extract_strided_slice %205 {offsets = [0, 0], sizes = [2, 32], strides = [1, 1]} : vector<2x256xf32> to vector<2x32xf32>
    %207 = vector.extract_strided_slice %205 {offsets = [0, 32], sizes = [2, 32], strides = [1, 1]} : vector<2x256xf32> to vector<2x32xf32>
    %208 = vector.extract_strided_slice %205 {offsets = [0, 64], sizes = [2, 32], strides = [1, 1]} : vector<2x256xf32> to vector<2x32xf32>
    %209 = vector.extract_strided_slice %205 {offsets = [0, 96], sizes = [2, 32], strides = [1, 1]} : vector<2x256xf32> to vector<2x32xf32>
    %210 = vector.extract_strided_slice %205 {offsets = [0, 128], sizes = [2, 32], strides = [1, 1]} : vector<2x256xf32> to vector<2x32xf32>
    %211 = vector.extract_strided_slice %205 {offsets = [0, 160], sizes = [2, 32], strides = [1, 1]} : vector<2x256xf32> to vector<2x32xf32>
    %212 = vector.extract_strided_slice %205 {offsets = [0, 192], sizes = [2, 32], strides = [1, 1]} : vector<2x256xf32> to vector<2x32xf32>
    %213 = vector.extract_strided_slice %205 {offsets = [0, 224], sizes = [2, 32], strides = [1, 1]} : vector<2x256xf32> to vector<2x32xf32>
    %214 = arith.mulf %207, %182 : vector<2x32xf32>
    %215 = arith.mulf %206, %208 : vector<2x32xf32>
    %216 = arith.addf %214, %215 : vector<2x32xf32>
    %217 = arith.mulf %211, %185 : vector<2x32xf32>
    %218 = arith.mulf %210, %212 : vector<2x32xf32>
    %219 = arith.addf %217, %218 : vector<2x32xf32>
    %220 = tpu.concatenate %216, %219 in 1 : vector<2x32xf32>, vector<2x32xf32> -> vector<2x64xf32>
    %221 = tpu.concatenate %209, %213 in 1 : vector<2x32xf32>, vector<2x32xf32> -> vector<2x64xf32>
    %222 = math.tanh %220 : vector<2x64xf32>
    %223 = arith.mulf %221, %222 : vector<2x64xf32>
    %224 = vector.extract_strided_slice %223 {offsets = [0, 0], sizes = [2, 32], strides = [1, 1]} : vector<2x64xf32> to vector<2x32xf32>
    %225 = vector.extract_strided_slice %223 {offsets = [0, 32], sizes = [2, 32], strides = [1, 1]} : vector<2x64xf32> to vector<2x32xf32>
    %c8_52 = arith.constant 8 : index
    %c0_53 = arith.constant 0 : index
    %226 = vector.load %arg12[%c8_52, %c0_53] : memref<16x32xf32, #tpu.memory_space<vmem>>, vector<2x32xf32>
    tpu.vector_store %arg12[%c8_52, %c0_53], %224 {strides = array<i32>} : memref<16x32xf32, #tpu.memory_space<vmem>>, vector<2x32xf32>,
    %c6_54 = arith.constant 6 : index
    %c0_55 = arith.constant 0 : index
    %227 = vector.load %arg13[%c6_54, %c0_55] : memref<16x32xf32, #tpu.memory_space<vmem>>, vector<2x32xf32>
    tpu.vector_store %arg13[%c6_54, %c0_55], %225 {strides = array<i32>} : memref<16x32xf32, #tpu.memory_space<vmem>>, vector<2x32xf32>,
    %228 = vector.extract_strided_slice %48 {offsets = [10, 0], sizes = [2, 128], strides = [1, 1]} : vector<16x256xf32> to vector<2x128xf32>
    %229 = vector.extract_strided_slice %48 {offsets = [4, 128], sizes = [2, 128], strides = [1, 1]} : vector<16x256xf32> to vector<2x128xf32>
    %230 = tpu.concatenate %228, %229 in 1 : vector<2x128xf32>, vector<2x128xf32> -> vector<2x256xf32>
    %231 = arith.truncf %223 : vector<2x64xf32> to vector<2x64xbf16>
    %cst_56 = arith.constant dense<0.000000e+00> : vector<2x256xf32>
    %232 = tpu.matmul %231, %41, %cst_56 {dimension_numbers = #tpu.dot_dimension_numbers<[1], [0], [0], [1], [0, 0, 1, 1], [], []>} : vector<2x64xbf16>, vector<64x256xbf16>, vector<2x256xf32> -> vector<2x256xf32>
    %233 = arith.addf %230, %232 : vector<2x256xf32>
    %234 = math.tanh %233 : vector<2x256xf32>
    %cst_57 = arith.constant 5.000000e-01 : f32
    %235 = vector.broadcast %cst_57 : f32 to vector<2x256xf32>
    %236 = arith.mulf %235, %234 : vector<2x256xf32>
    %cst_58 = arith.constant 5.000000e-01 : f32
    %237 = vector.broadcast %cst_58 : f32 to vector<2x256xf32>
    %238 = arith.addf %236, %237 : vector<2x256xf32>
    %239 = arith.select %37, %234, %238 : vector<2x256xi1>, vector<2x256xf32>
    %240 = vector.extract_strided_slice %239 {offsets = [0, 0], sizes = [2, 32], strides = [1, 1]} : vector<2x256xf32> to vector<2x32xf32>
    %241 = vector.extract_strided_slice %239 {offsets = [0, 32], sizes = [2, 32], strides = [1, 1]} : vector<2x256xf32> to vector<2x32xf32>
    %242 = vector.extract_strided_slice %239 {offsets = [0, 64], sizes = [2, 32], strides = [1, 1]} : vector<2x256xf32> to vector<2x32xf32>
    %243 = vector.extract_strided_slice %239 {offsets = [0, 96], sizes = [2, 32], strides = [1, 1]} : vector<2x256xf32> to vector<2x32xf32>
    %244 = vector.extract_strided_slice %239 {offsets = [0, 128], sizes = [2, 32], strides = [1, 1]} : vector<2x256xf32> to vector<2x32xf32>
    %245 = vector.extract_strided_slice %239 {offsets = [0, 160], sizes = [2, 32], strides = [1, 1]} : vector<2x256xf32> to vector<2x32xf32>
    %246 = vector.extract_strided_slice %239 {offsets = [0, 192], sizes = [2, 32], strides = [1, 1]} : vector<2x256xf32> to vector<2x32xf32>
    %247 = vector.extract_strided_slice %239 {offsets = [0, 224], sizes = [2, 32], strides = [1, 1]} : vector<2x256xf32> to vector<2x32xf32>
    %248 = arith.mulf %241, %216 : vector<2x32xf32>
    %249 = arith.mulf %240, %242 : vector<2x32xf32>
    %250 = arith.addf %248, %249 : vector<2x32xf32>
    %251 = arith.mulf %245, %219 : vector<2x32xf32>
    %252 = arith.mulf %244, %246 : vector<2x32xf32>
    %253 = arith.addf %251, %252 : vector<2x32xf32>
    %254 = tpu.concatenate %250, %253 in 1 : vector<2x32xf32>, vector<2x32xf32> -> vector<2x64xf32>
    %255 = tpu.concatenate %243, %247 in 1 : vector<2x32xf32>, vector<2x32xf32> -> vector<2x64xf32>
    %256 = math.tanh %254 : vector<2x64xf32>
    %257 = arith.mulf %255, %256 : vector<2x64xf32>
    %258 = vector.extract_strided_slice %257 {offsets = [0, 0], sizes = [2, 32], strides = [1, 1]} : vector<2x64xf32> to vector<2x32xf32>
    %259 = vector.extract_strided_slice %257 {offsets = [0, 32], sizes = [2, 32], strides = [1, 1]} : vector<2x64xf32> to vector<2x32xf32>
    %c10_59 = arith.constant 10 : index
    %c0_60 = arith.constant 0 : index
    %260 = vector.load %arg12[%c10_59, %c0_60] : memref<16x32xf32, #tpu.memory_space<vmem>>, vector<2x32xf32>
    tpu.vector_store %arg12[%c10_59, %c0_60], %258 {strides = array<i32>} : memref<16x32xf32, #tpu.memory_space<vmem>>, vector<2x32xf32>,
    %c4_61 = arith.constant 4 : index
    %c0_62 = arith.constant 0 : index
    %261 = vector.load %arg13[%c4_61, %c0_62] : memref<16x32xf32, #tpu.memory_space<vmem>>, vector<2x32xf32>
    tpu.vector_store %arg13[%c4_61, %c0_62], %259 {strides = array<i32>} : memref<16x32xf32, #tpu.memory_space<vmem>>, vector<2x32xf32>,
    %262 = vector.extract_strided_slice %48 {offsets = [12, 0], sizes = [2, 128], strides = [1, 1]} : vector<16x256xf32> to vector<2x128xf32>
    %263 = vector.extract_strided_slice %48 {offsets = [2, 128], sizes = [2, 128], strides = [1, 1]} : vector<16x256xf32> to vector<2x128xf32>
    %264 = tpu.concatenate %262, %263 in 1 : vector<2x128xf32>, vector<2x128xf32> -> vector<2x256xf32>
    %265 = arith.truncf %257 : vector<2x64xf32> to vector<2x64xbf16>
    %cst_63 = arith.constant dense<0.000000e+00> : vector<2x256xf32>
    %266 = tpu.matmul %265, %41, %cst_63 {dimension_numbers = #tpu.dot_dimension_numbers<[1], [0], [0], [1], [0, 0, 1, 1], [], []>} : vector<2x64xbf16>, vector<64x256xbf16>, vector<2x256xf32> -> vector<2x256xf32>
    %267 = arith.addf %264, %266 : vector<2x256xf32>
    %268 = math.tanh %267 : vector<2x256xf32>
    %cst_64 = arith.constant 5.000000e-01 : f32
    %269 = vector.broadcast %cst_64 : f32 to vector<2x256xf32>
    %270 = arith.mulf %269, %268 : vector<2x256xf32>
    %cst_65 = arith.constant 5.000000e-01 : f32
    %271 = vector.broadcast %cst_65 : f32 to vector<2x256xf32>
    %272 = arith.addf %270, %271 : vector<2x256xf32>
    %273 = arith.select %37, %268, %272 : vector<2x256xi1>, vector<2x256xf32>
    %274 = vector.extract_strided_slice %273 {offsets = [0, 0], sizes = [2, 32], strides = [1, 1]} : vector<2x256xf32> to vector<2x32xf32>
    %275 = vector.extract_strided_slice %273 {offsets = [0, 32], sizes = [2, 32], strides = [1, 1]} : vector<2x256xf32> to vector<2x32xf32>
    %276 = vector.extract_strided_slice %273 {offsets = [0, 64], sizes = [2, 32], strides = [1, 1]} : vector<2x256xf32> to vector<2x32xf32>
    %277 = vector.extract_strided_slice %273 {offsets = [0, 96], sizes = [2, 32], strides = [1, 1]} : vector<2x256xf32> to vector<2x32xf32>
    %278 = vector.extract_strided_slice %273 {offsets = [0, 128], sizes = [2, 32], strides = [1, 1]} : vector<2x256xf32> to vector<2x32xf32>
    %279 = vector.extract_strided_slice %273 {offsets = [0, 160], sizes = [2, 32], strides = [1, 1]} : vector<2x256xf32> to vector<2x32xf32>
    %280 = vector.extract_strided_slice %273 {offsets = [0, 192], sizes = [2, 32], strides = [1, 1]} : vector<2x256xf32> to vector<2x32xf32>
    %281 = vector.extract_strided_slice %273 {offsets = [0, 224], sizes = [2, 32], strides = [1, 1]} : vector<2x256xf32> to vector<2x32xf32>
    %282 = arith.mulf %275, %250 : vector<2x32xf32>
    %283 = arith.mulf %274, %276 : vector<2x32xf32>
    %284 = arith.addf %282, %283 : vector<2x32xf32>
    %285 = arith.mulf %279, %253 : vector<2x32xf32>
    %286 = arith.mulf %278, %280 : vector<2x32xf32>
    %287 = arith.addf %285, %286 : vector<2x32xf32>
    %288 = tpu.concatenate %284, %287 in 1 : vector<2x32xf32>, vector<2x32xf32> -> vector<2x64xf32>
    %289 = tpu.concatenate %277, %281 in 1 : vector<2x32xf32>, vector<2x32xf32> -> vector<2x64xf32>
    %290 = math.tanh %288 : vector<2x64xf32>
    %291 = arith.mulf %289, %290 : vector<2x64xf32>
    %292 = vector.extract_strided_slice %291 {offsets = [0, 0], sizes = [2, 32], strides = [1, 1]} : vector<2x64xf32> to vector<2x32xf32>
    %293 = vector.extract_strided_slice %291 {offsets = [0, 32], sizes = [2, 32], strides = [1, 1]} : vector<2x64xf32> to vector<2x32xf32>
    %c12_66 = arith.constant 12 : index
    %c0_67 = arith.constant 0 : index
    %294 = vector.load %arg12[%c12_66, %c0_67] : memref<16x32xf32, #tpu.memory_space<vmem>>, vector<2x32xf32>
    tpu.vector_store %arg12[%c12_66, %c0_67], %292 {strides = array<i32>} : memref<16x32xf32, #tpu.memory_space<vmem>>, vector<2x32xf32>,
    %c2_68 = arith.constant 2 : index
    %c0_69 = arith.constant 0 : index
    %295 = vector.load %arg13[%c2_68, %c0_69] : memref<16x32xf32, #tpu.memory_space<vmem>>, vector<2x32xf32>
    tpu.vector_store %arg13[%c2_68, %c0_69], %293 {strides = array<i32>} : memref<16x32xf32, #tpu.memory_space<vmem>>, vector<2x32xf32>,
    %296 = vector.extract_strided_slice %48 {offsets = [14, 0], sizes = [2, 128], strides = [1, 1]} : vector<16x256xf32> to vector<2x128xf32>
    %297 = vector.extract_strided_slice %48 {offsets = [0, 128], sizes = [2, 128], strides = [1, 1]} : vector<16x256xf32> to vector<2x128xf32>
    %298 = tpu.concatenate %296, %297 in 1 : vector<2x128xf32>, vector<2x128xf32> -> vector<2x256xf32>
    %299 = arith.truncf %291 : vector<2x64xf32> to vector<2x64xbf16>
    %cst_70 = arith.constant dense<0.000000e+00> : vector<2x256xf32>
    %300 = tpu.matmul %299, %41, %cst_70 {dimension_numbers = #tpu.dot_dimension_numbers<[1], [0], [0], [1], [0, 0, 1, 1], [], []>} : vector<2x64xbf16>, vector<64x256xbf16>, vector<2x256xf32> -> vector<2x256xf32>
    %301 = arith.addf %298, %300 : vector<2x256xf32>
    %302 = math.tanh %301 : vector<2x256xf32>
    %cst_71 = arith.constant 5.000000e-01 : f32
    %303 = vector.broadcast %cst_71 : f32 to vector<2x256xf32>
    %304 = arith.mulf %303, %302 : vector<2x256xf32>
    %cst_72 = arith.constant 5.000000e-01 : f32
    %305 = vector.broadcast %cst_72 : f32 to vector<2x256xf32>
    %306 = arith.addf %304, %305 : vector<2x256xf32>
    %307 = arith.select %37, %302, %306 : vector<2x256xi1>, vector<2x256xf32>
    %308 = vector.extract_strided_slice %307 {offsets = [0, 0], sizes = [2, 32], strides = [1, 1]} : vector<2x256xf32> to vector<2x32xf32>
    %309 = vector.extract_strided_slice %307 {offsets = [0, 32], sizes = [2, 32], strides = [1, 1]} : vector<2x256xf32> to vector<2x32xf32>
    %310 = vector.extract_strided_slice %307 {offsets = [0, 64], sizes = [2, 32], strides = [1, 1]} : vector<2x256xf32> to vector<2x32xf32>
    %311 = vector.extract_strided_slice %307 {offsets = [0, 96], sizes = [2, 32], strides = [1, 1]} : vector<2x256xf32> to vector<2x32xf32>
    %312 = vector.extract_strided_slice %307 {offsets = [0, 128], sizes = [2, 32], strides = [1, 1]} : vector<2x256xf32> to vector<2x32xf32>
    %313 = vector.extract_strided_slice %307 {offsets = [0, 160], sizes = [2, 32], strides = [1, 1]} : vector<2x256xf32> to vector<2x32xf32>
    %314 = vector.extract_strided_slice %307 {offsets = [0, 192], sizes = [2, 32], strides = [1, 1]} : vector<2x256xf32> to vector<2x32xf32>
    %315 = vector.extract_strided_slice %307 {offsets = [0, 224], sizes = [2, 32], strides = [1, 1]} : vector<2x256xf32> to vector<2x32xf32>
    %316 = arith.mulf %309, %284 : vector<2x32xf32>
    %317 = arith.mulf %308, %310 : vector<2x32xf32>
    %318 = arith.addf %316, %317 : vector<2x32xf32>
    %319 = arith.mulf %313, %287 : vector<2x32xf32>
    %320 = arith.mulf %312, %314 : vector<2x32xf32>
    %321 = arith.addf %319, %320 : vector<2x32xf32>
    %322 = tpu.concatenate %318, %321 in 1 : vector<2x32xf32>, vector<2x32xf32> -> vector<2x64xf32>
    %323 = tpu.concatenate %311, %315 in 1 : vector<2x32xf32>, vector<2x32xf32> -> vector<2x64xf32>
    %324 = math.tanh %322 : vector<2x64xf32>
    %325 = arith.mulf %323, %324 : vector<2x64xf32>
    %326 = vector.extract_strided_slice %325 {offsets = [0, 0], sizes = [2, 32], strides = [1, 1]} : vector<2x64xf32> to vector<2x32xf32>
    %327 = vector.extract_strided_slice %325 {offsets = [0, 32], sizes = [2, 32], strides = [1, 1]} : vector<2x64xf32> to vector<2x32xf32>
    %c14_73 = arith.constant 14 : index
    %c0_74 = arith.constant 0 : index
    %328 = vector.load %arg12[%c14_73, %c0_74] : memref<16x32xf32, #tpu.memory_space<vmem>>, vector<2x32xf32>
    tpu.vector_store %arg12[%c14_73, %c0_74], %326 {strides = array<i32>} : memref<16x32xf32, #tpu.memory_space<vmem>>, vector<2x32xf32>,
    %c0_75 = arith.constant 0 : index
    %c0_76 = arith.constant 0 : index
    %329 = vector.load %arg13[%c0_75, %c0_76] : memref<16x32xf32, #tpu.memory_space<vmem>>, vector<2x32xf32>
    tpu.vector_store %arg13[%c0_75, %c0_76], %327 {strides = array<i32>} : memref<16x32xf32, #tpu.memory_space<vmem>>, vector<2x32xf32>,
    %c0_77 = arith.constant 0 : index
    %c0_78 = arith.constant 0 : index
    %c0_79 = arith.constant 0 : index
    %330 = vector.load %arg10[%c0_77, %c0_78, %c0_79] : memref<4x2x32xf32, #tpu.memory_space<vmem>>, vector<1x2x32xf32>
    %331 = vector.shape_cast %330 : vector<1x2x32xf32> to vector<2x32xf32>
    %332 = vector.shape_cast %326 : vector<2x32xf32> to vector<1x2x32xf32>
    tpu.vector_store %arg10[%c0_77, %c0_78, %c0_79], %332 {strides = array<i32>} : memref<4x2x32xf32, #tpu.memory_space<vmem>>, vector<1x2x32xf32>,
    %c1_80 = arith.constant 1 : index
    %c0_81 = arith.constant 0 : index
    %c0_82 = arith.constant 0 : index
    %333 = vector.load %arg10[%c1_80, %c0_81, %c0_82] : memref<4x2x32xf32, #tpu.memory_space<vmem>>, vector<1x2x32xf32>
    %334 = vector.shape_cast %333 : vector<1x2x32xf32> to vector<2x32xf32>
    %335 = vector.shape_cast %327 : vector<2x32xf32> to vector<1x2x32xf32>
    tpu.vector_store %arg10[%c1_80, %c0_81, %c0_82], %335 {strides = array<i32>} : memref<4x2x32xf32, #tpu.memory_space<vmem>>, vector<1x2x32xf32>,
    %c0_83 = arith.constant 0 : index
    %c0_84 = arith.constant 0 : index
    %c0_85 = arith.constant 0 : index
    %336 = vector.load %arg11[%c0_83, %c0_84, %c0_85] : memref<4x2x32xf32, #tpu.memory_space<vmem>>, vector<1x2x32xf32>
    %337 = vector.shape_cast %336 : vector<1x2x32xf32> to vector<2x32xf32>
    %338 = vector.shape_cast %318 : vector<2x32xf32> to vector<1x2x32xf32>
    tpu.vector_store %arg11[%c0_83, %c0_84, %c0_85], %338 {strides = array<i32>} : memref<4x2x32xf32, #tpu.memory_space<vmem>>, vector<1x2x32xf32>,
    %c1_86 = arith.constant 1 : index
    %c0_87 = arith.constant 0 : index
    %c0_88 = arith.constant 0 : index
    %339 = vector.load %arg11[%c1_86, %c0_87, %c0_88] : memref<4x2x32xf32, #tpu.memory_space<vmem>>, vector<1x2x32xf32>
    %340 = vector.shape_cast %339 : vector<1x2x32xf32> to vector<2x32xf32>
    %341 = vector.shape_cast %321 : vector<2x32xf32> to vector<1x2x32xf32>
    tpu.vector_store %arg11[%c1_86, %c0_87, %c0_88], %341 {strides = array<i32>} : memref<4x2x32xf32, #tpu.memory_space<vmem>>, vector<1x2x32xf32>,
    %c1_89 = arith.constant 1 : index
    %c0_90 = arith.constant 0 : index
    %c0_91 = arith.constant 0 : index
    %342 = vector.load %arg6[%c1_89, %c0_90, %c0_91] : memref<2x1x256xf32, #tpu.memory_space<vmem>>, vector<1x1x256xf32>
    %343 = vector.shape_cast %342 : vector<1x1x256xf32> to vector<1x256xf32>
    %c1_92 = arith.constant 1 : index
    %c0_93 = arith.constant 0 : index
    %c0_94 = arith.constant 0 : index
    %344 = vector.load %arg5[%c1_92, %c0_93, %c0_94] : memref<2x64x256xbf16, #tpu.memory_space<vmem>>, vector<1x64x256xbf16>
    %345 = vector.shape_cast %344 : vector<1x64x256xbf16> to vector<64x256xbf16>
    %c0_95 = arith.constant 0 : index
    %c0_96 = arith.constant 0 : index
    %346 = vector.load %arg12[%c0_95, %c0_96] : memref<16x32xf32, #tpu.memory_space<vmem>>, vector<16x32xf32>
    %347 = arith.truncf %346 : vector<16x32xf32> to vector<16x32xbf16>
    %c0_97 = arith.constant 0 : index
    %c0_98 = arith.constant 0 : index
    %348 = vector.load %arg13[%c0_97, %c0_98] : memref<16x32xf32, #tpu.memory_space<vmem>>, vector<16x32xf32>
    %349 = arith.truncf %348 : vector<16x32xf32> to vector<16x32xbf16>
    %c0_99 = arith.constant 0 : index
    %c0_100 = arith.constant 0 : index
    %c0_101 = arith.constant 0 : index
    %350 = vector.load %arg4[%c0_99, %c0_100, %c0_101] : memref<1x64x256xbf16, #tpu.memory_space<vmem>>, vector<1x64x256xbf16>
    %351 = vector.shape_cast %350 : vector<1x64x256xbf16> to vector<64x256xbf16>
    %352 = vector.extract_strided_slice %351 {offsets = [0, 0], sizes = [32, 256], strides = [1, 1]} : vector<64x256xbf16> to vector<32x256xbf16>
    %cst_102 = arith.constant dense<0.000000e+00> : vector<16x256xf32>
    %353 = tpu.matmul %347, %352, %cst_102 {dimension_numbers = #tpu.dot_dimension_numbers<[1], [0], [0], [1], [0, 0, 1, 1], [], []>} : vector<16x32xbf16>, vector<32x256xbf16>, vector<16x256xf32> -> vector<16x256xf32>
    %354 = vector.extract_strided_slice %351 {offsets = [32, 0], sizes = [32, 256], strides = [1, 1]} : vector<64x256xbf16> to vector<32x256xbf16>
    %cst_103 = arith.constant dense<0.000000e+00> : vector<16x256xf32>
    %355 = tpu.matmul %349, %354, %cst_103 {dimension_numbers = #tpu.dot_dimension_numbers<[1], [0], [0], [1], [0, 0, 1, 1], [], []>} : vector<16x32xbf16>, vector<32x256xbf16>, vector<16x256xf32> -> vector<16x256xf32>
    %356 = arith.addf %353, %355 : vector<16x256xf32>
    %357 = vector.broadcast %343 : vector<1x256xf32> to vector<16x256xf32>
    %358 = arith.addf %356, %357 : vector<16x256xf32>
    %c2_104 = arith.constant 2 : index
    %c0_105 = arith.constant 0 : index
    %c0_106 = arith.constant 0 : index
    %359 = vector.load %arg1[%c2_104, %c0_105, %c0_106] : memref<4x2x32xf32, #tpu.memory_space<vmem>>, vector<1x2x32xf32>
    %360 = vector.shape_cast %359 : vector<1x2x32xf32> to vector<2x32xf32>
    %c3 = arith.constant 3 : index
    %c0_107 = arith.constant 0 : index
    %c0_108 = arith.constant 0 : index
    %361 = vector.load %arg1[%c3, %c0_107, %c0_108] : memref<4x2x32xf32, #tpu.memory_space<vmem>>, vector<1x2x32xf32>
    %362 = vector.shape_cast %361 : vector<1x2x32xf32> to vector<2x32xf32>
    %c2_109 = arith.constant 2 : index
    %c0_110 = arith.constant 0 : index
    %c0_111 = arith.constant 0 : index
    %363 = vector.load %arg2[%c2_109, %c0_110, %c0_111] : memref<4x2x32xf32, #tpu.memory_space<vmem>>, vector<1x2x32xf32>
    %364 = vector.shape_cast %363 : vector<1x2x32xf32> to vector<2x32xf32>
    %c3_112 = arith.constant 3 : index
    %c0_113 = arith.constant 0 : index
    %c0_114 = arith.constant 0 : index
    %365 = vector.load %arg2[%c3_112, %c0_113, %c0_114] : memref<4x2x32xf32, #tpu.memory_space<vmem>>, vector<1x2x32xf32>
    %366 = vector.shape_cast %365 : vector<1x2x32xf32> to vector<2x32xf32>
    %367 = tpu.concatenate %360, %362 in 1 : vector<2x32xf32>, vector<2x32xf32> -> vector<2x64xf32>
    %368 = vector.extract_strided_slice %358 {offsets = [0, 0], sizes = [2, 128], strides = [1, 1]} : vector<16x256xf32> to vector<2x128xf32>
    %369 = vector.extract_strided_slice %358 {offsets = [14, 128], sizes = [2, 128], strides = [1, 1]} : vector<16x256xf32> to vector<2x128xf32>
    %370 = tpu.concatenate %368, %369 in 1 : vector<2x128xf32>, vector<2x128xf32> -> vector<2x256xf32>
    %371 = arith.truncf %367 : vector<2x64xf32> to vector<2x64xbf16>
    %cst_115 = arith.constant dense<0.000000e+00> : vector<2x256xf32>
    %372 = tpu.matmul %371, %345, %cst_115 {dimension_numbers = #tpu.dot_dimension_numbers<[1], [0], [0], [1], [0, 0, 1, 1], [], []>} : vector<2x64xbf16>, vector<64x256xbf16>, vector<2x256xf32> -> vector<2x256xf32>
    %373 = arith.addf %370, %372 : vector<2x256xf32>
    %374 = math.tanh %373 : vector<2x256xf32>
    %cst_116 = arith.constant 5.000000e-01 : f32
    %375 = vector.broadcast %cst_116 : f32 to vector<2x256xf32>
    %376 = arith.mulf %375, %374 : vector<2x256xf32>
    %cst_117 = arith.constant 5.000000e-01 : f32
    %377 = vector.broadcast %cst_117 : f32 to vector<2x256xf32>
    %378 = arith.addf %376, %377 : vector<2x256xf32>
    %379 = arith.select %37, %374, %378 : vector<2x256xi1>, vector<2x256xf32>
    %380 = vector.extract_strided_slice %379 {offsets = [0, 0], sizes = [2, 32], strides = [1, 1]} : vector<2x256xf32> to vector<2x32xf32>
    %381 = vector.extract_strided_slice %379 {offsets = [0, 32], sizes = [2, 32], strides = [1, 1]} : vector<2x256xf32> to vector<2x32xf32>
    %382 = vector.extract_strided_slice %379 {offsets = [0, 64], sizes = [2, 32], strides = [1, 1]} : vector<2x256xf32> to vector<2x32xf32>
    %383 = vector.extract_strided_slice %379 {offsets = [0, 96], sizes = [2, 32], strides = [1, 1]} : vector<2x256xf32> to vector<2x32xf32>
    %384 = vector.extract_strided_slice %379 {offsets = [0, 128], sizes = [2, 32], strides = [1, 1]} : vector<2x256xf32> to vector<2x32xf32>
    %385 = vector.extract_strided_slice %379 {offsets = [0, 160], sizes = [2, 32], strides = [1, 1]} : vector<2x256xf32> to vector<2x32xf32>
    %386 = vector.extract_strided_slice %379 {offsets = [0, 192], sizes = [2, 32], strides = [1, 1]} : vector<2x256xf32> to vector<2x32xf32>
    %387 = vector.extract_strided_slice %379 {offsets = [0, 224], sizes = [2, 32], strides = [1, 1]} : vector<2x256xf32> to vector<2x32xf32>
    %388 = arith.mulf %381, %364 : vector<2x32xf32>
    %389 = arith.mulf %380, %382 : vector<2x32xf32>
    %390 = arith.addf %388, %389 : vector<2x32xf32>
    %391 = arith.mulf %385, %366 : vector<2x32xf32>
    %392 = arith.mulf %384, %386 : vector<2x32xf32>
    %393 = arith.addf %391, %392 : vector<2x32xf32>
    %394 = tpu.concatenate %390, %393 in 1 : vector<2x32xf32>, vector<2x32xf32> -> vector<2x64xf32>
    %395 = tpu.concatenate %383, %387 in 1 : vector<2x32xf32>, vector<2x32xf32> -> vector<2x64xf32>
    %396 = math.tanh %394 : vector<2x64xf32>
    %397 = arith.mulf %395, %396 : vector<2x64xf32>
    %398 = vector.extract_strided_slice %397 {offsets = [0, 0], sizes = [2, 32], strides = [1, 1]} : vector<2x64xf32> to vector<2x32xf32>
    %399 = vector.extract_strided_slice %397 {offsets = [0, 32], sizes = [2, 32], strides = [1, 1]} : vector<2x64xf32> to vector<2x32xf32>
    %c0_118 = arith.constant 0 : index
    %c0_119 = arith.constant 0 : index
    %400 = vector.load %arg12[%c0_118, %c0_119] : memref<16x32xf32, #tpu.memory_space<vmem>>, vector<2x32xf32>
    tpu.vector_store %arg12[%c0_118, %c0_119], %398 {strides = array<i32>} : memref<16x32xf32, #tpu.memory_space<vmem>>, vector<2x32xf32>,
    %c14_120 = arith.constant 14 : index
    %c0_121 = arith.constant 0 : index
    %401 = vector.load %arg13[%c14_120, %c0_121] : memref<16x32xf32, #tpu.memory_space<vmem>>, vector<2x32xf32>
    tpu.vector_store %arg13[%c14_120, %c0_121], %399 {strides = array<i32>} : memref<16x32xf32, #tpu.memory_space<vmem>>, vector<2x32xf32>,
    %402 = vector.extract_strided_slice %358 {offsets = [2, 0], sizes = [2, 128], strides = [1, 1]} : vector<16x256xf32> to vector<2x128xf32>
    %403 = vector.extract_strided_slice %358 {offsets = [12, 128], sizes = [2, 128], strides = [1, 1]} : vector<16x256xf32> to vector<2x128xf32>
    %404 = tpu.concatenate %402, %403 in 1 : vector<2x128xf32>, vector<2x128xf32> -> vector<2x256xf32>
    %405 = arith.truncf %397 : vector<2x64xf32> to vector<2x64xbf16>
    %cst_122 = arith.constant dense<0.000000e+00> : vector<2x256xf32>
    %406 = tpu.matmul %405, %345, %cst_122 {dimension_numbers = #tpu.dot_dimension_numbers<[1], [0], [0], [1], [0, 0, 1, 1], [], []>} : vector<2x64xbf16>, vector<64x256xbf16>, vector<2x256xf32> -> vector<2x256xf32>
    %407 = arith.addf %404, %406 : vector<2x256xf32>
    %408 = math.tanh %407 : vector<2x256xf32>
    %cst_123 = arith.constant 5.000000e-01 : f32
    %409 = vector.broadcast %cst_123 : f32 to vector<2x256xf32>
    %410 = arith.mulf %409, %408 : vector<2x256xf32>
    %cst_124 = arith.constant 5.000000e-01 : f32
    %411 = vector.broadcast %cst_124 : f32 to vector<2x256xf32>
    %412 = arith.addf %410, %411 : vector<2x256xf32>
    %413 = arith.select %37, %408, %412 : vector<2x256xi1>, vector<2x256xf32>
    %414 = vector.extract_strided_slice %413 {offsets = [0, 0], sizes = [2, 32], strides = [1, 1]} : vector<2x256xf32> to vector<2x32xf32>
    %415 = vector.extract_strided_slice %413 {offsets = [0, 32], sizes = [2, 32], strides = [1, 1]} : vector<2x256xf32> to vector<2x32xf32>
    %416 = vector.extract_strided_slice %413 {offsets = [0, 64], sizes = [2, 32], strides = [1, 1]} : vector<2x256xf32> to vector<2x32xf32>
    %417 = vector.extract_strided_slice %413 {offsets = [0, 96], sizes = [2, 32], strides = [1, 1]} : vector<2x256xf32> to vector<2x32xf32>
    %418 = vector.extract_strided_slice %413 {offsets = [0, 128], sizes = [2, 32], strides = [1, 1]} : vector<2x256xf32> to vector<2x32xf32>
    %419 = vector.extract_strided_slice %413 {offsets = [0, 160], sizes = [2, 32], strides = [1, 1]} : vector<2x256xf32> to vector<2x32xf32>
    %420 = vector.extract_strided_slice %413 {offsets = [0, 192], sizes = [2, 32], strides = [1, 1]} : vector<2x256xf32> to vector<2x32xf32>
    %421 = vector.extract_strided_slice %413 {offsets = [0, 224], sizes = [2, 32], strides = [1, 1]} : vector<2x256xf32> to vector<2x32xf32>
    %422 = arith.mulf %415, %390 : vector<2x32xf32>
    %423 = arith.mulf %414, %416 : vector<2x32xf32>
    %424 = arith.addf %422, %423 : vector<2x32xf32>
    %425 = arith.mulf %419, %393 : vector<2x32xf32>
    %426 = arith.mulf %418, %420 : vector<2x32xf32>
    %427 = arith.addf %425, %426 : vector<2x32xf32>
    %428 = tpu.concatenate %424, %427 in 1 : vector<2x32xf32>, vector<2x32xf32> -> vector<2x64xf32>
    %429 = tpu.concatenate %417, %421 in 1 : vector<2x32xf32>, vector<2x32xf32> -> vector<2x64xf32>
    %430 = math.tanh %428 : vector<2x64xf32>
    %431 = arith.mulf %429, %430 : vector<2x64xf32>
    %432 = vector.extract_strided_slice %431 {offsets = [0, 0], sizes = [2, 32], strides = [1, 1]} : vector<2x64xf32> to vector<2x32xf32>
    %433 = vector.extract_strided_slice %431 {offsets = [0, 32], sizes = [2, 32], strides = [1, 1]} : vector<2x64xf32> to vector<2x32xf32>
    %c2_125 = arith.constant 2 : index
    %c0_126 = arith.constant 0 : index
    %434 = vector.load %arg12[%c2_125, %c0_126] : memref<16x32xf32, #tpu.memory_space<vmem>>, vector<2x32xf32>
    tpu.vector_store %arg12[%c2_125, %c0_126], %432 {strides = array<i32>} : memref<16x32xf32, #tpu.memory_space<vmem>>, vector<2x32xf32>,
    %c12_127 = arith.constant 12 : index
    %c0_128 = arith.constant 0 : index
    %435 = vector.load %arg13[%c12_127, %c0_128] : memref<16x32xf32, #tpu.memory_space<vmem>>, vector<2x32xf32>
    tpu.vector_store %arg13[%c12_127, %c0_128], %433 {strides = array<i32>} : memref<16x32xf32, #tpu.memory_space<vmem>>, vector<2x32xf32>,
    %436 = vector.extract_strided_slice %358 {offsets = [4, 0], sizes = [2, 128], strides = [1, 1]} : vector<16x256xf32> to vector<2x128xf32>
    %437 = vector.extract_strided_slice %358 {offsets = [10, 128], sizes = [2, 128], strides = [1, 1]} : vector<16x256xf32> to vector<2x128xf32>
    %438 = tpu.concatenate %436, %437 in 1 : vector<2x128xf32>, vector<2x128xf32> -> vector<2x256xf32>
    %439 = arith.truncf %431 : vector<2x64xf32> to vector<2x64xbf16>
    %cst_129 = arith.constant dense<0.000000e+00> : vector<2x256xf32>
    %440 = tpu.matmul %439, %345, %cst_129 {dimension_numbers = #tpu.dot_dimension_numbers<[1], [0], [0], [1], [0, 0, 1, 1], [], []>} : vector<2x64xbf16>, vector<64x256xbf16>, vector<2x256xf32> -> vector<2x256xf32>
    %441 = arith.addf %438, %440 : vector<2x256xf32>
    %442 = math.tanh %441 : vector<2x256xf32>
    %cst_130 = arith.constant 5.000000e-01 : f32
    %443 = vector.broadcast %cst_130 : f32 to vector<2x256xf32>
    %444 = arith.mulf %443, %442 : vector<2x256xf32>
    %cst_131 = arith.constant 5.000000e-01 : f32
    %445 = vector.broadcast %cst_131 : f32 to vector<2x256xf32>
    %446 = arith.addf %444, %445 : vector<2x256xf32>
    %447 = arith.select %37, %442, %446 : vector<2x256xi1>, vector<2x256xf32>
    %448 = vector.extract_strided_slice %447 {offsets = [0, 0], sizes = [2, 32], strides = [1, 1]} : vector<2x256xf32> to vector<2x32xf32>
    %449 = vector.extract_strided_slice %447 {offsets = [0, 32], sizes = [2, 32], strides = [1, 1]} : vector<2x256xf32> to vector<2x32xf32>
    %450 = vector.extract_strided_slice %447 {offsets = [0, 64], sizes = [2, 32], strides = [1, 1]} : vector<2x256xf32> to vector<2x32xf32>
    %451 = vector.extract_strided_slice %447 {offsets = [0, 96], sizes = [2, 32], strides = [1, 1]} : vector<2x256xf32> to vector<2x32xf32>
    %452 = vector.extract_strided_slice %447 {offsets = [0, 128], sizes = [2, 32], strides = [1, 1]} : vector<2x256xf32> to vector<2x32xf32>
    %453 = vector.extract_strided_slice %447 {offsets = [0, 160], sizes = [2, 32], strides = [1, 1]} : vector<2x256xf32> to vector<2x32xf32>
    %454 = vector.extract_strided_slice %447 {offsets = [0, 192], sizes = [2, 32], strides = [1, 1]} : vector<2x256xf32> to vector<2x32xf32>
    %455 = vector.extract_strided_slice %447 {offsets = [0, 224], sizes = [2, 32], strides = [1, 1]} : vector<2x256xf32> to vector<2x32xf32>
    %456 = arith.mulf %449, %424 : vector<2x32xf32>
    %457 = arith.mulf %448, %450 : vector<2x32xf32>
    %458 = arith.addf %456, %457 : vector<2x32xf32>
    %459 = arith.mulf %453, %427 : vector<2x32xf32>
    %460 = arith.mulf %452, %454 : vector<2x32xf32>
    %461 = arith.addf %459, %460 : vector<2x32xf32>
    %462 = tpu.concatenate %458, %461 in 1 : vector<2x32xf32>, vector<2x32xf32> -> vector<2x64xf32>
    %463 = tpu.concatenate %451, %455 in 1 : vector<2x32xf32>, vector<2x32xf32> -> vector<2x64xf32>
    %464 = math.tanh %462 : vector<2x64xf32>
    %465 = arith.mulf %463, %464 : vector<2x64xf32>
    %466 = vector.extract_strided_slice %465 {offsets = [0, 0], sizes = [2, 32], strides = [1, 1]} : vector<2x64xf32> to vector<2x32xf32>
    %467 = vector.extract_strided_slice %465 {offsets = [0, 32], sizes = [2, 32], strides = [1, 1]} : vector<2x64xf32> to vector<2x32xf32>
    %c4_132 = arith.constant 4 : index
    %c0_133 = arith.constant 0 : index
    %468 = vector.load %arg12[%c4_132, %c0_133] : memref<16x32xf32, #tpu.memory_space<vmem>>, vector<2x32xf32>
    tpu.vector_store %arg12[%c4_132, %c0_133], %466 {strides = array<i32>} : memref<16x32xf32, #tpu.memory_space<vmem>>, vector<2x32xf32>,
    %c10_134 = arith.constant 10 : index
    %c0_135 = arith.constant 0 : index
    %469 = vector.load %arg13[%c10_134, %c0_135] : memref<16x32xf32, #tpu.memory_space<vmem>>, vector<2x32xf32>
    tpu.vector_store %arg13[%c10_134, %c0_135], %467 {strides = array<i32>} : memref<16x32xf32, #tpu.memory_space<vmem>>, vector<2x32xf32>,
    %470 = vector.extract_strided_slice %358 {offsets = [6, 0], sizes = [2, 128], strides = [1, 1]} : vector<16x256xf32> to vector<2x128xf32>
    %471 = vector.extract_strided_slice %358 {offsets = [8, 128], sizes = [2, 128], strides = [1, 1]} : vector<16x256xf32> to vector<2x128xf32>
    %472 = tpu.concatenate %470, %471 in 1 : vector<2x128xf32>, vector<2x128xf32> -> vector<2x256xf32>
    %473 = arith.truncf %465 : vector<2x64xf32> to vector<2x64xbf16>
    %cst_136 = arith.constant dense<0.000000e+00> : vector<2x256xf32>
    %474 = tpu.matmul %473, %345, %cst_136 {dimension_numbers = #tpu.dot_dimension_numbers<[1], [0], [0], [1], [0, 0, 1, 1], [], []>} : vector<2x64xbf16>, vector<64x256xbf16>, vector<2x256xf32> -> vector<2x256xf32>
    %475 = arith.addf %472, %474 : vector<2x256xf32>
    %476 = math.tanh %475 : vector<2x256xf32>
    %cst_137 = arith.constant 5.000000e-01 : f32
    %477 = vector.broadcast %cst_137 : f32 to vector<2x256xf32>
    %478 = arith.mulf %477, %476 : vector<2x256xf32>
    %cst_138 = arith.constant 5.000000e-01 : f32
    %479 = vector.broadcast %cst_138 : f32 to vector<2x256xf32>
    %480 = arith.addf %478, %479 : vector<2x256xf32>
    %481 = arith.select %37, %476, %480 : vector<2x256xi1>, vector<2x256xf32>
    %482 = vector.extract_strided_slice %481 {offsets = [0, 0], sizes = [2, 32], strides = [1, 1]} : vector<2x256xf32> to vector<2x32xf32>
    %483 = vector.extract_strided_slice %481 {offsets = [0, 32], sizes = [2, 32], strides = [1, 1]} : vector<2x256xf32> to vector<2x32xf32>
    %484 = vector.extract_strided_slice %481 {offsets = [0, 64], sizes = [2, 32], strides = [1, 1]} : vector<2x256xf32> to vector<2x32xf32>
    %485 = vector.extract_strided_slice %481 {offsets = [0, 96], sizes = [2, 32], strides = [1, 1]} : vector<2x256xf32> to vector<2x32xf32>
    %486 = vector.extract_strided_slice %481 {offsets = [0, 128], sizes = [2, 32], strides = [1, 1]} : vector<2x256xf32> to vector<2x32xf32>
    %487 = vector.extract_strided_slice %481 {offsets = [0, 160], sizes = [2, 32], strides = [1, 1]} : vector<2x256xf32> to vector<2x32xf32>
    %488 = vector.extract_strided_slice %481 {offsets = [0, 192], sizes = [2, 32], strides = [1, 1]} : vector<2x256xf32> to vector<2x32xf32>
    %489 = vector.extract_strided_slice %481 {offsets = [0, 224], sizes = [2, 32], strides = [1, 1]} : vector<2x256xf32> to vector<2x32xf32>
    %490 = arith.mulf %483, %458 : vector<2x32xf32>
    %491 = arith.mulf %482, %484 : vector<2x32xf32>
    %492 = arith.addf %490, %491 : vector<2x32xf32>
    %493 = arith.mulf %487, %461 : vector<2x32xf32>
    %494 = arith.mulf %486, %488 : vector<2x32xf32>
    %495 = arith.addf %493, %494 : vector<2x32xf32>
    %496 = tpu.concatenate %492, %495 in 1 : vector<2x32xf32>, vector<2x32xf32> -> vector<2x64xf32>
    %497 = tpu.concatenate %485, %489 in 1 : vector<2x32xf32>, vector<2x32xf32> -> vector<2x64xf32>
    %498 = math.tanh %496 : vector<2x64xf32>
    %499 = arith.mulf %497, %498 : vector<2x64xf32>
    %500 = vector.extract_strided_slice %499 {offsets = [0, 0], sizes = [2, 32], strides = [1, 1]} : vector<2x64xf32> to vector<2x32xf32>
    %501 = vector.extract_strided_slice %499 {offsets = [0, 32], sizes = [2, 32], strides = [1, 1]} : vector<2x64xf32> to vector<2x32xf32>
    %c6_139 = arith.constant 6 : index
    %c0_140 = arith.constant 0 : index
    %502 = vector.load %arg12[%c6_139, %c0_140] : memref<16x32xf32, #tpu.memory_space<vmem>>, vector<2x32xf32>
    tpu.vector_store %arg12[%c6_139, %c0_140], %500 {strides = array<i32>} : memref<16x32xf32, #tpu.memory_space<vmem>>, vector<2x32xf32>,
    %c8_141 = arith.constant 8 : index
    %c0_142 = arith.constant 0 : index
    %503 = vector.load %arg13[%c8_141, %c0_142] : memref<16x32xf32, #tpu.memory_space<vmem>>, vector<2x32xf32>
    tpu.vector_store %arg13[%c8_141, %c0_142], %501 {strides = array<i32>} : memref<16x32xf32, #tpu.memory_space<vmem>>, vector<2x32xf32>,
    %504 = vector.extract_strided_slice %358 {offsets = [8, 0], sizes = [2, 128], strides = [1, 1]} : vector<16x256xf32> to vector<2x128xf32>
    %505 = vector.extract_strided_slice %358 {offsets = [6, 128], sizes = [2, 128], strides = [1, 1]} : vector<16x256xf32> to vector<2x128xf32>
    %506 = tpu.concatenate %504, %505 in 1 : vector<2x128xf32>, vector<2x128xf32> -> vector<2x256xf32>
    %507 = arith.truncf %499 : vector<2x64xf32> to vector<2x64xbf16>
    %cst_143 = arith.constant dense<0.000000e+00> : vector<2x256xf32>
    %508 = tpu.matmul %507, %345, %cst_143 {dimension_numbers = #tpu.dot_dimension_numbers<[1], [0], [0], [1], [0, 0, 1, 1], [], []>} : vector<2x64xbf16>, vector<64x256xbf16>, vector<2x256xf32> -> vector<2x256xf32>
    %509 = arith.addf %506, %508 : vector<2x256xf32>
    %510 = math.tanh %509 : vector<2x256xf32>
    %cst_144 = arith.constant 5.000000e-01 : f32
    %511 = vector.broadcast %cst_144 : f32 to vector<2x256xf32>
    %512 = arith.mulf %511, %510 : vector<2x256xf32>
    %cst_145 = arith.constant 5.000000e-01 : f32
    %513 = vector.broadcast %cst_145 : f32 to vector<2x256xf32>
    %514 = arith.addf %512, %513 : vector<2x256xf32>
    %515 = arith.select %37, %510, %514 : vector<2x256xi1>, vector<2x256xf32>
    %516 = vector.extract_strided_slice %515 {offsets = [0, 0], sizes = [2, 32], strides = [1, 1]} : vector<2x256xf32> to vector<2x32xf32>
    %517 = vector.extract_strided_slice %515 {offsets = [0, 32], sizes = [2, 32], strides = [1, 1]} : vector<2x256xf32> to vector<2x32xf32>
    %518 = vector.extract_strided_slice %515 {offsets = [0, 64], sizes = [2, 32], strides = [1, 1]} : vector<2x256xf32> to vector<2x32xf32>
    %519 = vector.extract_strided_slice %515 {offsets = [0, 96], sizes = [2, 32], strides = [1, 1]} : vector<2x256xf32> to vector<2x32xf32>
    %520 = vector.extract_strided_slice %515 {offsets = [0, 128], sizes = [2, 32], strides = [1, 1]} : vector<2x256xf32> to vector<2x32xf32>
    %521 = vector.extract_strided_slice %515 {offsets = [0, 160], sizes = [2, 32], strides = [1, 1]} : vector<2x256xf32> to vector<2x32xf32>
    %522 = vector.extract_strided_slice %515 {offsets = [0, 192], sizes = [2, 32], strides = [1, 1]} : vector<2x256xf32> to vector<2x32xf32>
    %523 = vector.extract_strided_slice %515 {offsets = [0, 224], sizes = [2, 32], strides = [1, 1]} : vector<2x256xf32> to vector<2x32xf32>
    %524 = arith.mulf %517, %492 : vector<2x32xf32>
    %525 = arith.mulf %516, %518 : vector<2x32xf32>
    %526 = arith.addf %524, %525 : vector<2x32xf32>
    %527 = arith.mulf %521, %495 : vector<2x32xf32>
    %528 = arith.mulf %520, %522 : vector<2x32xf32>
    %529 = arith.addf %527, %528 : vector<2x32xf32>
    %530 = tpu.concatenate %526, %529 in 1 : vector<2x32xf32>, vector<2x32xf32> -> vector<2x64xf32>
    %531 = tpu.concatenate %519, %523 in 1 : vector<2x32xf32>, vector<2x32xf32> -> vector<2x64xf32>
    %532 = math.tanh %530 : vector<2x64xf32>
    %533 = arith.mulf %531, %532 : vector<2x64xf32>
    %534 = vector.extract_strided_slice %533 {offsets = [0, 0], sizes = [2, 32], strides = [1, 1]} : vector<2x64xf32> to vector<2x32xf32>
    %535 = vector.extract_strided_slice %533 {offsets = [0, 32], sizes = [2, 32], strides = [1, 1]} : vector<2x64xf32> to vector<2x32xf32>
    %c8_146 = arith.constant 8 : index
    %c0_147 = arith.constant 0 : index
    %536 = vector.load %arg12[%c8_146, %c0_147] : memref<16x32xf32, #tpu.memory_space<vmem>>, vector<2x32xf32>
    tpu.vector_store %arg12[%c8_146, %c0_147], %534 {strides = array<i32>} : memref<16x32xf32, #tpu.memory_space<vmem>>, vector<2x32xf32>,
    %c6_148 = arith.constant 6 : index
    %c0_149 = arith.constant 0 : index
    %537 = vector.load %arg13[%c6_148, %c0_149] : memref<16x32xf32, #tpu.memory_space<vmem>>, vector<2x32xf32>
    tpu.vector_store %arg13[%c6_148, %c0_149], %535 {strides = array<i32>} : memref<16x32xf32, #tpu.memory_space<vmem>>, vector<2x32xf32>,
    %538 = vector.extract_strided_slice %358 {offsets = [10, 0], sizes = [2, 128], strides = [1, 1]} : vector<16x256xf32> to vector<2x128xf32>
    %539 = vector.extract_strided_slice %358 {offsets = [4, 128], sizes = [2, 128], strides = [1, 1]} : vector<16x256xf32> to vector<2x128xf32>
    %540 = tpu.concatenate %538, %539 in 1 : vector<2x128xf32>, vector<2x128xf32> -> vector<2x256xf32>
    %541 = arith.truncf %533 : vector<2x64xf32> to vector<2x64xbf16>
    %cst_150 = arith.constant dense<0.000000e+00> : vector<2x256xf32>
    %542 = tpu.matmul %541, %345, %cst_150 {dimension_numbers = #tpu.dot_dimension_numbers<[1], [0], [0], [1], [0, 0, 1, 1], [], []>} : vector<2x64xbf16>, vector<64x256xbf16>, vector<2x256xf32> -> vector<2x256xf32>
    %543 = arith.addf %540, %542 : vector<2x256xf32>
    %544 = math.tanh %543 : vector<2x256xf32>
    %cst_151 = arith.constant 5.000000e-01 : f32
    %545 = vector.broadcast %cst_151 : f32 to vector<2x256xf32>
    %546 = arith.mulf %545, %544 : vector<2x256xf32>
    %cst_152 = arith.constant 5.000000e-01 : f32
    %547 = vector.broadcast %cst_152 : f32 to vector<2x256xf32>
    %548 = arith.addf %546, %547 : vector<2x256xf32>
    %549 = arith.select %37, %544, %548 : vector<2x256xi1>, vector<2x256xf32>
    %550 = vector.extract_strided_slice %549 {offsets = [0, 0], sizes = [2, 32], strides = [1, 1]} : vector<2x256xf32> to vector<2x32xf32>
    %551 = vector.extract_strided_slice %549 {offsets = [0, 32], sizes = [2, 32], strides = [1, 1]} : vector<2x256xf32> to vector<2x32xf32>
    %552 = vector.extract_strided_slice %549 {offsets = [0, 64], sizes = [2, 32], strides = [1, 1]} : vector<2x256xf32> to vector<2x32xf32>
    %553 = vector.extract_strided_slice %549 {offsets = [0, 96], sizes = [2, 32], strides = [1, 1]} : vector<2x256xf32> to vector<2x32xf32>
    %554 = vector.extract_strided_slice %549 {offsets = [0, 128], sizes = [2, 32], strides = [1, 1]} : vector<2x256xf32> to vector<2x32xf32>
    %555 = vector.extract_strided_slice %549 {offsets = [0, 160], sizes = [2, 32], strides = [1, 1]} : vector<2x256xf32> to vector<2x32xf32>
    %556 = vector.extract_strided_slice %549 {offsets = [0, 192], sizes = [2, 32], strides = [1, 1]} : vector<2x256xf32> to vector<2x32xf32>
    %557 = vector.extract_strided_slice %549 {offsets = [0, 224], sizes = [2, 32], strides = [1, 1]} : vector<2x256xf32> to vector<2x32xf32>
    %558 = arith.mulf %551, %526 : vector<2x32xf32>
    %559 = arith.mulf %550, %552 : vector<2x32xf32>
    %560 = arith.addf %558, %559 : vector<2x32xf32>
    %561 = arith.mulf %555, %529 : vector<2x32xf32>
    %562 = arith.mulf %554, %556 : vector<2x32xf32>
    %563 = arith.addf %561, %562 : vector<2x32xf32>
    %564 = tpu.concatenate %560, %563 in 1 : vector<2x32xf32>, vector<2x32xf32> -> vector<2x64xf32>
    %565 = tpu.concatenate %553, %557 in 1 : vector<2x32xf32>, vector<2x32xf32> -> vector<2x64xf32>
    %566 = math.tanh %564 : vector<2x64xf32>
    %567 = arith.mulf %565, %566 : vector<2x64xf32>
    %568 = vector.extract_strided_slice %567 {offsets = [0, 0], sizes = [2, 32], strides = [1, 1]} : vector<2x64xf32> to vector<2x32xf32>
    %569 = vector.extract_strided_slice %567 {offsets = [0, 32], sizes = [2, 32], strides = [1, 1]} : vector<2x64xf32> to vector<2x32xf32>
    %c10_153 = arith.constant 10 : index
    %c0_154 = arith.constant 0 : index
    %570 = vector.load %arg12[%c10_153, %c0_154] : memref<16x32xf32, #tpu.memory_space<vmem>>, vector<2x32xf32>
    tpu.vector_store %arg12[%c10_153, %c0_154], %568 {strides = array<i32>} : memref<16x32xf32, #tpu.memory_space<vmem>>, vector<2x32xf32>,
    %c4_155 = arith.constant 4 : index
    %c0_156 = arith.constant 0 : index
    %571 = vector.load %arg13[%c4_155, %c0_156] : memref<16x32xf32, #tpu.memory_space<vmem>>, vector<2x32xf32>
    tpu.vector_store %arg13[%c4_155, %c0_156], %569 {strides = array<i32>} : memref<16x32xf32, #tpu.memory_space<vmem>>, vector<2x32xf32>,
    %572 = vector.extract_strided_slice %358 {offsets = [12, 0], sizes = [2, 128], strides = [1, 1]} : vector<16x256xf32> to vector<2x128xf32>
    %573 = vector.extract_strided_slice %358 {offsets = [2, 128], sizes = [2, 128], strides = [1, 1]} : vector<16x256xf32> to vector<2x128xf32>
    %574 = tpu.concatenate %572, %573 in 1 : vector<2x128xf32>, vector<2x128xf32> -> vector<2x256xf32>
    %575 = arith.truncf %567 : vector<2x64xf32> to vector<2x64xbf16>
    %cst_157 = arith.constant dense<0.000000e+00> : vector<2x256xf32>
    %576 = tpu.matmul %575, %345, %cst_157 {dimension_numbers = #tpu.dot_dimension_numbers<[1], [0], [0], [1], [0, 0, 1, 1], [], []>} : vector<2x64xbf16>, vector<64x256xbf16>, vector<2x256xf32> -> vector<2x256xf32>
    %577 = arith.addf %574, %576 : vector<2x256xf32>
    %578 = math.tanh %577 : vector<2x256xf32>
    %cst_158 = arith.constant 5.000000e-01 : f32
    %579 = vector.broadcast %cst_158 : f32 to vector<2x256xf32>
    %580 = arith.mulf %579, %578 : vector<2x256xf32>
    %cst_159 = arith.constant 5.000000e-01 : f32
    %581 = vector.broadcast %cst_159 : f32 to vector<2x256xf32>
    %582 = arith.addf %580, %581 : vector<2x256xf32>
    %583 = arith.select %37, %578, %582 : vector<2x256xi1>, vector<2x256xf32>
    %584 = vector.extract_strided_slice %583 {offsets = [0, 0], sizes = [2, 32], strides = [1, 1]} : vector<2x256xf32> to vector<2x32xf32>
    %585 = vector.extract_strided_slice %583 {offsets = [0, 32], sizes = [2, 32], strides = [1, 1]} : vector<2x256xf32> to vector<2x32xf32>
    %586 = vector.extract_strided_slice %583 {offsets = [0, 64], sizes = [2, 32], strides = [1, 1]} : vector<2x256xf32> to vector<2x32xf32>
    %587 = vector.extract_strided_slice %583 {offsets = [0, 96], sizes = [2, 32], strides = [1, 1]} : vector<2x256xf32> to vector<2x32xf32>
    %588 = vector.extract_strided_slice %583 {offsets = [0, 128], sizes = [2, 32], strides = [1, 1]} : vector<2x256xf32> to vector<2x32xf32>
    %589 = vector.extract_strided_slice %583 {offsets = [0, 160], sizes = [2, 32], strides = [1, 1]} : vector<2x256xf32> to vector<2x32xf32>
    %590 = vector.extract_strided_slice %583 {offsets = [0, 192], sizes = [2, 32], strides = [1, 1]} : vector<2x256xf32> to vector<2x32xf32>
    %591 = vector.extract_strided_slice %583 {offsets = [0, 224], sizes = [2, 32], strides = [1, 1]} : vector<2x256xf32> to vector<2x32xf32>
    %592 = arith.mulf %585, %560 : vector<2x32xf32>
    %593 = arith.mulf %584, %586 : vector<2x32xf32>
    %594 = arith.addf %592, %593 : vector<2x32xf32>
    %595 = arith.mulf %589, %563 : vector<2x32xf32>
    %596 = arith.mulf %588, %590 : vector<2x32xf32>
    %597 = arith.addf %595, %596 : vector<2x32xf32>
    %598 = tpu.concatenate %594, %597 in 1 : vector<2x32xf32>, vector<2x32xf32> -> vector<2x64xf32>
    %599 = tpu.concatenate %587, %591 in 1 : vector<2x32xf32>, vector<2x32xf32> -> vector<2x64xf32>
    %600 = math.tanh %598 : vector<2x64xf32>
    %601 = arith.mulf %599, %600 : vector<2x64xf32>
    %602 = vector.extract_strided_slice %601 {offsets = [0, 0], sizes = [2, 32], strides = [1, 1]} : vector<2x64xf32> to vector<2x32xf32>
    %603 = vector.extract_strided_slice %601 {offsets = [0, 32], sizes = [2, 32], strides = [1, 1]} : vector<2x64xf32> to vector<2x32xf32>
    %c12_160 = arith.constant 12 : index
    %c0_161 = arith.constant 0 : index
    %604 = vector.load %arg12[%c12_160, %c0_161] : memref<16x32xf32, #tpu.memory_space<vmem>>, vector<2x32xf32>
    tpu.vector_store %arg12[%c12_160, %c0_161], %602 {strides = array<i32>} : memref<16x32xf32, #tpu.memory_space<vmem>>, vector<2x32xf32>,
    %c2_162 = arith.constant 2 : index
    %c0_163 = arith.constant 0 : index
    %605 = vector.load %arg13[%c2_162, %c0_163] : memref<16x32xf32, #tpu.memory_space<vmem>>, vector<2x32xf32>
    tpu.vector_store %arg13[%c2_162, %c0_163], %603 {strides = array<i32>} : memref<16x32xf32, #tpu.memory_space<vmem>>, vector<2x32xf32>,
    %606 = vector.extract_strided_slice %358 {offsets = [14, 0], sizes = [2, 128], strides = [1, 1]} : vector<16x256xf32> to vector<2x128xf32>
    %607 = vector.extract_strided_slice %358 {offsets = [0, 128], sizes = [2, 128], strides = [1, 1]} : vector<16x256xf32> to vector<2x128xf32>
    %608 = tpu.concatenate %606, %607 in 1 : vector<2x128xf32>, vector<2x128xf32> -> vector<2x256xf32>
    %609 = arith.truncf %601 : vector<2x64xf32> to vector<2x64xbf16>
    %cst_164 = arith.constant dense<0.000000e+00> : vector<2x256xf32>
    %610 = tpu.matmul %609, %345, %cst_164 {dimension_numbers = #tpu.dot_dimension_numbers<[1], [0], [0], [1], [0, 0, 1, 1], [], []>} : vector<2x64xbf16>, vector<64x256xbf16>, vector<2x256xf32> -> vector<2x256xf32>
    %611 = arith.addf %608, %610 : vector<2x256xf32>
    %612 = math.tanh %611 : vector<2x256xf32>
    %cst_165 = arith.constant 5.000000e-01 : f32
    %613 = vector.broadcast %cst_165 : f32 to vector<2x256xf32>
    %614 = arith.mulf %613, %612 : vector<2x256xf32>
    %cst_166 = arith.constant 5.000000e-01 : f32
    %615 = vector.broadcast %cst_166 : f32 to vector<2x256xf32>
    %616 = arith.addf %614, %615 : vector<2x256xf32>
    %617 = arith.select %37, %612, %616 : vector<2x256xi1>, vector<2x256xf32>
    %618 = vector.extract_strided_slice %617 {offsets = [0, 0], sizes = [2, 32], strides = [1, 1]} : vector<2x256xf32> to vector<2x32xf32>
    %619 = vector.extract_strided_slice %617 {offsets = [0, 32], sizes = [2, 32], strides = [1, 1]} : vector<2x256xf32> to vector<2x32xf32>
    %620 = vector.extract_strided_slice %617 {offsets = [0, 64], sizes = [2, 32], strides = [1, 1]} : vector<2x256xf32> to vector<2x32xf32>
    %621 = vector.extract_strided_slice %617 {offsets = [0, 96], sizes = [2, 32], strides = [1, 1]} : vector<2x256xf32> to vector<2x32xf32>
    %622 = vector.extract_strided_slice %617 {offsets = [0, 128], sizes = [2, 32], strides = [1, 1]} : vector<2x256xf32> to vector<2x32xf32>
    %623 = vector.extract_strided_slice %617 {offsets = [0, 160], sizes = [2, 32], strides = [1, 1]} : vector<2x256xf32> to vector<2x32xf32>
    %624 = vector.extract_strided_slice %617 {offsets = [0, 192], sizes = [2, 32], strides = [1, 1]} : vector<2x256xf32> to vector<2x32xf32>
    %625 = vector.extract_strided_slice %617 {offsets = [0, 224], sizes = [2, 32], strides = [1, 1]} : vector<2x256xf32> to vector<2x32xf32>
    %626 = arith.mulf %619, %594 : vector<2x32xf32>
    %627 = arith.mulf %618, %620 : vector<2x32xf32>
    %628 = arith.addf %626, %627 : vector<2x32xf32>
    %629 = arith.mulf %623, %597 : vector<2x32xf32>
    %630 = arith.mulf %622, %624 : vector<2x32xf32>
    %631 = arith.addf %629, %630 : vector<2x32xf32>
    %632 = tpu.concatenate %628, %631 in 1 : vector<2x32xf32>, vector<2x32xf32> -> vector<2x64xf32>
    %633 = tpu.concatenate %621, %625 in 1 : vector<2x32xf32>, vector<2x32xf32> -> vector<2x64xf32>
    %634 = math.tanh %632 : vector<2x64xf32>
    %635 = arith.mulf %633, %634 : vector<2x64xf32>
    %636 = vector.extract_strided_slice %635 {offsets = [0, 0], sizes = [2, 32], strides = [1, 1]} : vector<2x64xf32> to vector<2x32xf32>
    %637 = vector.extract_strided_slice %635 {offsets = [0, 32], sizes = [2, 32], strides = [1, 1]} : vector<2x64xf32> to vector<2x32xf32>
    %c14_167 = arith.constant 14 : index
    %c0_168 = arith.constant 0 : index
    %638 = vector.load %arg12[%c14_167, %c0_168] : memref<16x32xf32, #tpu.memory_space<vmem>>, vector<2x32xf32>
    tpu.vector_store %arg12[%c14_167, %c0_168], %636 {strides = array<i32>} : memref<16x32xf32, #tpu.memory_space<vmem>>, vector<2x32xf32>,
    %c0_169 = arith.constant 0 : index
    %c0_170 = arith.constant 0 : index
    %639 = vector.load %arg13[%c0_169, %c0_170] : memref<16x32xf32, #tpu.memory_space<vmem>>, vector<2x32xf32>
    tpu.vector_store %arg13[%c0_169, %c0_170], %637 {strides = array<i32>} : memref<16x32xf32, #tpu.memory_space<vmem>>, vector<2x32xf32>,
    %c2_171 = arith.constant 2 : index
    %c0_172 = arith.constant 0 : index
    %c0_173 = arith.constant 0 : index
    %640 = vector.load %arg10[%c2_171, %c0_172, %c0_173] : memref<4x2x32xf32, #tpu.memory_space<vmem>>, vector<1x2x32xf32>
    %641 = vector.shape_cast %640 : vector<1x2x32xf32> to vector<2x32xf32>
    %642 = vector.shape_cast %636 : vector<2x32xf32> to vector<1x2x32xf32>
    tpu.vector_store %arg10[%c2_171, %c0_172, %c0_173], %642 {strides = array<i32>} : memref<4x2x32xf32, #tpu.memory_space<vmem>>, vector<1x2x32xf32>,
    %c3_174 = arith.constant 3 : index
    %c0_175 = arith.constant 0 : index
    %c0_176 = arith.constant 0 : index
    %643 = vector.load %arg10[%c3_174, %c0_175, %c0_176] : memref<4x2x32xf32, #tpu.memory_space<vmem>>, vector<1x2x32xf32>
    %644 = vector.shape_cast %643 : vector<1x2x32xf32> to vector<2x32xf32>
    %645 = vector.shape_cast %637 : vector<2x32xf32> to vector<1x2x32xf32>
    tpu.vector_store %arg10[%c3_174, %c0_175, %c0_176], %645 {strides = array<i32>} : memref<4x2x32xf32, #tpu.memory_space<vmem>>, vector<1x2x32xf32>,
    %c2_177 = arith.constant 2 : index
    %c0_178 = arith.constant 0 : index
    %c0_179 = arith.constant 0 : index
    %646 = vector.load %arg11[%c2_177, %c0_178, %c0_179] : memref<4x2x32xf32, #tpu.memory_space<vmem>>, vector<1x2x32xf32>
    %647 = vector.shape_cast %646 : vector<1x2x32xf32> to vector<2x32xf32>
    %648 = vector.shape_cast %628 : vector<2x32xf32> to vector<1x2x32xf32>
    tpu.vector_store %arg11[%c2_177, %c0_178, %c0_179], %648 {strides = array<i32>} : memref<4x2x32xf32, #tpu.memory_space<vmem>>, vector<1x2x32xf32>,
    %c3_180 = arith.constant 3 : index
    %c0_181 = arith.constant 0 : index
    %c0_182 = arith.constant 0 : index
    %649 = vector.load %arg11[%c3_180, %c0_181, %c0_182] : memref<4x2x32xf32, #tpu.memory_space<vmem>>, vector<1x2x32xf32>
    %650 = vector.shape_cast %649 : vector<1x2x32xf32> to vector<2x32xf32>
    %651 = vector.shape_cast %631 : vector<2x32xf32> to vector<1x2x32xf32>
    tpu.vector_store %arg11[%c3_180, %c0_181, %c0_182], %651 {strides = array<i32>} : memref<4x2x32xf32, #tpu.memory_space<vmem>>, vector<1x2x32xf32>,
    %c0_183 = arith.constant 0 : index
    %c0_184 = arith.constant 0 : index
    %652 = vector.load %arg12[%c0_183, %c0_184] : memref<16x32xf32, #tpu.memory_space<vmem>>, vector<16x32xf32>
    %653 = arith.truncf %652 : vector<16x32xf32> to vector<16x32xbf16>
    %c0_185 = arith.constant 0 : index
    %c0_186 = arith.constant 0 : index
    %654 = vector.load %arg13[%c0_185, %c0_186] : memref<16x32xf32, #tpu.memory_space<vmem>>, vector<16x32xf32>
    %655 = arith.truncf %654 : vector<16x32xf32> to vector<16x32xbf16>
    %c0_187 = arith.constant 0 : index
    %c0_188 = arith.constant 0 : index
    %656 = vector.load %arg7[%c0_187, %c0_188] : memref<64x128xbf16, #tpu.memory_space<vmem>>, vector<64x128xbf16>
    %657 = vector.extract_strided_slice %656 {offsets = [0, 0], sizes = [32, 128], strides = [1, 1]} : vector<64x128xbf16> to vector<32x128xbf16>
    %cst_189 = arith.constant dense<0.000000e+00> : vector<16x128xf32>
    %658 = tpu.matmul %653, %657, %cst_189 {dimension_numbers = #tpu.dot_dimension_numbers<[1], [0], [0], [1], [0, 0, 1, 1], [], []>} : vector<16x32xbf16>, vector<32x128xbf16>, vector<16x128xf32> -> vector<16x128xf32>
    %659 = vector.extract_strided_slice %656 {offsets = [32, 0], sizes = [32, 128], strides = [1, 1]} : vector<64x128xbf16> to vector<32x128xbf16>
    %cst_190 = arith.constant dense<0.000000e+00> : vector<16x128xf32>
    %660 = tpu.matmul %655, %659, %cst_190 {dimension_numbers = #tpu.dot_dimension_numbers<[1], [0], [0], [1], [0, 0, 1, 1], [], []>} : vector<16x32xbf16>, vector<32x128xbf16>, vector<16x128xf32> -> vector<16x128xf32>
    %661 = arith.addf %658, %660 : vector<16x128xf32>
    %c0_191 = arith.constant 0 : index
    %c0_192 = arith.constant 0 : index
    %662 = vector.load %arg8[%c0_191, %c0_192] : memref<1x128xf32, #tpu.memory_space<vmem>>, vector<1x128xf32>
    %663 = vector.broadcast %662 : vector<1x128xf32> to vector<16x128xf32>
    %664 = arith.addf %661, %663 : vector<16x128xf32>
    %c0_193 = arith.constant 0 : index
    %c0_194 = arith.constant 0 : index
    %665 = vector.load %arg9[%c0_193, %c0_194] : memref<16x128xf32, #tpu.memory_space<vmem>>, vector<16x128xf32>
    tpu.vector_store %arg9[%c0_193, %c0_194], %664 {strides = array<i32>} : memref<16x128xf32, #tpu.memory_space<vmem>>, vector<16x128xf32>,
    return
  }
}

</mosaic_0001>

<bundles_post_ra>
// kernel: decoder_forward.1
= control target key start
LH: loop header
LB: loop body
LE: loop exit
PB: predicated region body
PF: predicated region fallthrough
CT: control target
= control target key end

     0   :  { %17 = vsyncpa [#allocation5], 0  ;;  %s3227_s0 = inlined_call_operand.vmem [shape: f32[16,1], index: 0, kind: input, shape index: {}]   ;;  %s3228_s1 = inlined_call_operand.hbm [shape: f32[4,2,32], index: 1, kind: input, shape index: {}]   ;;  %s3229_s2 = inlined_call_operand.hbm [shape: f32[4,2,32], index: 2, kind: input, shape index: {}]   ;;  %s3230_s3 = inlined_call_operand.vmem [shape: f32[1,256], index: 3, kind: input, shape index: {}]   ;;  %s3231_s4 = inlined_call_operand.hbm [shape: bf16[1,64,256], index: 4, kind: input, shape index: {}]   ;;  %s3232_s5 = inlined_call_operand.hbm [shape: bf16[2,64,256], index: 5, kind: input, shape index: {}]   ;;  %s3233_s6 = inlined_call_operand.vmem [shape: f32[2,1,256], index: 6, kind: input, shape index: {}]   ;;  %s3234_s7 = inlined_call_operand.vmem [shape: bf16[64,128], index: 7, kind: input, shape index: {}]   ;;  %s3235_s8 = inlined_call_operand.vmem [shape: f32[1,128], index: 8, kind: input, shape index: {}]   ;;  %s3236_s9 = inlined_call_operand.vmem [shape: f32[16,128], index: 9, kind: output, shape index: {0}]   ;;  %s3237_s10 = inlined_call_operand.hbm [shape: f32[4,2,32], index: 10, kind: output, shape index: {1}]   ;;  %s3238_s11 = inlined_call_operand.hbm [shape: f32[4,2,32], index: 11, kind: output, shape index: {2}]  }
   0x1   :  { %18 = vsyncpa [#allocation8], 0 }
   0x2   :  { %19 = vsyncpa [#allocation11], 0 }
   0x3   :  { %20 = vsyncpa [#allocation6], 0 }
   0x4   :  { %21 = vsyncpa [#allocation14], 0  ;;  %s41_s19 = sshll.u32 %s3229_s2, 4  ;;  %s2472_s20 = smov [#allocation7]   ;;  %s42_s19 = int_to_ptr.hbm [resolvable:$true] %s41_s19 }
   0x5   :  { %s43_s21 = sshll.u32 %s2472_s20, 4  ;;  %s28_s24 = sshll.u32 %s3228_s1, 4  ;;  %s44_s21 = int_to_ptr.vmem [resolvable:$true] %s43_s21  ;;  %s29_s24 = int_to_ptr.hbm [resolvable:$true] %s28_s24 }
   0x6   :  { %s2473_s25 = smov 32   ;;  %s2474_s26 = smov 2  }
   0x7   :  { %49 = dma.hbm_to_vmem [thread:$0]  %s42_s19, 128, %s44_s21, [#allocation8], %s2473_s25, %s2473_s25, %s2474_s26  }
   0x8   :  { %s2475_s27 = smov [#allocation4]   ;;  %s56_s2 = sshll.u32 %s3231_s4, 4  ;;  %s57_s2 = int_to_ptr.hbm [resolvable:$true] %s56_s2 }
   0x9   :  { %s30_s28 = sshll.u32 %s2475_s27, 4  ;;  %s2476_s1 = smov [#allocation9]   ;;  %s31_s28 = int_to_ptr.vmem [resolvable:$true] %s30_s28 }
   0xa   :  { %36 = dma.hbm_to_vmem [thread:$0]  %s29_s24, 128, %s31_s28, [#allocation5], %s2473_s25, %s2473_s25, %s2474_s26  }
   0xb   :  { %s58_s12 = sshll.u32 %s2476_s1, 4  ;;  %s69_s15 = sshll.u32 %s3232_s5, 4  ;;  %s59_s12 = int_to_ptr.vmem [resolvable:$true] %s58_s12  ;;  %s70_s15 = int_to_ptr.hbm [resolvable:$true] %s69_s15 }
   0xc   :  { %s2477_s16 = smov 128   ;;  %s2478_s17 = smov 8  }
   0xd   :  { %64 = dma.hbm_to_vmem [thread:$0]  %s57_s2, 1024, %s59_s12, [#allocation8], %s2477_s16, %s2477_s16, %s2478_s17  }
   0xe   :  { %s2479_s18 = smov [#allocation10]  }
   0xf   :  { %s71_s19 = sshll.u32 %s2479_s18, 4  ;;  %s72_s19 = int_to_ptr.vmem [resolvable:$true] %s71_s19 }
  0x10   :  { %77 = dma.hbm_to_vmem [thread:$0]  %s70_s15, 2048, %s72_s19, [#allocation11], %s2477_s16, %s2477_s16, %s2478_s17  }
  0x11   :  { %2462 = dma.done.wait [#allocation5], 128  }
  0x12   :  { %2463 = vsyncadd [#allocation5], 4294967168 }
  0x13   :  { %2464 = dma.done.wait [#allocation8], 1152  }
  0x14   :  { %2465 = vsyncadd [#allocation8], 4294966144 }
  0x15   :  { %2466 = dma.done.wait [#allocation11], 2048  }
  0x16   :  { %2467 = vsyncadd [#allocation11], 4294965248  ;;  %v176_v0 = vld [vmem:[#allocation4 + $0x2] sm:$0x3]  ;;  %v2185_v2 = vld [vmem:[#allocation10 + $0x34] sm:$0xf0]  ;;  %v101_v48 = vlaneseq }
  0x17   :  { %v2053_v1 = vld [vmem:[#allocation10 + $0x30] sm:$0xf]  ;;  %181 = vrot.lane.b32.xlu0 %v176_v0, %s2473_s25  ;;  %v2184_v4 = vld [vmem:[#allocation10 + $0x34] sm:$0xf]  ;;  %v2055_v5 = vld [vmem:[#allocation10 + $0x38] sm:$0xf0] }
  0x18   :  { %v2564_v3 = vor.u32 %v2185_v2, %v2053_v1  ;;  %v2045_v6 = vld [vmem:[#allocation10 + $0x20] sm:$0xf]  ;;  %v2566_v7 = vor.u32 %v2184_v4, %v2055_v5  ;;  %v2183_v8 = vld [vmem:[#allocation10 + $0x24] sm:$0xf0]  ;;  %v2182_v9 = vld [vmem:[#allocation10 + $0x24] sm:$0xf] }
  0x19   :  { %v2047_v10 = vld [vmem:[#allocation10 + $0x28] sm:$0xf0]  ;;  %v2569_v11 = vor.u32 %v2183_v8, %v2045_v6  ;;  %v2037_v13 = vld [vmem:[#allocation10 + $0x10] sm:$0xf]  ;;  %v2181_v14 = vld [vmem:[#allocation10 + $0x14] sm:$0xf0] }
  0x1a   :  { %238 = vmatpush.bf16.msra.mxu0 %v2564_v3  ;;  %328 = vmatpush.bf16.msra.mxu2 %v2564_v3  ;;  %v2573_v12 = vor.u32 %v2182_v9, %v2047_v10  ;;  %v2180_v15 = vld [vmem:[#allocation10 + $0x14] sm:$0xf]  ;;  %v2039_v16 = vld [vmem:[#allocation10 + $0x18] sm:$0xf0]  ;;  %v2577_v17 = vor.u32 %v2181_v14, %v2037_v13  ;;  %v2029_v19 = vld [vmem:[#allocation10] sm:$0xf] }
  0x1b   :  { %251 = vmatpush.bf16.msra.mxu1 %v2566_v7  ;;  %341 = vmatpush.bf16.msra.mxu3 %v2566_v7  ;;  %v2581_v18 = vor.u32 %v2180_v15, %v2039_v16  ;;  %v2179_v20 = vld [vmem:[#allocation10 + $0x4] sm:$0xf0]  ;;  %v2178_v21 = vld [vmem:[#allocation10 + $0x4] sm:$0xf]  ;;  %v2031_v23 = vld [vmem:[#allocation10 + $0x8] sm:$0xf0] }
  0x1c   :  { %v2588_v22 = vor.u32 %v2179_v20, %v2029_v19  ;;  %v2590_v24 = vor.u32 %v2178_v21, %v2031_v23  ;;  %v144_v25 = vld [vmem:[%s3227_s0 + $0x8] sm:$0xff]  ;;  %v143_v26 = vld [vmem:[%s3227_s0] sm:$0xff]  ;;  %v2480_v28 = vmov 0   ;;  %vm184_vm0 = vcmask 261120   ;;  %s2482_s27 = smov 96   ;;  %s2483_s16 = smov [#allocation12]  }
  0x1d   :  { %v177_v27 = vld [vmem:[#allocation7] sm:$0x3]  ;;  %2220 = vset.pattern.permute.xlu1 %v2480_v28  ;;  %2219 = vset.pattern.permute.xlu0 %v2480_v28  ;;  %v174_v29 = vld [vmem:[#allocation4] sm:$0x3]  ;;  %vm230_vm1 = vcmask 523264   ;;  %v102_v51 = vand.u32 127, %v101_v48 }
  0x1e   :  { %239 = vmatpush.bf16.msra.mxu0 %v2569_v11  ;;  %329 = vmatpush.bf16.msra.mxu2 %v2569_v11  ;;  %v145_v33 = vld [vmem:[%s3230_s3] sm:$0x3]  ;;  %s2481_s3 = smov 64   ;;  %v179_v8 = vld [vmem:[#allocation7 + $0x2] sm:$0x3]  ;;  %vm311_vm8 = vcmask 254976  }
  0x1f   :  { %252 = vmatpush.bf16.msra.mxu1 %v2573_v12  ;;  %342 = vmatpush.bf16.msra.mxu3 %v2573_v12  ;;  %v134_v34 = vld [vmem:[%s3233_s6] sm:$0x3]  ;;  %v157_v35 = vperm.slane %v145_v33, 0  ;;  %v158_v36 = vperm.slane %v145_v33, 1  ;;  %v103_v56 = vadd.s32 128, %v102_v51  ;;  %vm128_vm2 = vcmp.ge.s32.totalorder %v102_v51, 64 }
  0x20   :  { %153 = vperm.xlu1 %2220, %v144_v25   ;;  %148 = vperm.xlu0 %2219, %v143_v26   ;;  %v166_v40 = vperm.slane %v134_v34, 0  ;;  %v167_v41 = vperm.slane %v134_v34, 1  ;;  %vm130_vm3 = vcmp.lt.s32.totalorder %v102_v51, 96  ;;  %vm404_vm9 = vcmask 257026   ;;  %s1990_s17 = sshll.u32 %s2483_s16, 4  ;;  %s1992_s4 = sshll.u32 %s3237_s10, 4  ;;  %s1991_s17 = int_to_ptr.vmem [resolvable:$true] %s1990_s17  ;;  %s1993_s4 = int_to_ptr.hbm [resolvable:$true] %s1992_s4 }
  0x21   :  { %271 = vrot.lane.b32.xlu2 %v177_v27, %s2473_s25  ;;  %v115_v57 = vand.u32 127, %v103_v56  ;;  %vm2648_vm6 = vmand %vm128_vm2, %vm130_vm3  ;;  %vm497_vm10 = vcmask 259076   ;;  %vm590_vm11 = vcmask 261126   ;;  %s2005_s0 = sshll.u32 %s3238_s11, 4  ;;  %s2006_s0 = int_to_ptr.hbm [resolvable:$true] %s2005_s0 }
  0x22   :  { %240 = vmatpush.bf16.msra.mxu0 %v2577_v17  ;;  %330 = vmatpush.bf16.msra.mxu2 %v2577_v17 }
  0x23   :  { %253 = vmatpush.bf16.msra.mxu1 %v2581_v18  ;;  %343 = vmatpush.bf16.msra.mxu3 %v2581_v18  ;;  %vm129_vm4 = vcmp.ge.s32.totalorder %v115_v57, 64  ;;  %vm131_vm5 = vcmp.lt.s32.totalorder %v115_v57, 96 }
  0x24   :  { %vm2652_vm7 = vmand %vm129_vm4, %vm131_vm5 }
  0x26   :  { %241 = vmatpush.bf16.msra.mxu0 %v2588_v22  ;;  %331 = vmatpush.bf16.msra.mxu2 %v2588_v22 }
  0x27   :  { %254 = vmatpush.bf16.msra.mxu1 %v2590_v24  ;;  %344 = vmatpush.bf16.msra.mxu3 %v2590_v24 }
  0x2a   :  { %421 = vmatpush.bf16.msrb.mxu0 %v2564_v3  ;;  %514 = vmatpush.bf16.msrb.mxu2 %v2564_v3 }
  0x2b   :  { %434 = vmatpush.bf16.msrb.mxu1 %v2566_v7  ;;  %527 = vmatpush.bf16.msrb.mxu3 %v2566_v7 }
  0x2e   :  { %422 = vmatpush.bf16.msrb.mxu0 %v2569_v11  ;;  %515 = vmatpush.bf16.msrb.mxu2 %v2569_v11 }
  0x2f   :  { %435 = vmatpush.bf16.msrb.mxu1 %v2573_v12  ;;  %528 = vmatpush.bf16.msrb.mxu3 %v2573_v12 }
  0x32   :  { %423 = vmatpush.bf16.msrb.mxu0 %v2577_v17  ;;  %516 = vmatpush.bf16.msrb.mxu2 %v2577_v17 }
  0x33   :  { %436 = vmatpush.bf16.msrb.mxu1 %v2581_v18  ;;  %529 = vmatpush.bf16.msrb.mxu3 %v2581_v18 }
  0x36   :  { %424 = vmatpush.bf16.msrb.mxu0 %v2588_v22  ;;  %517 = vmatpush.bf16.msrb.mxu2 %v2588_v22 }
  0x37   :  { %437 = vmatpush.bf16.msrb.mxu1 %v2590_v24  ;;  %530 = vmatpush.bf16.msrb.mxu3 %v2590_v24 }
  0x7b   :  { %v272_v9 = vpop.permute.xlu2 %271 }
  0x89   :  { %v182_v30 = vpop.permute.xlu0 %181 }
  0x8a   :  { %v185_v31 = vsel %vm184_vm0, %v174_v29, %v182_v30 }
  0x8b   :  { %v189_v32 = vpack.c.bf16 %v185_v31, %v185_v31 }
  0x8d   :  { %2059 = vmatmul.msk.bf16.vlgmr.msra.gmra.mxu0 %vm230_vm1, %v189_v32  ;;  %2060 = vmatmul.msk.bf16.vlgmr.msra.gmra.mxu1 %vm230_vm1, %v189_v32 }
  0x8e   :  { %610 = vmatpush.bf16.msra.mxu0 %v2564_v3  ;;  %623 = vmatpush.bf16.msra.mxu1 %v2566_v7 }
  0x92   :  { %611 = vmatpush.bf16.msra.mxu0 %v2569_v11  ;;  %624 = vmatpush.bf16.msra.mxu1 %v2573_v12  ;;  %v154_v37 = vpop.permute.xlu1 %153  ;;  %v149_v38 = vpop.permute.xlu0 %148 }
  0x93   :  { %v163_v39 = vmul.f32 %v157_v35, %v154_v37  ;;  %v162_v42 = vmul.f32 %v158_v36, %v149_v38  ;;  %v164_v45 = vmul.f32 %v158_v36, %v154_v37  ;;  %v161_v47 = vmul.f32 %v157_v35, %v149_v38 }
  0x95   :  { %v2636_v43 = vadd.f32 %v166_v40, %v163_v39  ;;  %v2638_v44 = vadd.f32 %v167_v41, %v162_v42  ;;  %v2640_v46 = vadd.f32 %v167_v41, %v164_v45  ;;  %v2642_v49 = vadd.f32 %v166_v40, %v161_v47 }
  0x96   :  { %612 = vmatpush.bf16.msra.mxu0 %v2577_v17  ;;  %625 = vmatpush.bf16.msra.mxu1 %v2581_v18 }
  0x97   :  { %v187_v50 = vrot.slane %v2640_v46, 6  ;;  %v318_v37 = vrot.slane %v2640_v46, 2 }
  0x9a   :  { %613 = vmatpush.bf16.msra.mxu0 %v2588_v22  ;;  %626 = vmatpush.bf16.msra.mxu1 %v2590_v24 }
 0x10a   :  { %v243_v52 = vpop.f32.mrf.mxu0  ;;  %v256_v53 = vpop.f32.mrf.mxu1 }
 0x10b   :  { %v260_v54 = vadd.f32 %v243_v52, %v2642_v49  ;;  %v261_v55 = vadd.f32 %v256_v53, %v187_v50 }
 0x10d   :  { %2222 = vtanh.f32 %v260_v54 }
 0x10e   :  { %2224 = vtanh.f32 %v261_v55 }
 0x112   :  { %v245_v58 = vpop.f32.mrf.mxu0  ;;  %v258_v59 = vpop.f32.mrf.mxu1 }
 0x113   :  { %v2223_v60 = vpop.eup %2222 }
 0x114   :  { %v2225_v61 = vpop.eup %2224  ;;  %v264_v62 = vmul.f32 0.5, %v2223_v60 }
 0x115   :  { %v265_v0 = vmul.f32 0.5, %v2225_v61 }
 0x116   :  { %v266_v1 = vadd.f32 0.5, %v264_v62 }
 0x117   :  { %v267_v4 = vadd.f32 0.5, %v265_v0 }
 0x118   :  { %v268_v5 = vsel %vm2648_vm6, %v2223_v60, %v266_v1 }
 0x119   :  { %v269_v6 = vsel %vm2652_vm7, %v2225_v61, %v267_v4  ;;  %276 = vrot.lane.b32.xlu1 %v268_v5, %s2481_s3  ;;  %v274_v16 = vmul.f32 %v272_v9, %v268_v5 }
 0x11a   :  { %291 = vrot.lane.b32.xlu2 %v269_v6, %s2481_s3 }
 0x122   :  { %286 = vrot.lane.b32.xlu2 %v179_v8, %s2473_s25 }
 0x12a   :  { %305 = vrot.lane.b32.xlu2 %v268_v5, %s2473_s25 }
 0x174   :  { %v292_v10 = vpop.permute.xlu2 %291 }
 0x175   :  { %v294_v13 = vmul.f32 %v292_v10, %v269_v6 }
 0x177   :  { %296 = vrot.lane.b32.xlu0 %v294_v13, %s2473_s25 }
 0x17c   :  { %v287_v21 = vpop.permute.xlu2 %286 }
 0x17d   :  { %v289_v25 = vmul.f32 %v287_v21, %v269_v6 }
 0x184   :  { %v306_v29 = vpop.permute.xlu2 %305 }
 0x185   :  { %v308_v31 = vsel %vm184_vm0, %v306_v29, %v292_v10 }
 0x18b   :  { %v277_v14 = vpop.permute.xlu1 %276 }
 0x18c   :  { %v279_v15 = vmul.f32 %v277_v14, %v268_v5 }
 0x18e   :  { %281 = vrot.lane.b32.xlu1 %v279_v15, %s2473_s25 }
 0x1e9   :  { %v297_v23 = vpop.permute.xlu0 %296 }
 0x1ea   :  { %v299_v26 = vadd.f32 %v297_v23, %v289_v25 }
 0x1ec   :  { %v380_v1 = vrot.slane %v299_v26, 6 }
 0x200   :  { %v282_v19 = vpop.permute.xlu1 %281 }
 0x201   :  { %v284_v20 = vadd.f32 %v282_v19, %v274_v16 }
 0x203   :  { %301 = vrot.lane.b32.xlu1 %v284_v20, %s2482_s27  ;;  %v366_v60 = vrot.slane %v284_v20, 6 }
 0x275   :  { %v302_v27 = vpop.permute.xlu1 %301 }
 0x276   :  { %v304_v28 = vsel %vm184_vm0, %v302_v27, %v299_v26 }
 0x277   :  { %2226 = vtanh.f32 %v304_v28 }
 0x27d   :  { %v2227_v30 = vpop.eup %2226 }
 0x27e   :  { %v2669_v32 = vmul.f32 %v2227_v30, %v308_v31 }
 0x280   :  { %312 = vst.msk [vmem:[#allocation2] sm:$0x3] %vm311_vm8, %v2669_v32  ;;  %v320_v33 = vpack.c.bf16 %v2669_v32, %v2669_v32 }
 0x282   :  { %2061 = vmatmul.msk.bf16.vlgmr.msra.gmra.mxu2 %vm230_vm1, %v320_v33  ;;  %2062 = vmatmul.msk.bf16.vlgmr.msra.gmra.mxu3 %vm230_vm1, %v320_v33 }
 0x283   :  { %696 = vmatpush.bf16.msra.mxu2 %v2564_v3  ;;  %709 = vmatpush.bf16.msra.mxu3 %v2566_v7 }
 0x287   :  { %697 = vmatpush.bf16.msra.mxu2 %v2569_v11  ;;  %710 = vmatpush.bf16.msra.mxu3 %v2573_v12 }
 0x28b   :  { %698 = vmatpush.bf16.msra.mxu2 %v2577_v17  ;;  %711 = vmatpush.bf16.msra.mxu3 %v2581_v18 }
 0x28f   :  { %699 = vmatpush.bf16.msra.mxu2 %v2588_v22  ;;  %712 = vmatpush.bf16.msra.mxu3 %v2590_v24 }
 0x305   :  { %v333_v34 = vpop.f32.mrf.mxu2  ;;  %v346_v35 = vpop.f32.mrf.mxu3 }
 0x306   :  { %v352_v36 = vrot.slane %v333_v34, 6  ;;  %v353_v38 = vrot.slane %v346_v35, 6 }
 0x308   :  { %v356_v39 = vadd.f32 %v352_v36, %v2642_v49  ;;  %v357_v40 = vadd.f32 %v353_v38, %v318_v37 }
 0x30a   :  { %2228 = vtanh.f32 %v356_v39 }
 0x30b   :  { %2230 = vtanh.f32 %v357_v40 }
 0x30d   :  { %v335_v41 = vpop.f32.mrf.mxu2  ;;  %v348_v42 = vpop.f32.mrf.mxu3 }
 0x310   :  { %v2229_v45 = vpop.eup %2228 }
 0x311   :  { %v2231_v47 = vpop.eup %2230  ;;  %v360_v48 = vmul.f32 0.5, %v2229_v45 }
 0x312   :  { %v361_v51 = vmul.f32 0.5, %v2231_v47 }
 0x313   :  { %v362_v52 = vadd.f32 0.5, %v360_v48 }
 0x314   :  { %v363_v53 = vadd.f32 0.5, %v361_v51 }
 0x315   :  { %v364_v54 = vsel %vm2648_vm6, %v2229_v45, %v362_v52 }
 0x316   :  { %v365_v55 = vsel %vm2652_vm7, %v2231_v47, %v363_v53  ;;  %370 = vrot.lane.b32.xlu0 %v364_v54, %s2481_s3  ;;  %v368_v61 = vmul.f32 %v366_v60, %v364_v54 }
 0x317   :  { %384 = vrot.lane.b32.xlu1 %v365_v55, %s2481_s3  ;;  %v382_v5 = vmul.f32 %v380_v1, %v365_v55 }
 0x388   :  { %v371_v56 = vpop.permute.xlu0 %370 }
 0x389   :  { %v385_v57 = vpop.permute.xlu1 %384  ;;  %v373_v58 = vmul.f32 %v371_v56, %v364_v54 }
 0x38a   :  { %v387_v59 = vmul.f32 %v385_v57, %v365_v55 }
 0x38b   :  { %375 = vrot.lane.b32.xlu2 %v373_v58, %s2473_s25 }
 0x38c   :  { %389 = vrot.lane.b32.xlu0 %v387_v59, %s2473_s25 }
 0x393   :  { %398 = vrot.lane.b32.xlu2 %v364_v54, %s2473_s25 }
 0x3e5   :  { %v376_v62 = vpop.permute.xlu2 %375 }
 0x3e6   :  { %v378_v0 = vadd.f32 %v376_v62, %v368_v61 }
 0x3e8   :  { %394 = vrot.lane.b32.xlu1 %v378_v0, %s2482_s27  ;;  %v459_v45 = vrot.slane %v378_v0, 6 }
 0x3ed   :  { %v399_v10 = vpop.permute.xlu2 %398 }
 0x3ee   :  { %v401_v14 = vsel %vm184_vm0, %v399_v10, %v385_v57 }
 0x3fe   :  { %v390_v4 = vpop.permute.xlu0 %389 }
 0x3ff   :  { %v392_v6 = vadd.f32 %v390_v4, %v382_v5 }
 0x401   :  { %v473_v52 = vrot.slane %v392_v6, 6 }
 0x45a   :  { %v395_v8 = vpop.permute.xlu1 %394 }
 0x45b   :  { %v397_v9 = vsel %vm184_vm0, %v395_v8, %v392_v6 }
 0x45c   :  { %2232 = vtanh.f32 %v397_v9 }
 0x462   :  { %v2233_v13 = vpop.eup %2232 }
 0x463   :  { %v2701_v15 = vmul.f32 %v2233_v13, %v401_v14 }
 0x465   :  { %405 = vst.msk [vmem:[#allocation2] sm:$0xc] %vm404_vm9, %v2701_v15  ;;  %v411_v16 = vpack.c.bf16 %v2701_v15, %v2701_v15 }
 0x467   :  { %v413_v19 = vrot.slane %v411_v16, 1 }
 0x469   :  { %2063 = vmatmul.msk.bf16.vlgmr.msrb.gmra.mxu0 %vm230_vm1, %v413_v19  ;;  %2064 = vmatmul.msk.bf16.vlgmr.msrb.gmra.mxu1 %vm230_vm1, %v413_v19 }
 0x46a   :  { %788 = vmatpush.bf16.msrb.mxu0 %v2564_v3  ;;  %801 = vmatpush.bf16.msrb.mxu1 %v2566_v7 }
 0x46e   :  { %789 = vmatpush.bf16.msrb.mxu0 %v2569_v11  ;;  %802 = vmatpush.bf16.msrb.mxu1 %v2573_v12 }
 0x472   :  { %790 = vmatpush.bf16.msrb.mxu0 %v2577_v17  ;;  %803 = vmatpush.bf16.msrb.mxu1 %v2581_v18 }
 0x476   :  { %791 = vmatpush.bf16.msrb.mxu0 %v2588_v22  ;;  %804 = vmatpush.bf16.msrb.mxu1 %v2590_v24 }
 0x4e6   :  { %v426_v20 = vpop.f32.mrf.mxu0  ;;  %v439_v21 = vpop.f32.mrf.mxu1 }
 0x4e7   :  { %v445_v23 = vrot.slane %v426_v20, 4  ;;  %v446_v25 = vrot.slane %v439_v21, 4 }
 0x4e9   :  { %v449_v26 = vadd.f32 %v445_v23, %v2642_v49  ;;  %v450_v27 = vadd.f32 %v446_v25, %v187_v50 }
 0x4eb   :  { %2234 = vtanh.f32 %v449_v26 }
 0x4ec   :  { %2236 = vtanh.f32 %v450_v27 }
 0x4ee   :  { %v428_v28 = vpop.f32.mrf.mxu0  ;;  %v441_v29 = vpop.f32.mrf.mxu1 }
 0x4f1   :  { %v2235_v30 = vpop.eup %2234 }
 0x4f2   :  { %v2237_v31 = vpop.eup %2236  ;;  %v453_v33 = vmul.f32 0.5, %v2235_v30 }
 0x4f3   :  { %v454_v34 = vmul.f32 0.5, %v2237_v31 }
 0x4f4   :  { %v455_v35 = vadd.f32 0.5, %v453_v33 }
 0x4f5   :  { %v456_v36 = vadd.f32 0.5, %v454_v34 }
 0x4f6   :  { %v457_v38 = vsel %vm2648_vm6, %v2235_v30, %v455_v35 }
 0x4f7   :  { %v458_v39 = vsel %vm2652_vm7, %v2237_v31, %v456_v36  ;;  %463 = vrot.lane.b32.xlu0 %v457_v38, %s2481_s3  ;;  %v461_v47 = vmul.f32 %v459_v45, %v457_v38 }
 0x4f8   :  { %477 = vrot.lane.b32.xlu1 %v458_v39, %s2481_s3  ;;  %v475_v54 = vmul.f32 %v473_v52, %v458_v39 }
 0x569   :  { %v464_v50 = vpop.permute.xlu0 %463 }
 0x56a   :  { %v478_v40 = vpop.permute.xlu1 %477  ;;  %v466_v41 = vmul.f32 %v464_v50, %v457_v38 }
 0x56b   :  { %v480_v42 = vmul.f32 %v478_v40, %v458_v39 }
 0x56c   :  { %468 = vrot.lane.b32.xlu2 %v466_v41, %s2473_s25 }
 0x56d   :  { %482 = vrot.lane.b32.xlu0 %v480_v42, %s2473_s25 }
 0x574   :  { %491 = vrot.lane.b32.xlu2 %v457_v38, %s2473_s25  ;;  %v598_v38 = vrot.slane %v2638_v44, 6 }
 0x5c6   :  { %v469_v48 = vpop.permute.xlu2 %468 }
 0x5c7   :  { %v471_v51 = vadd.f32 %v469_v48, %v461_v47 }
 0x5c9   :  { %487 = vrot.lane.b32.xlu1 %v471_v51, %s2482_s27  ;;  %v552_v16 = vrot.slane %v471_v51, 6 }
 0x5ce   :  { %v492_v58 = vpop.permute.xlu2 %491 }
 0x5cf   :  { %v494_v60 = vsel %vm184_vm0, %v492_v58, %v478_v40 }
 0x5df   :  { %v483_v53 = vpop.permute.xlu0 %482 }
 0x5e0   :  { %v485_v55 = vadd.f32 %v483_v53, %v475_v54 }
 0x5e2   :  { %v566_v23 = vrot.slane %v485_v55, 6 }
 0x63b   :  { %v488_v56 = vpop.permute.xlu1 %487 }
 0x63c   :  { %v490_v57 = vsel %vm184_vm0, %v488_v56, %v485_v55 }
 0x63d   :  { %2238 = vtanh.f32 %v490_v57 }
 0x643   :  { %v2239_v59 = vpop.eup %2238 }
 0x644   :  { %v2732_v61 = vmul.f32 %v2239_v59, %v494_v60 }
 0x646   :  { %498 = vst.msk [vmem:[#allocation2] sm:$0x30] %vm497_vm10, %v2732_v61  ;;  %v504_v62 = vpack.c.bf16 %v2732_v61, %v2732_v61 }
 0x648   :  { %v506_v0 = vrot.slane %v504_v62, 2 }
 0x64a   :  { %2065 = vmatmul.msk.bf16.vlgmr.msrb.gmra.mxu2 %vm230_vm1, %v506_v0  ;;  %2066 = vmatmul.msk.bf16.vlgmr.msrb.gmra.mxu3 %vm230_vm1, %v506_v0 }
 0x64b   :  { %880 = vmatpush.bf16.msrb.mxu2 %v2564_v3  ;;  %893 = vmatpush.bf16.msrb.mxu3 %v2566_v7 }
 0x64f   :  { %881 = vmatpush.bf16.msrb.mxu2 %v2569_v11  ;;  %894 = vmatpush.bf16.msrb.mxu3 %v2573_v12 }
 0x653   :  { %882 = vmatpush.bf16.msrb.mxu2 %v2577_v17  ;;  %895 = vmatpush.bf16.msrb.mxu3 %v2581_v18 }
 0x657   :  { %883 = vmatpush.bf16.msrb.mxu2 %v2588_v22  ;;  %896 = vmatpush.bf16.msrb.mxu3 %v2590_v24 }
 0x6cd   :  { %v519_v1 = vpop.f32.mrf.mxu2  ;;  %v532_v4 = vpop.f32.mrf.mxu3 }
 0x6ce   :  { %v538_v5 = vrot.slane %v519_v1, 2  ;;  %v539_v6 = vrot.slane %v532_v4, 2 }
 0x6d0   :  { %v542_v3 = vadd.f32 %v538_v5, %v2642_v49  ;;  %v543_v7 = vadd.f32 %v539_v6, %v318_v37 }
 0x6d2   :  { %2240 = vtanh.f32 %v542_v3 }
 0x6d3   :  { %2242 = vtanh.f32 %v543_v7 }
 0x6d5   :  { %v521_v11 = vpop.f32.mrf.mxu2  ;;  %v534_v12 = vpop.f32.mrf.mxu3 }
 0x6d8   :  { %v2241_v17 = vpop.eup %2240 }
 0x6d9   :  { %v2243_v8 = vpop.eup %2242  ;;  %v546_v18 = vmul.f32 0.5, %v2241_v17 }
 0x6da   :  { %v547_v9 = vmul.f32 0.5, %v2243_v8 }
 0x6db   :  { %v548_v22 = vadd.f32 0.5, %v546_v18 }
 0x6dc   :  { %v549_v10 = vadd.f32 0.5, %v547_v9 }
 0x6dd   :  { %v550_v24 = vsel %vm2648_vm6, %v2241_v17, %v548_v22 }
 0x6de   :  { %v551_v13 = vsel %vm2652_vm7, %v2243_v8, %v549_v10  ;;  %556 = vrot.lane.b32.xlu0 %v550_v24, %s2481_s3  ;;  %v554_v19 = vmul.f32 %v552_v16, %v550_v24 }
 0x6df   :  { %570 = vrot.lane.b32.xlu1 %v551_v13, %s2481_s3  ;;  %v568_v26 = vmul.f32 %v566_v23, %v551_v13 }
 0x750   :  { %v557_v46 = vpop.permute.xlu0 %556 }
 0x751   :  { %v571_v49 = vpop.permute.xlu1 %570  ;;  %v559_v37 = vmul.f32 %v557_v46, %v550_v24  ;;  %v686_v46 = vrot.slane %v2638_v44, 2 }
 0x752   :  { %v573_v14 = vmul.f32 %v571_v49, %v551_v13 }
 0x753   :  { %561 = vrot.lane.b32.xlu2 %v559_v37, %s2473_s25 }
 0x754   :  { %575 = vrot.lane.b32.xlu0 %v573_v14, %s2473_s25 }
 0x75b   :  { %584 = vrot.lane.b32.xlu2 %v550_v24, %s2473_s25 }
 0x7ad   :  { %v562_v20 = vpop.permute.xlu2 %561 }
 0x7ae   :  { %v564_v21 = vadd.f32 %v562_v20, %v554_v19 }
 0x7b0   :  { %580 = vrot.lane.b32.xlu1 %v564_v21, %s2482_s27  ;;  %v642_v62 = vrot.slane %v564_v21, 6 }
 0x7b5   :  { %v585_v30 = vpop.permute.xlu2 %584 }
 0x7b6   :  { %v587_v33 = vsel %vm184_vm0, %v585_v30, %v571_v49 }
 0x7c6   :  { %v576_v25 = vpop.permute.xlu0 %575 }
 0x7c7   :  { %v578_v27 = vadd.f32 %v576_v25, %v568_v26 }
 0x7c9   :  { %v656_v5 = vrot.slane %v578_v27, 6 }
 0x822   :  { %v581_v28 = vpop.permute.xlu1 %580 }
 0x823   :  { %v583_v29 = vsel %vm184_vm0, %v581_v28, %v578_v27 }
 0x824   :  { %2244 = vtanh.f32 %v583_v29 }
 0x82a   :  { %v2245_v31 = vpop.eup %2244 }
 0x82b   :  { %v2763_v34 = vmul.f32 %v2245_v31, %v587_v33 }
 0x82d   :  { %591 = vst.msk [vmem:[#allocation2] sm:$0xc0] %vm590_vm11, %v2763_v34  ;;  %v600_v35 = vpack.c.bf16 %v2763_v34, %v2763_v34 }
 0x82f   :  { %v602_v36 = vrot.slane %v600_v35, 3 }
 0x831   :  { %2067 = vmatmul.msk.bf16.vlgmr.msra.gmra.mxu0 %vm230_vm1, %v602_v36  ;;  %2068 = vmatmul.msk.bf16.vlgmr.msra.gmra.mxu1 %vm230_vm1, %v602_v36 }
 0x8ae   :  { %v615_v39 = vpop.f32.mrf.mxu0  ;;  %v628_v50 = vpop.f32.mrf.mxu1 }
 0x8af   :  { %v632_v40 = vadd.f32 %v615_v39, %v2636_v43  ;;  %v633_v41 = vadd.f32 %v628_v50, %v598_v38 }
 0x8b1   :  { %2246 = vtanh.f32 %v632_v40 }
 0x8b2   :  { %2248 = vtanh.f32 %v633_v41 }
 0x8b6   :  { %v617_v42 = vpop.f32.mrf.mxu0  ;;  %v630_v45 = vpop.f32.mrf.mxu1 }
 0x8b7   :  { %v2247_v47 = vpop.eup %2246 }
 0x8b8   :  { %v2249_v48 = vpop.eup %2248  ;;  %v636_v51 = vmul.f32 0.5, %v2247_v47 }
 0x8b9   :  { %v637_v52 = vmul.f32 0.5, %v2249_v48 }
 0x8ba   :  { %v638_v53 = vadd.f32 0.5, %v636_v51 }
 0x8bb   :  { %v639_v54 = vadd.f32 0.5, %v637_v52 }
 0x8bc   :  { %v640_v55 = vsel %vm2648_vm6, %v2247_v47, %v638_v53 }
 0x8bd   :  { %v641_v56 = vsel %vm2652_vm7, %v2249_v48, %v639_v54  ;;  %646 = vrot.lane.b32.xlu0 %v640_v55, %s2481_s3  ;;  %v644_v0 = vmul.f32 %v642_v62, %v640_v55 }
 0x8be   :  { %660 = vrot.lane.b32.xlu1 %v641_v56, %s2481_s3  ;;  %v658_v3 = vmul.f32 %v656_v5, %v641_v56 }
 0x92f   :  { %v647_v57 = vpop.permute.xlu0 %646 }
 0x930   :  { %v661_v58 = vpop.permute.xlu1 %660  ;;  %v649_v59 = vmul.f32 %v647_v57, %v640_v55 }
 0x931   :  { %v663_v60 = vmul.f32 %v661_v58, %v641_v56 }
 0x932   :  { %651 = vrot.lane.b32.xlu2 %v649_v59, %s2473_s25 }
 0x933   :  { %665 = vrot.lane.b32.xlu0 %v663_v60, %s2473_s25 }
 0x93a   :  { %674 = vrot.lane.b32.xlu2 %v640_v55, %s2473_s25 }
 0x98c   :  { %v652_v1 = vpop.permute.xlu2 %651 }
 0x98d   :  { %v654_v4 = vadd.f32 %v652_v1, %v644_v0 }
 0x98f   :  { %670 = vrot.lane.b32.xlu1 %v654_v4, %s2482_s27  ;;  %v734_v36 = vrot.slane %v654_v4, 6 }
 0x994   :  { %v675_v17 = vpop.permute.xlu2 %674 }
 0x995   :  { %v677_v18 = vsel %vm184_vm0, %v675_v17, %v661_v58 }
 0x9a5   :  { %v666_v6 = vpop.permute.xlu0 %665 }
 0x9a6   :  { %v668_v7 = vadd.f32 %v666_v6, %v658_v3 }
 0x9a8   :  { %v748_v41 = vrot.slane %v668_v7, 6 }
 0xa01   :  { %v671_v11 = vpop.permute.xlu1 %670 }
 0xa02   :  { %v673_v12 = vsel %vm184_vm0, %v671_v11, %v668_v7 }
 0xa03   :  { %2250 = vtanh.f32 %v673_v12 }
 0xa09   :  { %v2251_v8 = vpop.eup %2250 }
 0xa0a   :  { %v2787_v9 = vmul.f32 %v2251_v8, %v677_v18 }
 0xa0c   :  { %680 = vst.msk [vmem:[#allocation2 + $0x8] sm:$0x3] %vm311_vm8, %v2787_v9  ;;  %v688_v22 = vpack.c.bf16 %v2787_v9, %v2787_v9 }
 0xa0e   :  { %2069 = vmatmul.msk.bf16.vlgmr.msra.gmra.mxu2 %vm230_vm1, %v688_v22  ;;  %2070 = vmatmul.msk.bf16.vlgmr.msra.gmra.mxu3 %vm230_vm1, %v688_v22 }
 0xa91   :  { %v701_v10 = vpop.f32.mrf.mxu2  ;;  %v714_v24 = vpop.f32.mrf.mxu3 }
 0xa92   :  { %v720_v13 = vrot.slane %v701_v10, 6  ;;  %v721_v49 = vrot.slane %v714_v24, 6 }
 0xa94   :  { %v724_v37 = vadd.f32 %v720_v13, %v2636_v43  ;;  %v725_v14 = vadd.f32 %v721_v49, %v686_v46 }
 0xa96   :  { %2252 = vtanh.f32 %v724_v37 }
 0xa97   :  { %2254 = vtanh.f32 %v725_v14 }
 0xa99   :  { %v703_v16 = vpop.f32.mrf.mxu2  ;;  %v716_v19 = vpop.f32.mrf.mxu3 }
 0xa9c   :  { %v2253_v20 = vpop.eup %2252 }
 0xa9d   :  { %v2255_v21 = vpop.eup %2254  ;;  %v728_v23 = vmul.f32 0.5, %v2253_v20 }
 0xa9e   :  { %v729_v25 = vmul.f32 0.5, %v2255_v21 }
 0xa9f   :  { %v730_v26 = vadd.f32 0.5, %v728_v23 }
 0xaa0   :  { %v731_v27 = vadd.f32 0.5, %v729_v25 }
 0xaa1   :  { %v732_v28 = vsel %vm2648_vm6, %v2253_v20, %v730_v26 }
 0xaa2   :  { %v733_v29 = vsel %vm2652_vm7, %v2255_v21, %v731_v27  ;;  %738 = vrot.lane.b32.xlu0 %v732_v28, %s2481_s3  ;;  %v736_v39 = vmul.f32 %v734_v36, %v732_v28 }
 0xaa3   :  { %752 = vrot.lane.b32.xlu1 %v733_v29, %s2481_s3  ;;  %v750_v45 = vmul.f32 %v748_v41, %v733_v29 }
 0xb14   :  { %v739_v30 = vpop.permute.xlu0 %738 }
 0xb15   :  { %v753_v31 = vpop.permute.xlu1 %752  ;;  %v741_v33 = vmul.f32 %v739_v30, %v732_v28 }
 0xb16   :  { %v755_v35 = vmul.f32 %v753_v31, %v733_v29 }
 0xb17   :  { %743 = vrot.lane.b32.xlu2 %v741_v33, %s2473_s25 }
 0xb18   :  { %757 = vrot.lane.b32.xlu0 %v755_v35, %s2473_s25 }
 0xb1f   :  { %766 = vrot.lane.b32.xlu2 %v732_v28, %s2473_s25 }
 0xb71   :  { %v744_v50 = vpop.permute.xlu2 %743 }
 0xb72   :  { %v746_v40 = vadd.f32 %v744_v50, %v736_v39 }
 0xb74   :  { %762 = vrot.lane.b32.xlu1 %v746_v40, %s2482_s27  ;;  %v826_v13 = vrot.slane %v746_v40, 6 }
 0xb79   :  { %v767_v52 = vpop.permute.xlu2 %766 }
 0xb7a   :  { %v769_v54 = vsel %vm184_vm0, %v767_v52, %v753_v31 }
 0xb8a   :  { %v758_v42 = vpop.permute.xlu0 %757 }
 0xb8b   :  { %v760_v47 = vadd.f32 %v758_v42, %v750_v45 }
 0xb8d   :  { %v840_v16 = vrot.slane %v760_v47, 6 }
 0xbe6   :  { %v763_v48 = vpop.permute.xlu1 %762 }
 0xbe7   :  { %v765_v51 = vsel %vm184_vm0, %v763_v48, %v760_v47 }
 0xbe8   :  { %2256 = vtanh.f32 %v765_v51 }
 0xbee   :  { %v2257_v53 = vpop.eup %2256 }
 0xbef   :  { %v2811_v55 = vmul.f32 %v2257_v53, %v769_v54 }
 0xbf1   :  { %772 = vst.msk [vmem:[#allocation2 + $0x8] sm:$0xc] %vm404_vm9, %v2811_v55  ;;  %v778_v56 = vpack.c.bf16 %v2811_v55, %v2811_v55 }
 0xbf3   :  { %v780_v57 = vrot.slane %v778_v56, 1 }
 0xbf5   :  { %2071 = vmatmul.msk.bf16.vlgmr.msrb.gmra.mxu0 %vm230_vm1, %v780_v57  ;;  %2072 = vmatmul.msk.bf16.vlgmr.msrb.gmra.mxu1 %vm230_vm1, %v780_v57 }
 0xc72   :  { %v793_v58 = vpop.f32.mrf.mxu0  ;;  %v806_v59 = vpop.f32.mrf.mxu1 }
 0xc73   :  { %v812_v60 = vrot.slane %v793_v58, 4  ;;  %v813_v62 = vrot.slane %v806_v59, 4 }
 0xc75   :  { %v816_v0 = vadd.f32 %v812_v60, %v2636_v43  ;;  %v817_v1 = vadd.f32 %v813_v62, %v598_v38 }
 0xc77   :  { %2258 = vtanh.f32 %v816_v0 }
 0xc78   :  { %2260 = vtanh.f32 %v817_v1 }
 0xc7a   :  { %v795_v4 = vpop.f32.mrf.mxu0  ;;  %v808_v5 = vpop.f32.mrf.mxu1 }
 0xc7b   :  { %v2197_v5 = vld [vmem:[#allocation9 + $0x14] sm:$0xf0] }
 0xc7d   :  { %v2259_v6 = vpop.eup %2258 }
 0xc7e   :  { %v2261_v3 = vpop.eup %2260  ;;  %v820_v7 = vmul.f32 0.5, %v2259_v6 }
 0xc7f   :  { %v821_v11 = vmul.f32 0.5, %v2261_v3 }
 0xc80   :  { %v822_v12 = vadd.f32 0.5, %v820_v7  ;;  %v2106_v7 = vld [vmem:[#allocation9 + $0x18] sm:$0xf0] }
 0xc81   :  { %v823_v17 = vadd.f32 0.5, %v821_v11 }
 0xc82   :  { %v824_v8 = vsel %vm2648_vm6, %v2259_v6, %v822_v12  ;;  %v2196_v6 = vld [vmem:[#allocation9 + $0x14] sm:$0xf]  ;;  %v2195_v12 = vld [vmem:[#allocation9 + $0x4] sm:$0xf0] }
 0xc83   :  { %v825_v18 = vsel %vm2652_vm7, %v2261_v3, %v823_v17  ;;  %830 = vrot.lane.b32.xlu0 %v824_v8, %s2481_s3  ;;  %v828_v49 = vmul.f32 %v826_v13, %v824_v8  ;;  %v2109_v11 = vor.u32 %v2196_v6, %v2106_v7  ;;  %v2194_v17 = vld [vmem:[#allocation9 + $0x4] sm:$0xf] }
 0xc84   :  { %844 = vrot.lane.b32.xlu1 %v825_v18, %s2481_s3  ;;  %v842_v20 = vmul.f32 %v840_v16, %v825_v18 }
 0xc85   :  { %1091 = vmatpush.bf16.msra.mxu3 %v2109_v11  ;;  %v1115_v11 = vld [vmem:[#allocation7 + $0x6] sm:$0x3] }
 0xcf5   :  { %v831_v38 = vpop.permute.xlu0 %830 }
 0xcf6   :  { %v845_v22 = vpop.permute.xlu1 %844  ;;  %v833_v10 = vmul.f32 %v831_v38, %v824_v8 }
 0xcf7   :  { %v847_v24 = vmul.f32 %v845_v22, %v825_v18  ;;  %v2098_v18 = vld [vmem:[#allocation9 + $0x8] sm:$0xf0] }
 0xcf8   :  { %835 = vrot.lane.b32.xlu2 %v833_v10, %s2473_s25  ;;  %v2101_v38 = vor.u32 %v2194_v17, %v2098_v18  ;;  %v2086_v10 = vld [vmem:[#allocation9 + $0x30] sm:$0xf] }
 0xcf9   :  { %849 = vrot.lane.b32.xlu0 %v847_v24, %s2473_s25  ;;  %v2201_v24 = vld [vmem:[#allocation9 + $0x34] sm:$0xf0]  ;;  %v2075_v18 = vld [vmem:[%s3233_s6 + $0x2] sm:$0x3] }
 0xcfa   :  { %1092 = vmatpush.bf16.msra.mxu3 %v2101_v38  ;;  %v2087_v13 = vor.u32 %v2201_v24, %v2086_v10  ;;  %v1101_v10 = vperm.slane %v2075_v18, 1 }
 0xcfc   :  { %1026 = vmatpush.bf16.msra.mxu0 %v2087_v13 }
 0xd00   :  { %858 = vrot.lane.b32.xlu2 %v824_v8, %s2473_s25 }
 0xd52   :  { %v836_v37 = vpop.permute.xlu2 %835 }
 0xd53   :  { %v838_v14 = vadd.f32 %v836_v37, %v828_v49 }
 0xd55   :  { %854 = vrot.lane.b32.xlu1 %v838_v14, %s2482_s27  ;;  %v918_v58 = vrot.slane %v838_v14, 6 }
 0xd5a   :  { %v859_v26 = vpop.permute.xlu2 %858 }
 0xd5b   :  { %v861_v28 = vsel %vm184_vm0, %v859_v26, %v845_v22  ;;  %v1111_v22 = vld [vmem:[#allocation4 + $0x6] sm:$0x3] }
 0xd6b   :  { %v850_v19 = vpop.permute.xlu0 %849 }
 0xd6c   :  { %v2832_v21 = vadd.f32 %v850_v19, %v842_v20 }
 0xd6e   :  { %v932_v49 = vrot.slane %v2832_v21, 6 }
 0xdc7   :  { %v855_v23 = vpop.permute.xlu1 %854 }
 0xdc8   :  { %v857_v25 = vsel %vm184_vm0, %v855_v23, %v2832_v21 }
 0xdc9   :  { %2262 = vtanh.f32 %v857_v25 }
 0xdcf   :  { %v2263_v27 = vpop.eup %2262 }
 0xdd0   :  { %v863_v29 = vmul.f32 %v2263_v27, %v861_v28  ;;  %v983_v27 = vld [vmem:[#allocation2] sm:$0xff] }
 0xdd2   :  { %864 = vst.msk [vmem:[#allocation2 + $0x8] sm:$0x30] %vm497_vm10, %v863_v29  ;;  %v870_v30 = vpack.c.bf16 %v863_v29, %v863_v29 }
 0xdd4   :  { %v872_v31 = vrot.slane %v870_v30, 2  ;;  %v2078_v30 = vld [vmem:[#allocation9 + $0x20] sm:$0xf] }
 0xdd6   :  { %2073 = vmatmul.msk.bf16.vlgmr.msrb.gmra.mxu2 %vm230_vm1, %v872_v31  ;;  %2074 = vmatmul.msk.bf16.vlgmr.msrb.gmra.mxu3 %vm230_vm1, %v872_v31  ;;  %v2199_v31 = vld [vmem:[#allocation9 + $0x24] sm:$0xf0] }
 0xe59   :  { %v885_v33 = vpop.f32.mrf.mxu2  ;;  %v898_v35 = vpop.f32.mrf.mxu3 }
 0xe5a   :  { %v904_v36 = vrot.slane %v885_v33, 2  ;;  %v905_v39 = vrot.slane %v898_v35, 2  ;;  %v2200_v33 = vld [vmem:[#allocation9 + $0x34] sm:$0xf]  ;;  %v2079_v35 = vor.u32 %v2199_v31, %v2078_v30 }
 0xe5c   :  { %v908_v50 = vadd.f32 %v904_v36, %v2636_v43  ;;  %v909_v40 = vadd.f32 %v905_v39, %v686_v46  ;;  %v2088_v36 = vld [vmem:[#allocation9 + $0x38] sm:$0xf0]  ;;  %v2198_v39 = vld [vmem:[#allocation9 + $0x24] sm:$0xf]  ;;  %1027 = vmatpush.bf16.msra.mxu0 %v2079_v35 }
 0xe5e   :  { %2264 = vtanh.f32 %v908_v50  ;;  %v2080_v50 = vld [vmem:[#allocation9 + $0x28] sm:$0xf0] }
 0xe5f   :  { %2266 = vtanh.f32 %v909_v40  ;;  %v2091_v40 = vor.u32 %v2200_v33, %v2088_v36 }
 0xe61   :  { %v887_v41 = vpop.f32.mrf.mxu2  ;;  %v900_v42 = vpop.f32.mrf.mxu3  ;;  %1040 = vmatpush.bf16.msra.mxu1 %v2091_v40 }
 0xe62   :  { %v2083_v41 = vor.u32 %v2198_v39, %v2080_v50  ;;  %v2138_v42 = vld [vmem:[#allocation10 + $0x70] sm:$0xf] }
 0xe64   :  { %v2265_v45 = vpop.eup %2264 }
 0xe65   :  { %v2267_v47 = vpop.eup %2266  ;;  %v912_v48 = vmul.f32 0.5, %v2265_v45  ;;  %1041 = vmatpush.bf16.msra.mxu1 %v2083_v41 }
 0xe66   :  { %v913_v51 = vmul.f32 0.5, %v2267_v47 }
 0xe67   :  { %v914_v52 = vadd.f32 0.5, %v912_v48 }
 0xe68   :  { %v915_v53 = vadd.f32 0.5, %v913_v51  ;;  %v2140_v51 = vld [vmem:[#allocation10 + $0x78] sm:$0xf0] }
 0xe69   :  { %v916_v54 = vsel %vm2648_vm6, %v2265_v45, %v914_v52  ;;  %v2193_v45 = vld [vmem:[#allocation10 + $0x74] sm:$0xf0]  ;;  %v2130_v52 = vld [vmem:[#allocation10 + $0x60] sm:$0xf] }
 0xe6a   :  { %v917_v56 = vsel %vm2652_vm7, %v2267_v47, %v915_v53  ;;  %922 = vrot.lane.b32.xlu0 %v916_v54, %s2481_s3  ;;  %v920_v59 = vmul.f32 %v918_v58, %v916_v54  ;;  %v2192_v47 = vld [vmem:[#allocation10 + $0x74] sm:$0xf]  ;;  %v2886_v48 = vor.u32 %v2193_v45, %v2138_v42  ;;  %v2191_v53 = vld [vmem:[#allocation10 + $0x64] sm:$0xf0]  ;;  %v2189_v58 = vld [vmem:[#allocation10 + $0x54] sm:$0xf0] }
 0xe6b   :  { %936 = vrot.lane.b32.xlu1 %v917_v56, %s2481_s3  ;;  %v934_v37 = vmul.f32 %v932_v49, %v917_v56 }
 0xe6c   :  { %1172 = vmatpush.bf16.msrb.mxu0 %v2886_v48 }
 0xedc   :  { %v923_v43 = vpop.permute.xlu0 %922 }
 0xedd   :  { %v937_v44 = vpop.permute.xlu1 %936  ;;  %v925_v46 = vmul.f32 %v923_v43, %v916_v54  ;;  %v2132_v43 = vld [vmem:[#allocation10 + $0x68] sm:$0xf0] }
 0xede   :  { %v939_v57 = vmul.f32 %v937_v44, %v917_v56  ;;  %v2190_v56 = vld [vmem:[#allocation10 + $0x64] sm:$0xf] }
 0xedf   :  { %927 = vrot.lane.b32.xlu2 %v925_v46, %s2473_s25  ;;  %v2895_v46 = vor.u32 %v2190_v56, %v2132_v43 }
 0xee0   :  { %941 = vrot.lane.b32.xlu0 %v939_v57, %s2473_s25  ;;  %v2122_v57 = vld [vmem:[#allocation10 + $0x50] sm:$0xf] }
 0xee7   :  { %950 = vrot.lane.b32.xlu2 %v916_v54, %s2473_s25  ;;  %v2888_v54 = vor.u32 %v2192_v47, %v2140_v51 }
 0xee8   :  { %314 = vrot.lane.b32.xlu0 %v2669_v32, %s2482_s27 }
 0xee9   :  { %1185 = vmatpush.bf16.msrb.mxu1 %v2888_v54  ;;  %1274 = vmatpush.bf16.msrb.mxu3 %v2888_v54 }
 0xeed   :  { %1186 = vmatpush.bf16.msrb.mxu1 %v2895_v46  ;;  %1275 = vmatpush.bf16.msrb.mxu3 %v2895_v46 }
 0xeef   :  { %500 = vrot.lane.b32.xlu2 %v2732_v61, %s2482_s27 }
 0xef0   :  { %593 = vrot.lane.b32.xlu0 %v2763_v34, %s2482_s27 }
 0xef7   :  { %774 = vrot.lane.b32.xlu2 %v2811_v55, %s2482_s27 }
 0xef8   :  { %866 = vrot.lane.b32.xlu0 %v863_v29, %s2482_s27 }
 0xeff   :  { %1117 = vrot.lane.b32.xlu2 %v1111_v22, %s2473_s25 }
 0xf39   :  { %v928_v60 = vpop.permute.xlu2 %927 }
 0xf3a   :  { %v930_v62 = vadd.f32 %v928_v60, %v920_v59  ;;  %v2188_v59 = vld [vmem:[#allocation10 + $0x54] sm:$0xf]  ;;  %v2124_v60 = vld [vmem:[#allocation10 + $0x58] sm:$0xf0] }
 0xf3c   :  { %946 = vrot.lane.b32.xlu1 %v930_v62, %s2482_s27  ;;  %v2899_v62 = vor.u32 %v2189_v58, %v2122_v57 }
 0xf41   :  { %v951_v0 = vpop.permute.xlu2 %950 }
 0xf42   :  { %v953_v23 = vsel %vm184_vm0, %v951_v0, %v937_v44  ;;  %v2891_v44 = vor.u32 %v2191_v53, %v2130_v52  ;;  %v2903_v0 = vor.u32 %v2188_v59, %v2124_v60 }
 0xf44   :  { %407 = vrot.lane.b32.xlu1 %v2701_v15, %s2482_s27  ;;  %v2104_v15 = vld [vmem:[#allocation9 + $0x10] sm:$0xf]  ;;  %1173 = vmatpush.bf16.msrb.mxu0 %v2891_v44 }
 0xf45   :  { %v2105_v3 = vor.u32 %v2197_v5, %v2104_v15  ;;  %1187 = vmatpush.bf16.msrb.mxu1 %v2903_v0  ;;  %1276 = vmatpush.bf16.msrb.mxu3 %v2903_v0  ;;  %v1113_v5 = vld [vmem:[#allocation7 + $0x4] sm:$0x3] }
 0xf47   :  { %1077 = vmatpush.bf16.msra.mxu2 %v2105_v3 }
 0xf48   :  { %1174 = vmatpush.bf16.msrb.mxu0 %v2899_v62 }
 0xf49   :  { %v501_v32 = vpop.permute.xlu2 %500 }
 0xf4a   :  { %503 = vst.msk [vmem:[#allocation3 + $0x6] sm:$0x30] %vm497_vm10, %v501_v32  ;;  %v2114_v32 = vld [vmem:[#allocation10 + $0x40] sm:$0xf] }
 0xf4c   :  { %682 = vrot.lane.b32.xlu1 %v2787_v9, %s2482_s27  ;;  %v2096_v9 = vld [vmem:[#allocation9] sm:$0xf] }
 0xf4d   :  { %v2097_v8 = vor.u32 %v2195_v12, %v2096_v9  ;;  %v1109_v9 = vld [vmem:[#allocation4 + $0x4] sm:$0x3] }
 0xf4f   :  { %1078 = vmatpush.bf16.msra.mxu2 %v2097_v8 }
 0xf51   :  { %v775_v61 = vpop.permute.xlu2 %774 }
 0xf52   :  { %777 = vst.msk [vmem:[#allocation3 + $0x2] sm:$0xc] %vm404_vm9, %v775_v61  ;;  %v942_v34 = vpop.permute.xlu0 %941  ;;  %v2187_v61 = vld [vmem:[#allocation10 + $0x44] sm:$0xf0] }
 0xf53   :  { %v2873_v14 = vadd.f32 %v942_v34, %v934_v37  ;;  %1261 = vmatpush.bf16.msrb.mxu2 %v2886_v48  ;;  %v2186_v34 = vld [vmem:[#allocation10 + $0x44] sm:$0xf] }
 0xf57   :  { %1262 = vmatpush.bf16.msrb.mxu2 %v2891_v44 }
 0xf59   :  { %v1118_v12 = vpop.permute.xlu2 %1117 }
 0xf5a   :  { %v315_v55 = vpop.permute.xlu0 %314  ;;  %v1120_v17 = vsel %vm184_vm0, %v1109_v9, %v1118_v12 }
 0xf5b   :  { %317 = vst.msk [vmem:[#allocation3 + $0xe] sm:$0x3] %vm311_vm8, %v315_v55  ;;  %v2116_v55 = vld [vmem:[#allocation10 + $0x48] sm:$0xf0]  ;;  %1263 = vmatpush.bf16.msrb.mxu2 %v2899_v62  ;;  %v1124_v8 = vpack.c.bf16 %v1120_v17, %v1120_v17 }
 0xf62   :  { %v594_v1 = vpop.permute.xlu0 %593 }
 0xf63   :  { %596 = vst.msk [vmem:[#allocation3 + $0x2] sm:$0xc0] %vm590_vm11, %v594_v1  ;;  %v2907_v1 = vor.u32 %v2187_v61, %v2114_v32 }
 0xf65   :  { %1175 = vmatpush.bf16.msrb.mxu0 %v2907_v1  ;;  %1264 = vmatpush.bf16.msrb.mxu2 %v2907_v1 }
 0xf6a   :  { %v867_v4 = vpop.permute.xlu0 %866 }
 0xf6b   :  { %869 = vst.msk [vmem:[#allocation3 - $0x2] sm:$0x30] %vm497_vm10, %v867_v4  ;;  %v2911_v4 = vor.u32 %v2186_v34, %v2116_v55 }
 0xf6d   :  { %1188 = vmatpush.bf16.msrb.mxu1 %v2911_v4  ;;  %1277 = vmatpush.bf16.msrb.mxu3 %v2911_v4 }
 0xfae   :  { %v947_v16 = vpop.permute.xlu1 %946 }
 0xfaf   :  { %v949_v19 = vsel %vm184_vm0, %v947_v16, %v2873_v14  ;;  %965 = vst.msk [vmem:[#allocation13 - $0x6] sm:$0xc0] %vm590_vm11, %v947_v16 }
 0xfb0   :  { %2268 = vtanh.f32 %v949_v19 }
 0xfb6   :  { %v2269_v20 = vpop.eup %2268  ;;  %v408_v25 = vpop.permute.xlu1 %407 }
 0xfb7   :  { %410 = vst.msk [vmem:[#allocation3 + $0xa] sm:$0xc] %vm404_vm9, %v408_v25  ;;  %v955_v26 = vmul.f32 %v2269_v20, %v953_v23  ;;  %v1100_v25 = vperm.slane %v2075_v18, 0 }
 0xfb9   :  { %958 = vrot.lane.b32.xlu1 %v955_v26, %s2482_s27  ;;  %956 = vst.msk [vmem:[#allocation2 + $0x8] sm:$0xc0] %vm590_vm11, %v955_v26 }
 0xfba   :  { %962 = vst.msk [vmem:[#allocation12 - $0x6] sm:$0xc0] %vm590_vm11, %v955_v26 }
 0xfbe   :  { %v683_v21 = vpop.permute.xlu1 %682  ;;  %v987_v3 = vld [vmem:[#allocation3 + $0x8] sm:$0xff] }
 0xfbf   :  { %685 = vst.msk [vmem:[#allocation3 + $0x6] sm:$0x3] %vm311_vm8, %v683_v21 }
 0xfc0   :  { %v984_v28 = vld [vmem:[#allocation2 + $0x8] sm:$0xff] }
 0xfc1   :  { %v985_v29 = vpack.c.bf16 %v984_v28, %v983_v27  ;;  %1205 = vrot.lane.b32.xlu1 %v1113_v5, %s2473_s25 }
 0xfc3   :  { %2110 = vmatmul.msk.bf16.vlgmr.msra.gmra.mxu2 %vm184_vm0, %v985_v29  ;;  %2111 = vmatmul.msk.bf16.vlgmr.msra.gmra.mxu3 %vm184_vm0, %v985_v29 }
 0xfc4   :  { %1445 = vmatpush.bf16.msra.mxu2 %v2886_v48  ;;  %1458 = vmatpush.bf16.msra.mxu3 %v2888_v54 }
 0xfc8   :  { %1446 = vmatpush.bf16.msra.mxu2 %v2891_v44  ;;  %1459 = vmatpush.bf16.msra.mxu3 %v2895_v46 }
 0xfc9   :  { %1220 = vrot.lane.b32.xlu1 %v1115_v11, %s2473_s25 }
 0xfcc   :  { %1447 = vmatpush.bf16.msra.mxu2 %v2899_v62  ;;  %1460 = vmatpush.bf16.msra.mxu3 %v2903_v0 }
 0xfd0   :  { %1448 = vmatpush.bf16.msra.mxu2 %v2907_v1  ;;  %1461 = vmatpush.bf16.msra.mxu3 %v2911_v4 }
0x102b   :  { %v959_v15 = vpop.permute.xlu1 %958 }
0x102c   :  { %961 = vst.msk [vmem:[#allocation3 - $0x6] sm:$0xc0] %vm590_vm11, %v959_v15 }
0x102d   :  { %964 = vst.msk [vmem:[#allocation12 - $0x4] sm:$0xc0] %vm590_vm11, %v959_v15 }
0x1033   :  { %v986_v6 = vld [vmem:[#allocation3] sm:$0xff]  ;;  %v1206_v60 = vpop.permute.xlu1 %1205 }
0x1034   :  { %v988_v7 = vpack.c.bf16 %v987_v3, %v986_v6 }
0x1036   :  { %2092 = vmatmul.msk.bf16.vlgmr.msra.gmra.mxu0 %vm184_vm0, %v988_v7  ;;  %2093 = vmatmul.msk.bf16.vlgmr.msra.gmra.mxu1 %vm184_vm0, %v988_v7 }
0x1037   :  { %1353 = vmatpush.bf16.msra.mxu0 %v2886_v48  ;;  %1366 = vmatpush.bf16.msra.mxu1 %v2888_v54 }
0x103b   :  { %1354 = vmatpush.bf16.msra.mxu0 %v2891_v44  ;;  %1367 = vmatpush.bf16.msra.mxu1 %v2895_v46  ;;  %v1221_v55 = vpop.permute.xlu1 %1220 }
0x103f   :  { %1355 = vmatpush.bf16.msra.mxu0 %v2899_v62  ;;  %1368 = vmatpush.bf16.msra.mxu1 %v2903_v0 }
0x1043   :  { %1356 = vmatpush.bf16.msra.mxu0 %v2907_v1  ;;  %1369 = vmatpush.bf16.msra.mxu1 %v2911_v4 }
0x1046   :  { %2144 = vmatmul.msk.bf16.vlgmr.msrb.gmra.mxu0 %vm230_vm1, %v1124_v8  ;;  %2145 = vmatmul.msk.bf16.vlgmr.msrb.gmra.mxu1 %vm230_vm1, %v1124_v8  ;;  %v1080_v38 = vpop.f32.mrf.mxu2  ;;  %v1094_v22 = vpop.f32.mrf.mxu3 }
0x1047   :  { %1540 = vmatpush.bf16.msrb.mxu0 %v2886_v48  ;;  %1553 = vmatpush.bf16.msrb.mxu1 %v2888_v54 }
0x104b   :  { %1541 = vmatpush.bf16.msrb.mxu0 %v2891_v44  ;;  %1554 = vmatpush.bf16.msrb.mxu1 %v2895_v46 }
0x104e   :  { %v1082_v16 = vpop.f32.mrf.mxu2  ;;  %v1096_v19 = vpop.f32.mrf.mxu3 }
0x104f   :  { %1542 = vmatpush.bf16.msrb.mxu0 %v2899_v62  ;;  %1555 = vmatpush.bf16.msrb.mxu1 %v2903_v0 }
0x1053   :  { %1543 = vmatpush.bf16.msrb.mxu0 %v2907_v1  ;;  %1556 = vmatpush.bf16.msrb.mxu1 %v2911_v4 }
0x10b3   :  { %v1029_v24 = vpop.f32.mrf.mxu0  ;;  %v1043_v13 = vpop.f32.mrf.mxu1 }
0x10b4   :  { %v1095_v49 = vadd.f32 %v1094_v22, %v1043_v13  ;;  %v1081_v27 = vadd.f32 %v1080_v38, %v1029_v24 }
0x10b6   :  { %v2954_v37 = vadd.f32 %v1101_v10, %v1095_v49  ;;  %v2960_v30 = vadd.f32 %v1100_v25, %v1081_v27 }
0x10bb   :  { %v1031_v20 = vpop.f32.mrf.mxu0  ;;  %v1045_v23 = vpop.f32.mrf.mxu1 }
0x10bc   :  { %v1083_v26 = vadd.f32 %v1082_v16, %v1031_v20  ;;  %v1097_v21 = vadd.f32 %v1096_v19, %v1045_v23 }
0x10be   :  { %v2956_v28 = vadd.f32 %v1100_v25, %v1083_v26  ;;  %v2958_v29 = vadd.f32 %v1101_v10, %v1097_v21 }
0x10c0   :  { %v1122_v31 = vrot.slane %v2958_v29, 6  ;;  %v1251_v10 = vrot.slane %v2958_v29, 2 }
0x10c3   :  { %v1177_v33 = vpop.f32.mrf.mxu0  ;;  %v1190_v35 = vpop.f32.mrf.mxu1 }
0x10c4   :  { %v1194_v36 = vadd.f32 %v1177_v33, %v2960_v30  ;;  %v1195_v39 = vadd.f32 %v1190_v35, %v1122_v31 }
0x10c6   :  { %2270 = vtanh.f32 %v1194_v36 }
0x10c7   :  { %2272 = vtanh.f32 %v1195_v39 }
0x10cb   :  { %v1179_v50 = vpop.f32.mrf.mxu0  ;;  %v1192_v40 = vpop.f32.mrf.mxu1 }
0x10cc   :  { %v2271_v41 = vpop.eup %2270 }
0x10cd   :  { %v2273_v42 = vpop.eup %2272  ;;  %v1198_v45 = vmul.f32 0.5, %v2271_v41 }
0x10ce   :  { %v1199_v47 = vmul.f32 0.5, %v2273_v42 }
0x10cf   :  { %v1200_v51 = vadd.f32 0.5, %v1198_v45 }
0x10d0   :  { %v1201_v52 = vadd.f32 0.5, %v1199_v47 }
0x10d1   :  { %v1202_v53 = vsel %vm2648_vm6, %v2271_v41, %v1200_v51 }
0x10d2   :  { %v1203_v56 = vsel %vm2652_vm7, %v2273_v42, %v1201_v52  ;;  %1239 = vrot.lane.b32.xlu1 %v1202_v53, %s2473_s25  ;;  %1210 = vrot.lane.b32.xlu0 %v1202_v53, %s2481_s3  ;;  %v1208_v32 = vmul.f32 %v1206_v60, %v1202_v53 }
0x10d3   :  { %1225 = vrot.lane.b32.xlu2 %v1203_v56, %s2481_s3  ;;  %v1223_v5 = vmul.f32 %v1221_v55, %v1203_v56 }
0x112d   :  { %v1226_v43 = vpop.permute.xlu2 %1225 }
0x112e   :  { %v1228_v57 = vmul.f32 %v1226_v43, %v1203_v56 }
0x1130   :  { %1230 = vrot.lane.b32.xlu2 %v1228_v57, %s2473_s25 }
0x1144   :  { %v1211_v58 = vpop.permute.xlu0 %1210  ;;  %v1240_v11 = vpop.permute.xlu1 %1239 }
0x1145   :  { %v1213_v59 = vmul.f32 %v1211_v58, %v1202_v53  ;;  %v1242_v12 = vsel %vm184_vm0, %v1240_v11, %v1226_v43 }
0x1147   :  { %1215 = vrot.lane.b32.xlu0 %v1213_v59, %s2473_s25 }
0x118a   :  { %v1231_v15 = vpop.permute.xlu2 %1230 }
0x118b   :  { %v1233_v6 = vadd.f32 %v1231_v15, %v1223_v5 }
0x118d   :  { %v1313_v51 = vrot.slane %v1233_v6, 6 }
0x11b9   :  { %v1216_v61 = vpop.permute.xlu0 %1215 }
0x11ba   :  { %v1218_v34 = vadd.f32 %v1216_v61, %v1208_v32 }
0x11bc   :  { %1235 = vrot.lane.b32.xlu0 %v1218_v34, %s2482_s27  ;;  %v1299_v41 = vrot.slane %v1218_v34, 6 }
0x122e   :  { %v1236_v3 = vpop.permute.xlu0 %1235 }
0x122f   :  { %v1238_v7 = vsel %vm184_vm0, %v1236_v3, %v1233_v6 }
0x1230   :  { %2274 = vtanh.f32 %v1238_v7 }
0x1236   :  { %v2275_v9 = vpop.eup %2274 }
0x1237   :  { %v2978_v17 = vmul.f32 %v2275_v9, %v1242_v12 }
0x1239   :  { %1245 = vst.msk [vmem:[#allocation2] sm:$0x3] %vm311_vm8, %v2978_v17  ;;  %v1253_v8 = vpack.c.bf16 %v2978_v17, %v2978_v17 }
0x123b   :  { %2146 = vmatmul.msk.bf16.vlgmr.msrb.gmra.mxu2 %vm230_vm1, %v1253_v8  ;;  %2147 = vmatmul.msk.bf16.vlgmr.msrb.gmra.mxu3 %vm230_vm1, %v1253_v8 }
0x123c   :  { %1626 = vmatpush.bf16.msrb.mxu2 %v2886_v48  ;;  %1639 = vmatpush.bf16.msrb.mxu3 %v2888_v54 }
0x1240   :  { %1627 = vmatpush.bf16.msrb.mxu2 %v2891_v44  ;;  %1640 = vmatpush.bf16.msrb.mxu3 %v2895_v46 }
0x1244   :  { %1628 = vmatpush.bf16.msrb.mxu2 %v2899_v62  ;;  %1641 = vmatpush.bf16.msrb.mxu3 %v2903_v0 }
0x1248   :  { %1629 = vmatpush.bf16.msrb.mxu2 %v2907_v1  ;;  %1642 = vmatpush.bf16.msrb.mxu3 %v2911_v4 }
0x12be   :  { %v1266_v18 = vpop.f32.mrf.mxu2  ;;  %v1279_v38 = vpop.f32.mrf.mxu3 }
0x12bf   :  { %v1285_v22 = vrot.slane %v1266_v18, 6  ;;  %v1286_v24 = vrot.slane %v1279_v38, 6 }
0x12c1   :  { %v1289_v13 = vadd.f32 %v1285_v22, %v2960_v30  ;;  %v1290_v49 = vadd.f32 %v1286_v24, %v1251_v10 }
0x12c3   :  { %2276 = vtanh.f32 %v1289_v13 }
0x12c4   :  { %2278 = vtanh.f32 %v1290_v49 }
0x12c6   :  { %v1268_v16 = vpop.f32.mrf.mxu2  ;;  %v1281_v19 = vpop.f32.mrf.mxu3 }
0x12c9   :  { %v2277_v20 = vpop.eup %2276 }
0x12ca   :  { %v2279_v23 = vpop.eup %2278  ;;  %v1293_v25 = vmul.f32 0.5, %v2277_v20 }
0x12cb   :  { %v1294_v26 = vmul.f32 0.5, %v2279_v23 }
0x12cc   :  { %v1295_v21 = vadd.f32 0.5, %v1293_v25 }
0x12cd   :  { %v1296_v27 = vadd.f32 0.5, %v1294_v26 }
0x12ce   :  { %v1297_v33 = vsel %vm2648_vm6, %v2277_v20, %v1295_v21 }
0x12cf   :  { %v1298_v35 = vsel %vm2652_vm7, %v2279_v23, %v1296_v27  ;;  %1303 = vrot.lane.b32.xlu2 %v1297_v33, %s2481_s3  ;;  %v1301_v42 = vmul.f32 %v1299_v41, %v1297_v33 }
0x12d0   :  { %1317 = vrot.lane.b32.xlu0 %v1298_v35, %s2481_s3  ;;  %v1315_v53 = vmul.f32 %v1313_v51, %v1298_v35 }
0x1329   :  { %v1304_v36 = vpop.permute.xlu2 %1303 }
0x132a   :  { %v1306_v39 = vmul.f32 %v1304_v36, %v1297_v33 }
0x132c   :  { %1308 = vrot.lane.b32.xlu1 %v1306_v39, %s2473_s25 }
0x1334   :  { %1331 = vrot.lane.b32.xlu1 %v1297_v33, %s2473_s25 }
0x1342   :  { %v1318_v50 = vpop.permute.xlu0 %1317 }
0x1343   :  { %v1320_v40 = vmul.f32 %v1318_v50, %v1298_v35 }
0x1345   :  { %1322 = vrot.lane.b32.xlu2 %v1320_v40, %s2473_s25 }
0x139e   :  { %v1309_v45 = vpop.permute.xlu1 %1308 }
0x139f   :  { %v1311_v47 = vadd.f32 %v1309_v45, %v1301_v42  ;;  %v1323_v52 = vpop.permute.xlu2 %1322 }
0x13a0   :  { %v1325_v56 = vadd.f32 %v1323_v52, %v1315_v53 }
0x13a1   :  { %1327 = vrot.lane.b32.xlu0 %v1311_v47, %s2482_s27  ;;  %v1391_v23 = vrot.slane %v1311_v47, 6 }
0x13a2   :  { %v1405_v27 = vrot.slane %v1325_v56, 6 }
0x13a6   :  { %v1332_v58 = vpop.permute.xlu1 %1331 }
0x13a7   :  { %v1334_v60 = vsel %vm184_vm0, %v1332_v58, %v1318_v50 }
0x1413   :  { %v1328_v43 = vpop.permute.xlu0 %1327 }
0x1414   :  { %v1330_v57 = vsel %vm184_vm0, %v1328_v43, %v1325_v56 }
0x1415   :  { %2280 = vtanh.f32 %v1330_v57 }
0x141b   :  { %v2281_v59 = vpop.eup %2280 }
0x141c   :  { %v3010_v32 = vmul.f32 %v2281_v59, %v1334_v60 }
0x141e   :  { %1337 = vst.msk [vmem:[#allocation2] sm:$0xc] %vm404_vm9, %v3010_v32  ;;  %v1343_v61 = vpack.c.bf16 %v3010_v32, %v3010_v32 }
0x1420   :  { %v1345_v34 = vrot.slane %v1343_v61, 1 }
0x1422   :  { %2148 = vmatmul.msk.bf16.vlgmr.msra.gmra.mxu0 %vm230_vm1, %v1345_v34  ;;  %2149 = vmatmul.msk.bf16.vlgmr.msra.gmra.mxu1 %vm230_vm1, %v1345_v34 }
0x1423   :  { %1718 = vmatpush.bf16.msra.mxu0 %v2886_v48  ;;  %1731 = vmatpush.bf16.msra.mxu1 %v2888_v54 }
0x1427   :  { %1719 = vmatpush.bf16.msra.mxu0 %v2891_v44  ;;  %1732 = vmatpush.bf16.msra.mxu1 %v2895_v46 }
0x142b   :  { %1720 = vmatpush.bf16.msra.mxu0 %v2899_v62  ;;  %1733 = vmatpush.bf16.msra.mxu1 %v2903_v0 }
0x142f   :  { %1721 = vmatpush.bf16.msra.mxu0 %v2907_v1  ;;  %1734 = vmatpush.bf16.msra.mxu1 %v2911_v4 }
0x149f   :  { %v1358_v55 = vpop.f32.mrf.mxu0  ;;  %v1371_v15 = vpop.f32.mrf.mxu1 }
0x14a0   :  { %v1377_v5 = vrot.slane %v1358_v55, 4  ;;  %v1378_v6 = vrot.slane %v1371_v15, 4 }
0x14a2   :  { %v1381_v3 = vadd.f32 %v1377_v5, %v2960_v30  ;;  %v1382_v7 = vadd.f32 %v1378_v6, %v1122_v31 }
0x14a4   :  { %2282 = vtanh.f32 %v1381_v3 }
0x14a5   :  { %2284 = vtanh.f32 %v1382_v7 }
0x14a7   :  { %v1360_v11 = vpop.f32.mrf.mxu0  ;;  %v1373_v9 = vpop.f32.mrf.mxu1 }
0x14aa   :  { %v2283_v12 = vpop.eup %2282 }
0x14ab   :  { %v2285_v8 = vpop.eup %2284  ;;  %v1385_v18 = vmul.f32 0.5, %v2283_v12 }
0x14ac   :  { %v1386_v38 = vmul.f32 0.5, %v2285_v8 }
0x14ad   :  { %v1387_v22 = vadd.f32 0.5, %v1385_v18 }
0x14ae   :  { %v1388_v24 = vadd.f32 0.5, %v1386_v38 }
0x14af   :  { %v1389_v13 = vsel %vm2648_vm6, %v2283_v12, %v1387_v22 }
0x14b0   :  { %v1390_v49 = vsel %vm2652_vm7, %v2285_v8, %v1388_v24  ;;  %1395 = vrot.lane.b32.xlu2 %v1389_v13, %s2481_s3  ;;  %v1393_v25 = vmul.f32 %v1391_v23, %v1389_v13 }
0x14b1   :  { %1409 = vrot.lane.b32.xlu0 %v1390_v49, %s2481_s3  ;;  %v1407_v35 = vmul.f32 %v1405_v27, %v1390_v49 }
0x150a   :  { %v1396_v31 = vpop.permute.xlu2 %1395 }
0x150b   :  { %v1398_v16 = vmul.f32 %v1396_v31, %v1389_v13 }
0x150d   :  { %1400 = vrot.lane.b32.xlu1 %v1398_v16, %s2473_s25 }
0x1515   :  { %1423 = vrot.lane.b32.xlu1 %v1389_v13, %s2473_s25 }
0x1523   :  { %v1410_v19 = vpop.permute.xlu0 %1409 }
0x1524   :  { %v1412_v20 = vmul.f32 %v1410_v19, %v1390_v49  ;;  %v1528_v49 = vrot.slane %v2954_v37, 6 }
0x1526   :  { %1414 = vrot.lane.b32.xlu2 %v1412_v20, %s2473_s25 }
0x157f   :  { %v1401_v26 = vpop.permute.xlu1 %1400 }
0x1580   :  { %v1403_v21 = vadd.f32 %v1401_v26, %v1393_v25  ;;  %v1415_v33 = vpop.permute.xlu2 %1414 }
0x1581   :  { %v1417_v36 = vadd.f32 %v1415_v33, %v1407_v35 }
0x1582   :  { %1419 = vrot.lane.b32.xlu0 %v1403_v21, %s2482_s27  ;;  %v1483_v34 = vrot.slane %v1403_v21, 6 }
0x1583   :  { %v1497_v6 = vrot.slane %v1417_v36, 6 }
0x1587   :  { %v1424_v40 = vpop.permute.xlu1 %1423 }
0x1588   :  { %v1426_v42 = vsel %vm184_vm0, %v1424_v40, %v1410_v19 }
0x15f4   :  { %v1420_v39 = vpop.permute.xlu0 %1419 }
0x15f5   :  { %v1422_v50 = vsel %vm184_vm0, %v1420_v39, %v1417_v36 }
0x15f6   :  { %2286 = vtanh.f32 %v1422_v50 }
0x15fc   :  { %v2287_v41 = vpop.eup %2286 }
0x15fd   :  { %v3041_v45 = vmul.f32 %v2287_v41, %v1426_v42 }
0x15ff   :  { %1429 = vst.msk [vmem:[#allocation2] sm:$0x30] %vm497_vm10, %v3041_v45  ;;  %v1435_v47 = vpack.c.bf16 %v3041_v45, %v3041_v45 }
0x1601   :  { %v1437_v51 = vrot.slane %v1435_v47, 2 }
0x1603   :  { %2150 = vmatmul.msk.bf16.vlgmr.msra.gmra.mxu2 %vm230_vm1, %v1437_v51  ;;  %2151 = vmatmul.msk.bf16.vlgmr.msra.gmra.mxu3 %vm230_vm1, %v1437_v51 }
0x1604   :  { %1810 = vmatpush.bf16.msra.mxu2 %v2886_v48  ;;  %1823 = vmatpush.bf16.msra.mxu3 %v2888_v54 }
0x1608   :  { %1811 = vmatpush.bf16.msra.mxu2 %v2891_v44  ;;  %1824 = vmatpush.bf16.msra.mxu3 %v2895_v46 }
0x160c   :  { %1812 = vmatpush.bf16.msra.mxu2 %v2899_v62  ;;  %1825 = vmatpush.bf16.msra.mxu3 %v2903_v0 }
0x1610   :  { %1813 = vmatpush.bf16.msra.mxu2 %v2907_v1  ;;  %1826 = vmatpush.bf16.msra.mxu3 %v2911_v4 }
0x1686   :  { %v1450_v52 = vpop.f32.mrf.mxu2  ;;  %v1463_v53 = vpop.f32.mrf.mxu3 }
0x1687   :  { %v1469_v56 = vrot.slane %v1450_v52, 2  ;;  %v1470_v43 = vrot.slane %v1463_v53, 2 }
0x1689   :  { %v1473_v48 = vadd.f32 %v1469_v56, %v2960_v30  ;;  %v1474_v54 = vadd.f32 %v1470_v43, %v1251_v10 }
0x168b   :  { %2288 = vtanh.f32 %v1473_v48 }
0x168c   :  { %2290 = vtanh.f32 %v1474_v54 }
0x168e   :  { %v1452_v44 = vpop.f32.mrf.mxu2  ;;  %v1465_v46 = vpop.f32.mrf.mxu3 }
0x1691   :  { %v2289_v62 = vpop.eup %2288 }
0x1692   :  { %v2291_v57 = vpop.eup %2290  ;;  %v1477_v0 = vmul.f32 0.5, %v2289_v62 }
0x1693   :  { %v1478_v58 = vmul.f32 0.5, %v2291_v57 }
0x1694   :  { %v1479_v1 = vadd.f32 0.5, %v1477_v0 }
0x1695   :  { %v1480_v59 = vadd.f32 0.5, %v1478_v58 }
0x1696   :  { %v1481_v4 = vsel %vm2648_vm6, %v2289_v62, %v1479_v1 }
0x1697   :  { %v1482_v60 = vsel %vm2652_vm7, %v2291_v57, %v1480_v59  ;;  %1487 = vrot.lane.b32.xlu2 %v1481_v4, %s2481_s3  ;;  %v1485_v55 = vmul.f32 %v1483_v34, %v1481_v4 }
0x1698   :  { %1501 = vrot.lane.b32.xlu0 %v1482_v60, %s2481_s3  ;;  %v1499_v7 = vmul.f32 %v1497_v6, %v1482_v60 }
0x16f1   :  { %v1488_v29 = vpop.permute.xlu2 %1487 }
0x16f2   :  { %v1490_v30 = vmul.f32 %v1488_v29, %v1481_v4 }
0x16f4   :  { %1492 = vrot.lane.b32.xlu1 %v1490_v30, %s2473_s25  ;;  %v1616_v30 = vrot.slane %v2954_v37, 2 }
0x16fc   :  { %1515 = vrot.lane.b32.xlu1 %v1481_v4, %s2473_s25 }
0x170a   :  { %v1502_v10 = vpop.permute.xlu0 %1501 }
0x170b   :  { %v1504_v61 = vmul.f32 %v1502_v10, %v1482_v60 }
0x170d   :  { %1506 = vrot.lane.b32.xlu2 %v1504_v61, %s2473_s25 }
0x1766   :  { %v1493_v15 = vpop.permute.xlu1 %1492 }
0x1767   :  { %v1495_v5 = vadd.f32 %v1493_v15, %v1485_v55  ;;  %v1507_v3 = vpop.permute.xlu2 %1506 }
0x1768   :  { %v1509_v11 = vadd.f32 %v1507_v3, %v1499_v7 }
0x1769   :  { %1511 = vrot.lane.b32.xlu0 %v1495_v5, %s2482_s27  ;;  %v1572_v51 = vrot.slane %v1495_v5, 6 }
0x176a   :  { %v1586_v43 = vrot.slane %v1509_v11, 6 }
0x176e   :  { %v1516_v8 = vpop.permute.xlu1 %1515 }
0x176f   :  { %v1518_v38 = vsel %vm184_vm0, %v1516_v8, %v1502_v10 }
0x17db   :  { %v1512_v9 = vpop.permute.xlu0 %1511 }
0x17dc   :  { %v1514_v12 = vsel %vm184_vm0, %v1512_v9, %v1509_v11 }
0x17dd   :  { %2292 = vtanh.f32 %v1514_v12 }
0x17e3   :  { %v2293_v18 = vpop.eup %2292 }
0x17e4   :  { %v3072_v22 = vmul.f32 %v2293_v18, %v1518_v38 }
0x17e6   :  { %1521 = vst.msk [vmem:[#allocation2] sm:$0xc0] %vm590_vm11, %v3072_v22  ;;  %v1530_v24 = vpack.c.bf16 %v3072_v22, %v3072_v22 }
0x17e8   :  { %v1532_v13 = vrot.slane %v1530_v24, 3 }
0x17ea   :  { %2152 = vmatmul.msk.bf16.vlgmr.msrb.gmra.mxu0 %vm230_vm1, %v1532_v13  ;;  %2153 = vmatmul.msk.bf16.vlgmr.msrb.gmra.mxu1 %vm230_vm1, %v1532_v13 }
0x1867   :  { %v1545_v31 = vpop.f32.mrf.mxu0  ;;  %v1558_v16 = vpop.f32.mrf.mxu1 }
0x1868   :  { %v1562_v19 = vadd.f32 %v1545_v31, %v2956_v28  ;;  %v1563_v20 = vadd.f32 %v1558_v16, %v1528_v49 }
0x186a   :  { %2294 = vtanh.f32 %v1562_v19 }
0x186b   :  { %2296 = vtanh.f32 %v1563_v20 }
0x186f   :  { %v1547_v23 = vpop.f32.mrf.mxu0  ;;  %v1560_v25 = vpop.f32.mrf.mxu1 }
0x1870   :  { %v2295_v26 = vpop.eup %2294 }
0x1871   :  { %v2297_v21 = vpop.eup %2296  ;;  %v1566_v27 = vmul.f32 0.5, %v2295_v26 }
0x1872   :  { %v1567_v33 = vmul.f32 0.5, %v2297_v21 }
0x1873   :  { %v1568_v35 = vadd.f32 0.5, %v1566_v27 }
0x1874   :  { %v1569_v36 = vadd.f32 0.5, %v1567_v33 }
0x1875   :  { %v1570_v39 = vsel %vm2648_vm6, %v2295_v26, %v1568_v35 }
0x1876   :  { %v1571_v50 = vsel %vm2652_vm7, %v2297_v21, %v1569_v36  ;;  %1576 = vrot.lane.b32.xlu2 %v1570_v39, %s2481_s3  ;;  %v1574_v52 = vmul.f32 %v1572_v51, %v1570_v39 }
0x1877   :  { %1590 = vrot.lane.b32.xlu0 %v1571_v50, %s2481_s3  ;;  %v1588_v54 = vmul.f32 %v1586_v43, %v1571_v50 }
0x18d0   :  { %v1577_v40 = vpop.permute.xlu2 %1576 }
0x18d1   :  { %v1579_v41 = vmul.f32 %v1577_v40, %v1570_v39 }
0x18d3   :  { %1581 = vrot.lane.b32.xlu1 %v1579_v41, %s2473_s25 }
0x18db   :  { %1604 = vrot.lane.b32.xlu1 %v1570_v39, %s2473_s25 }
0x18e9   :  { %v1591_v42 = vpop.permute.xlu0 %1590 }
0x18ea   :  { %v1593_v47 = vmul.f32 %v1591_v42, %v1571_v50 }
0x18ec   :  { %1595 = vrot.lane.b32.xlu2 %v1593_v47, %s2473_s25 }
0x1945   :  { %v1582_v53 = vpop.permute.xlu1 %1581 }
0x1946   :  { %v1584_v56 = vadd.f32 %v1582_v53, %v1574_v52  ;;  %v1596_v48 = vpop.permute.xlu2 %1595 }
0x1947   :  { %v1598_v44 = vadd.f32 %v1596_v48, %v1588_v54 }
0x1948   :  { %1600 = vrot.lane.b32.xlu0 %v1584_v56, %s2482_s27  ;;  %v1664_v31 = vrot.slane %v1584_v56, 6 }
0x1949   :  { %v1678_v23 = vrot.slane %v1598_v44, 6 }
0x194d   :  { %v1605_v57 = vpop.permute.xlu1 %1604 }
0x194e   :  { %v1607_v58 = vsel %vm184_vm0, %v1605_v57, %v1591_v42 }
0x19ba   :  { %v1601_v46 = vpop.permute.xlu0 %1600 }
0x19bb   :  { %v1603_v62 = vsel %vm184_vm0, %v1601_v46, %v1598_v44 }
0x19bc   :  { %2298 = vtanh.f32 %v1603_v62 }
0x19c2   :  { %v2299_v0 = vpop.eup %2298 }
0x19c3   :  { %v3096_v1 = vmul.f32 %v2299_v0, %v1607_v58 }
0x19c5   :  { %1610 = vst.msk [vmem:[#allocation2 + $0x8] sm:$0x3] %vm311_vm8, %v3096_v1  ;;  %v1618_v59 = vpack.c.bf16 %v3096_v1, %v3096_v1 }
0x19c7   :  { %2154 = vmatmul.msk.bf16.vlgmr.msrb.gmra.mxu2 %vm230_vm1, %v1618_v59  ;;  %2155 = vmatmul.msk.bf16.vlgmr.msrb.gmra.mxu3 %vm230_vm1, %v1618_v59 }
0x1a4a   :  { %v1631_v4 = vpop.f32.mrf.mxu2  ;;  %v1644_v60 = vpop.f32.mrf.mxu3 }
0x1a4b   :  { %v1650_v29 = vrot.slane %v1631_v4, 6  ;;  %v1651_v10 = vrot.slane %v1644_v60, 6 }
0x1a4d   :  { %v1654_v61 = vadd.f32 %v1650_v29, %v2956_v28  ;;  %v1655_v34 = vadd.f32 %v1651_v10, %v1616_v30 }
0x1a4f   :  { %2300 = vtanh.f32 %v1654_v61 }
0x1a50   :  { %2302 = vtanh.f32 %v1655_v34 }
0x1a52   :  { %v1633_v55 = vpop.f32.mrf.mxu2  ;;  %v1646_v15 = vpop.f32.mrf.mxu3 }
0x1a55   :  { %v2301_v5 = vpop.eup %2300 }
0x1a56   :  { %v2303_v6 = vpop.eup %2302  ;;  %v1658_v3 = vmul.f32 0.5, %v2301_v5 }
0x1a57   :  { %v1659_v7 = vmul.f32 0.5, %v2303_v6 }
0x1a58   :  { %v1660_v11 = vadd.f32 0.5, %v1658_v3 }
0x1a59   :  { %v1661_v9 = vadd.f32 0.5, %v1659_v7 }
0x1a5a   :  { %v1662_v12 = vsel %vm2648_vm6, %v2301_v5, %v1660_v11 }
0x1a5b   :  { %v1663_v8 = vsel %vm2652_vm7, %v2303_v6, %v1661_v9  ;;  %1668 = vrot.lane.b32.xlu2 %v1662_v12, %s2481_s3  ;;  %v1666_v16 = vmul.f32 %v1664_v31, %v1662_v12 }
0x1a5c   :  { %1682 = vrot.lane.b32.xlu0 %v1663_v8, %s2481_s3  ;;  %v1680_v26 = vmul.f32 %v1678_v23, %v1663_v8 }
0x1ab5   :  { %v1669_v18 = vpop.permute.xlu2 %1668 }
0x1ab6   :  { %v1671_v38 = vmul.f32 %v1669_v18, %v1662_v12 }
0x1ab8   :  { %1673 = vrot.lane.b32.xlu1 %v1671_v38, %s2473_s25 }
0x1ac0   :  { %1696 = vrot.lane.b32.xlu1 %v1662_v12, %s2473_s25 }
0x1ace   :  { %v1683_v24 = vpop.permute.xlu0 %1682 }
0x1acf   :  { %v1685_v13 = vmul.f32 %v1683_v24, %v1663_v8 }
0x1ad1   :  { %1687 = vrot.lane.b32.xlu2 %v1685_v13, %s2473_s25 }
0x1b2a   :  { %v1674_v19 = vpop.permute.xlu1 %1673 }
0x1b2b   :  { %v1676_v20 = vadd.f32 %v1674_v19, %v1666_v16  ;;  %v1688_v25 = vpop.permute.xlu2 %1687 }
0x1b2c   :  { %v1690_v21 = vadd.f32 %v1688_v25, %v1680_v26 }
0x1b2d   :  { %1692 = vrot.lane.b32.xlu0 %v1676_v20, %s2482_s27  ;;  %v1756_v10 = vrot.slane %v1676_v20, 6 }
0x1b2e   :  { %v1770_v15 = vrot.slane %v1690_v21, 6 }
0x1b32   :  { %v1697_v35 = vpop.permute.xlu1 %1696 }
0x1b33   :  { %v1699_v39 = vsel %vm184_vm0, %v1697_v35, %v1683_v24 }
0x1b9f   :  { %v1693_v27 = vpop.permute.xlu0 %1692 }
0x1ba0   :  { %v1695_v33 = vsel %vm184_vm0, %v1693_v27, %v1690_v21 }
0x1ba1   :  { %2304 = vtanh.f32 %v1695_v33 }
0x1ba7   :  { %v2305_v36 = vpop.eup %2304 }
0x1ba8   :  { %v3120_v50 = vmul.f32 %v2305_v36, %v1699_v39 }
0x1baa   :  { %1702 = vst.msk [vmem:[#allocation2 + $0x8] sm:$0xc] %vm404_vm9, %v3120_v50  ;;  %v1708_v40 = vpack.c.bf16 %v3120_v50, %v3120_v50 }
0x1bac   :  { %v1710_v41 = vrot.slane %v1708_v40, 1 }
0x1bae   :  { %2156 = vmatmul.msk.bf16.vlgmr.msra.gmra.mxu0 %vm230_vm1, %v1710_v41  ;;  %2157 = vmatmul.msk.bf16.vlgmr.msra.gmra.mxu1 %vm230_vm1, %v1710_v41 }
0x1c2b   :  { %v1723_v42 = vpop.f32.mrf.mxu0  ;;  %v1736_v47 = vpop.f32.mrf.mxu1 }
0x1c2c   :  { %v1742_v51 = vrot.slane %v1723_v42, 4  ;;  %v1743_v52 = vrot.slane %v1736_v47, 4 }
0x1c2e   :  { %v1746_v53 = vadd.f32 %v1742_v51, %v2956_v28  ;;  %v1747_v56 = vadd.f32 %v1743_v52, %v1528_v49 }
0x1c30   :  { %2306 = vtanh.f32 %v1746_v53 }
0x1c31   :  { %2308 = vtanh.f32 %v1747_v56 }
0x1c33   :  { %v1725_v43 = vpop.f32.mrf.mxu0  ;;  %v1738_v48 = vpop.f32.mrf.mxu1 }
0x1c36   :  { %v2307_v54 = vpop.eup %2306 }
0x1c37   :  { %v2309_v44 = vpop.eup %2308  ;;  %v1750_v46 = vmul.f32 0.5, %v2307_v54 }
0x1c38   :  { %v1751_v62 = vmul.f32 0.5, %v2309_v44 }
0x1c39   :  { %v1752_v57 = vadd.f32 0.5, %v1750_v46  ;;  %v2205_v46 = vld [vmem:[%s3234_s7 + $0x18] sm:$0xff] }
0x1c3a   :  { %v1753_v0 = vadd.f32 0.5, %v1751_v62  ;;  %1939 = vmatpush.bf16.msrb.mxu0 %v2205_v46 }
0x1c3b   :  { %v1754_v58 = vsel %vm2648_vm6, %v2307_v54, %v1752_v57 }
0x1c3c   :  { %v1755_v59 = vsel %vm2652_vm7, %v2309_v44, %v1753_v0  ;;  %1760 = vrot.lane.b32.xlu2 %v1754_v58, %s2481_s3  ;;  %v1758_v61 = vmul.f32 %v1756_v10, %v1754_v58 }
0x1c3d   :  { %1774 = vrot.lane.b32.xlu0 %v1755_v59, %s2481_s3  ;;  %v1772_v6 = vmul.f32 %v1770_v15, %v1755_v59 }
0x1c96   :  { %v1761_v49 = vpop.permute.xlu2 %1760 }
0x1c97   :  { %v1763_v4 = vmul.f32 %v1761_v49, %v1754_v58 }
0x1c99   :  { %1765 = vrot.lane.b32.xlu1 %v1763_v4, %s2473_s25 }
0x1ca1   :  { %1788 = vrot.lane.b32.xlu1 %v1754_v58, %s2473_s25 }
0x1caf   :  { %v1775_v60 = vpop.permute.xlu0 %1774 }
0x1cb0   :  { %v1777_v29 = vmul.f32 %v1775_v60, %v1755_v59 }
0x1cb2   :  { %1779 = vrot.lane.b32.xlu2 %v1777_v29, %s2473_s25 }
0x1d0b   :  { %v1766_v34 = vpop.permute.xlu1 %1765 }
0x1d0c   :  { %v1768_v55 = vadd.f32 %v1766_v34, %v1758_v61  ;;  %v1780_v5 = vpop.permute.xlu2 %1779  ;;  %v2204_v61 = vld [vmem:[%s3234_s7 + $0x10] sm:$0xff] }
0x1d0d   :  { %v1782_v3 = vadd.f32 %v1780_v5, %v1772_v6  ;;  %1940 = vmatpush.bf16.msrb.mxu0 %v2204_v61 }
0x1d0e   :  { %1784 = vrot.lane.b32.xlu0 %v1768_v55, %s2482_s27  ;;  %v1848_v63 = vrot.slane %v1768_v55, 6 }
0x1d0f   :  { %v1862_v2 = vrot.slane %v1782_v3, 6 }
0x1d13   :  { %v1789_v9 = vpop.permute.xlu1 %1788 }
0x1d14   :  { %v1791_v8 = vsel %vm184_vm0, %v1789_v9, %v1775_v60  ;;  %v1904_v60 = vld [vmem:[#allocation2] sm:$0xff] }
0x1d80   :  { %v1785_v7 = vpop.permute.xlu0 %1784 }
0x1d81   :  { %v1787_v11 = vsel %vm184_vm0, %v1785_v7, %v1782_v3  ;;  %v2221_v3 = vld [vmem:[%s3235_s8] ss:$0 sm:$0xff] }
0x1d82   :  { %2310 = vtanh.f32 %v1787_v11 }
0x1d88   :  { %v2311_v12 = vpop.eup %2310 }
0x1d89   :  { %v1793_v18 = vmul.f32 %v2311_v12, %v1791_v8 }
0x1d8b   :  { %1794 = vst.msk [vmem:[#allocation2 + $0x8] sm:$0x30] %vm497_vm10, %v1793_v18  ;;  %v1800_v38 = vpack.c.bf16 %v1793_v18, %v1793_v18 }
0x1d8d   :  { %v1802_v24 = vrot.slane %v1800_v38, 2 }
0x1d8f   :  { %2158 = vmatmul.msk.bf16.vlgmr.msra.gmra.mxu2 %vm230_vm1, %v1802_v24  ;;  %2159 = vmatmul.msk.bf16.vlgmr.msra.gmra.mxu3 %vm230_vm1, %v1802_v24 }
0x1e12   :  { %v1815_v13 = vpop.f32.mrf.mxu2  ;;  %v1828_v31 = vpop.f32.mrf.mxu3 }
0x1e13   :  { %v1834_v16 = vrot.slane %v1815_v13, 2  ;;  %v1835_v19 = vrot.slane %v1828_v31, 2 }
0x1e15   :  { %v1838_v20 = vadd.f32 %v1834_v16, %v2956_v28  ;;  %v1839_v23 = vadd.f32 %v1835_v19, %v1616_v30 }
0x1e17   :  { %2312 = vtanh.f32 %v1838_v20 }
0x1e18   :  { %2314 = vtanh.f32 %v1839_v23 }
0x1e1a   :  { %v1817_v25 = vpop.f32.mrf.mxu2  ;;  %v1830_v26 = vpop.f32.mrf.mxu3 }
0x1e1d   :  { %v2313_v21 = vpop.eup %2312 }
0x1e1e   :  { %v2315_v27 = vpop.eup %2314  ;;  %v1842_v33 = vmul.f32 0.5, %v2313_v21 }
0x1e1f   :  { %v1843_v35 = vmul.f32 0.5, %v2315_v27 }
0x1e20   :  { %v1844_v36 = vadd.f32 0.5, %v1842_v33 }
0x1e21   :  { %v1845_v39 = vadd.f32 0.5, %v1843_v35 }
0x1e22   :  { %v1846_v40 = vsel %vm2648_vm6, %v2313_v21, %v1844_v36 }
0x1e23   :  { %v1847_v41 = vsel %vm2652_vm7, %v2315_v27, %v1845_v39  ;;  %1852 = vrot.lane.b32.xlu2 %v1846_v40, %s2481_s3 }
0x1e24   :  { %1866 = vrot.lane.b32.xlu0 %v1847_v41, %s2481_s3  ;;  %v1864_v51 = vmul.f32 %v1862_v2, %v1847_v41 }
0x1e7d   :  { %v1853_v37 = vpop.permute.xlu2 %1852 }
0x1e7e   :  { %v1855_v28 = vmul.f32 %v1853_v37, %v1846_v40 }
0x1e80   :  { %1857 = vrot.lane.b32.xlu1 %v1855_v28, %s2473_s25 }
0x1e88   :  { %1880 = vrot.lane.b32.xlu1 %v1846_v40, %s2473_s25 }
0x1e90   :  { %1431 = vrot.lane.b32.xlu1 %v3041_v45, %s2482_s27  ;;  %v1850_v45 = vmul.f32 %v1848_v63, %v1846_v40 }
0x1e96   :  { %v1867_v30 = vpop.permute.xlu0 %1866 }
0x1e97   :  { %v1869_v42 = vmul.f32 %v1867_v30, %v1847_v41 }
0x1e98   :  { %1704 = vrot.lane.b32.xlu1 %v3120_v50, %s2482_s27 }
0x1e99   :  { %1871 = vrot.lane.b32.xlu2 %v1869_v42, %s2473_s25 }
0x1ea0   :  { %967 = vrot.lane.b32.xlu1 %v2873_v14, %s2482_s27 }
0x1ea1   :  { %1247 = vrot.lane.b32.xlu2 %v2978_v17, %s2482_s27 }
0x1ea9   :  { %1523 = vrot.lane.b32.xlu2 %v3072_v22, %s2482_s27 }
0x1eb1   :  { %1796 = vrot.lane.b32.xlu2 %v1793_v18, %s2482_s27 }
0x1ef2   :  { %v1858_v47 = vpop.permute.xlu1 %1857 }
0x1ef3   :  { %v1860_v52 = vadd.f32 %v1858_v47, %v1850_v45  ;;  %v1872_v50 = vpop.permute.xlu2 %1871 }
0x1ef4   :  { %v1874_v53 = vadd.f32 %v1872_v50, %v1864_v51 }
0x1ef5   :  { %1876 = vrot.lane.b32.xlu0 %v1860_v52, %s2482_s27 }
0x1ef6   :  { %1899 = vrot.lane.b32.xlu2 %v1874_v53, %s2482_s27 }
0x1efa   :  { %v1881_v14 = vpop.permute.xlu1 %1880 }
0x1efb   :  { %v1248_v56 = vpop.permute.xlu2 %1247  ;;  %v1883_v58 = vsel %vm184_vm0, %v1881_v14, %v1867_v30 }
0x1efc   :  { %1250 = vst.msk [vmem:[#allocation3 + $0xe] sm:$0x3] %vm311_vm8, %v1248_v56 }
0x1efd   :  { %1339 = vrot.lane.b32.xlu0 %v3010_v32, %s2482_s27  ;;  %v2203_v32 = vld [vmem:[%s3234_s7 + $0x8] sm:$0xff] }
0x1efe   :  { %1968 = vmatpush.bf16.msrb.mxu1 %v2203_v32 }
0x1f02   :  { %v1432_v17 = vpop.permute.xlu1 %1431 }
0x1f03   :  { %1434 = vst.msk [vmem:[#allocation3 + $0x6] sm:$0x30] %vm497_vm10, %v1432_v17  ;;  %v1524_v22 = vpop.permute.xlu2 %1523 }
0x1f04   :  { %1526 = vst.msk [vmem:[#allocation3 + $0x2] sm:$0xc0] %vm590_vm11, %v1524_v22 }
0x1f05   :  { %1612 = vrot.lane.b32.xlu0 %v3096_v1, %s2482_s27  ;;  %v2202_v1 = vld [vmem:[%s3234_s7] sm:$0xff]  ;;  %s2484_s7 = smov [#allocation13]  }
0x1f06   :  { %1969 = vmatpush.bf16.msrb.mxu1 %v2202_v1  ;;  %s2003_s5 = sshll.u32 %s2484_s7, 4  ;;  %s2004_s5 = int_to_ptr.vmem [resolvable:$true] %s2003_s5 }
0x1f0a   :  { %v1705_v43 = vpop.permute.xlu1 %1704 }
0x1f0b   :  { %1707 = vst.msk [vmem:[#allocation3 + $0x2] sm:$0xc] %vm404_vm9, %v1705_v43  ;;  %v1797_v48 = vpop.permute.xlu2 %1796 }
0x1f0c   :  { %1799 = vst.msk [vmem:[#allocation3 - $0x2] sm:$0x30] %vm497_vm10, %v1797_v48 }
0x1f12   :  { %v968_v54 = vpop.permute.xlu1 %967 }
0x1f13   :  { %971 = vst.msk [vmem:[#allocation13 - $0x4] sm:$0xc0] %vm590_vm11, %v968_v54 }
0x1f50   :  { %v1900_v44 = vpop.permute.xlu2 %1899 }
0x1f51   :  { %1903 = vst.msk [vmem:[#allocation13] sm:$0xc0] %vm590_vm11, %v1900_v44 }
0x1f67   :  { %v1877_v62 = vpop.permute.xlu0 %1876 }
0x1f68   :  { %v1879_v57 = vsel %vm184_vm0, %v1877_v62, %v1874_v53  ;;  %1897 = vst.msk [vmem:[#allocation13 - $0x2] sm:$0xc0] %vm590_vm11, %v1877_v62 }
0x1f69   :  { %2316 = vtanh.f32 %v1879_v57  ;;  %2011 = dma.vmem_to_hbm [thread:$0]  %s2004_s5, 128, %s2006_s0, [#allocation14], %s2473_s25, %s2473_s25, %s2474_s26  }
0x1f6f   :  { %v2317_v0 = vpop.eup %2316  ;;  %v1340_v59 = vpop.permute.xlu0 %1339 }
0x1f70   :  { %1342 = vst.msk [vmem:[#allocation3 + $0xa] sm:$0xc] %vm404_vm9, %v1340_v59  ;;  %v1885_v49 = vmul.f32 %v2317_v0, %v1883_v58 }
0x1f72   :  { %1888 = vrot.lane.b32.xlu0 %v1885_v49, %s2482_s27  ;;  %1886 = vst.msk [vmem:[#allocation2 + $0x8] sm:$0xc0] %vm590_vm11, %v1885_v49 }
0x1f73   :  { %1893 = vst.msk [vmem:[#allocation12 - $0x2] sm:$0xc0] %vm590_vm11, %v1885_v49 }
0x1f77   :  { %v1613_v4 = vpop.permute.xlu0 %1612  ;;  %v1908_v15 = vld [vmem:[#allocation3 + $0x8] sm:$0xff] }
0x1f78   :  { %1615 = vst.msk [vmem:[#allocation3 + $0x6] sm:$0x3] %vm311_vm8, %v1613_v4 }
0x1f79   :  { %v1905_v29 = vld [vmem:[#allocation2 + $0x8] sm:$0xff] }
0x1f7a   :  { %v1906_v10 = vpack.c.bf16 %v1905_v29, %v1904_v60 }
0x1f7c   :  { %2177 = vmatmul.msk.bf16.vlgmr.msrb.gmra.mxu1 %vm184_vm0, %v1906_v10 }
0x1fe4   :  { %v1889_v34 = vpop.permute.xlu0 %1888 }
0x1fe5   :  { %1891 = vst.msk [vmem:[#allocation3 - $0x6] sm:$0xc0] %vm590_vm11, %v1889_v34 }
0x1fe6   :  { %1895 = vst.msk [vmem:[#allocation12] sm:$0xc0] %vm590_vm11, %v1889_v34 }
0x1fe7   :  { %1998 = dma.vmem_to_hbm [thread:$0]  %s1991_s17, 128, %s1993_s4, [#allocation6], %s2473_s25, %s2473_s25, %s2474_s26  }
0x1fec   :  { %v1907_v55 = vld [vmem:[#allocation3] sm:$0xff] }
0x1fed   :  { %v1909_v5 = vpack.c.bf16 %v1908_v15, %v1907_v55 }
0x1fef   :  { %2168 = vmatmul.msk.bf16.vlgmr.msrb.gmra.mxu0 %vm184_vm0, %v1909_v5 }
0x1ff9   :  { %v1971_v6 = vpop.f32.mrf.mxu1 }
0x2001   :  { %v1973_v12 = vpop.f32.mrf.mxu1 }
0x206c   :  { %v1942_v7 = vpop.f32.mrf.mxu0 }
0x206d   :  { %v1972_v11 = vadd.f32 %v1971_v6, %v1942_v7 }
0x206f   :  { %v1980_v9 = vadd.f32 %v2221_v3, %v1972_v11 }
0x2071   :  { %1982 = vst [vmem:[%s3236_s9] sm:$0xff] %v1980_v9 }
0x2074   :  { %v1944_v8 = vpop.f32.mrf.mxu0 }
0x2075   :  { %v1974_v18 = vadd.f32 %v1973_v12, %v1944_v8 }
0x2077   :  { %v1981_v38 = vadd.f32 %v2221_v3, %v1974_v18 }
0x2079   :  { %1983 = vst [vmem:[%s3236_s9 + $0x8] sm:$0xff] %v1981_v38 }
0x207a   :  { %2468 = dma.done.wait [#allocation6], 128  }
0x207b   :  { %2469 = vsyncadd [#allocation6], 4294967168 }
0x207c   :  { %2470 = dma.done.wait [#allocation14], 128  }
0x207d   :  { %2471 = vsyncadd [#allocation14], 4294967168 }
0x207e   :  { %2022 = vsyncpa [#allocation5], 1 }
0x207f   :  { %2023 = vsyncpa [#allocation8], 1 }
0x2080   :  { %2024 = vsyncpa [#allocation11], 1 }
0x2081   :  { %2025 = vsyncpa [#allocation6], 1 }
0x2082   :  { %2026 = vsyncpa [#allocation14], 1 }

</bundles_post_ra>
